<compile_context>
chip_gen: v6e
topology: v6e:2x2x1
jax: 0.10.0
libtpu: 0.0.40
codegen_flags: <defaults>
</compile_context>

<pallas_src>
import numpy as np

import jax
import jax.numpy as jnp
from jax.experimental import pallas as pl
from jax.experimental.pallas import tpu as pltpu


_VMEM_SPEC = pl.BlockSpec(memory_space=pltpu.MemorySpace.VMEM)


# ----------------------------------------------------------------------------
# Fused kernel: GlstmConv x2 + Linear + Softmax
#   x_ref     (T*B, F)        time-major flattened input (row = t*B + (b*N + n))
#   wih1_ref  (F,  4*H1)      fused-gate input weights, gate order [i | f | g | o]
#   whh1_ref  (H1, 4*H1)      fused-gate recurrent weights
#   b1_ref    (1,  H1)        GlstmConv bias (layer 1)
#   adj_ref   (B,  B)         kron(I_bs, A_norm)   (block-diagonal normalized adjacency)
#   wih2_ref  (H1, 4*H2)
#   whh2_ref  (H2, 4*H2)
#   b2_ref    (1,  H2)
#   lin_w_ref (N*H2, D_out)   classifier weight (pre-transposed)
#   lin_b_ref (1,  D_out)
#   out_ref   (bs, D_out)     softmax probabilities
#   scratch:  gx_ref (T*B, 4*H1), x2_ref (T*B, H1), feat_ref (bs, N*H2)
# ----------------------------------------------------------------------------
def grnn_kernel(x_ref, wih1_ref, whh1_ref, b1_ref, adj_ref,
                wih2_ref, whh2_ref, b2_ref, lin_w_ref, lin_b_ref,
                out_ref, gx_ref, x2_ref, feat_ref):
    TB = x_ref.shape[0]
    B = adj_ref.shape[0]
    T = TB // B
    H2 = whh2_ref.shape[0]
    bs = feat_ref.shape[0]
    N = B // bs

    adj = adj_ref[...]                                        # hoisted, reused by both layers

    def run_layer(whh, h, c, emit):
        # gx_ref holds the whole-sequence fused-gate input projection for this layer.
        H = whh.shape[0]
        for t in range(T):                                    # static unroll (T small)
            r0 = t * B
            pre = gx_ref[r0:r0 + B, :] + jnp.dot(
                h, whh, preferred_element_type=jnp.float32)   # (B, 4H), one MXU push
            i_g = jax.nn.sigmoid(pre[:, 0:H])
            f_g = jax.nn.sigmoid(pre[:, H:2 * H])
            g_g = jnp.tanh(pre[:, 2 * H:3 * H])
            o_g = jax.nn.sigmoid(pre[:, 3 * H:4 * H])
            c = f_g * c + i_g * g_g
            h = o_g * jnp.tanh(c)
            if emit is not None:
                emit(r0, h)
        return h, c

    # ---- layer 1: one whole-sequence fused-gate input projection -------------------
    gx_ref[...] = jnp.dot(x_ref[...], wih1_ref[...],
                          preferred_element_type=jnp.float32)
    whh1 = whh1_ref[...]                                      # hoisted out of the T loop
    b1 = b1_ref[...]
    H1 = whh1.shape[0]

    def emit1(r0, h):
        # Per-step graph aggregation + bias + ReLU -> layer-2 input scratch.
        # These (B,B)@(B,H1) matmuls sit off the recurrence's serial chain.
        x2_ref[r0:r0 + B, :] = jnp.maximum(
            jnp.dot(adj, h, preferred_element_type=jnp.float32) + b1, 0.0)

    hn, cn = run_layer(whh1,
                       jnp.zeros((B, H1), jnp.float32),
                       jnp.zeros((B, H1), jnp.float32),
                       emit1)

    # ---- layer 2: reuse gx scratch (H1 == H2 handoff), seeded with layer-1 state ---
    gx_ref[...] = jnp.dot(x2_ref[...], wih2_ref[...],
                          preferred_element_type=jnp.float32)
    whh2 = whh2_ref[...]
    h2, _ = run_layer(whh2, hn, cn, None)

    # Only the last time step feeds the classifier head.
    agg = jnp.dot(adj, h2, preferred_element_type=jnp.float32) + b2_ref[...]   # (B, H2)

    # ---- fused head: lane-dense (bs, N*H2) features -> Linear -> Softmax -----------
    for b in range(bs):                                       # tiny static scatter
        for n in range(N):
            r = b * N + n
            feat_ref[b:b + 1, n * H2:(n + 1) * H2] = agg[r:r + 1, :]
    z = jnp.dot(feat_ref[...], lin_w_ref[...],
                preferred_element_type=jnp.float32) + lin_b_ref[...]
    z = z - jnp.max(z, axis=-1, keepdims=True)
    e = jnp.exp(z)
    out_ref[...] = e / jnp.sum(e, axis=-1, keepdims=True)     # exact divide: rows sum to 1


def run_grnn_kernel(x_flat, p1, p2, adj_b, lin_w_t, lin_b, *, bs, N, T):
    B = adj_b.shape[0]
    H1 = p1["whh"].shape[0]
    H2 = p2["whh"].shape[0]
    d_out = lin_w_t.shape[1]
    return pl.pallas_call(
        grnn_kernel,
        out_shape=jax.ShapeDtypeStruct((bs, d_out), jnp.float32),
        in_specs=[_VMEM_SPEC] * 10,
        out_specs=_VMEM_SPEC,
        scratch_shapes=[
            pltpu.VMEM((T * B, 4 * H1), jnp.float32),   # gx: fused-gate input projection (reused by both layers)
            pltpu.VMEM((T * B, H1), jnp.float32),       # layer-2 input sequence
            pltpu.VMEM((bs, N * H2), jnp.float32),      # lane-dense head features
        ],
    )(x_flat, p1["wih"], p1["whh"], p1["bias"], adj_b,
      p2["wih"], p2["whh"], p2["bias"], lin_w_t, lin_b)


# ----------------------------------------------------------------------------
# Glue: dense normalized adjacency and full gRNN forward
# ----------------------------------------------------------------------------
def build_norm_adj(edge_index, num_nodes):
    # add_self_loops + degree(col)^-1/2 normalization, densified (plain-JAX glue).
    row, col = edge_index
    loops = jnp.arange(num_nodes, dtype=row.dtype)
    row = jnp.concatenate([row, loops])
    col = jnp.concatenate([col, loops])
    deg = jnp.zeros((num_nodes,), jnp.float32).at[col].add(1.0)
    dinv = jnp.where(deg > 0, deg ** -0.5, 0.0)
    norm = dinv[row] * dinv[col]
    # aggregation at target i over messages from source j:  A[i, j] += norm
    A = jnp.zeros((num_nodes, num_nodes), jnp.float32).at[col, row].add(norm)
    return A


def grnn_forward(params, x, adj):
    bs, N, T, F = x.shape
    p1, p2 = params["layer1"], params["layer2"]
    H1 = p1["whh"].shape[0]
    H2 = p2["whh"].shape[0]
    # layer-1's (h_n, c_n) seed layer 2 (as in the source module), needs matching sizes
    assert H1 == H2 and p2["wih"].shape[0] == H1, "hidden-state handoff needs H1 == H2"
    B = bs * N
    # time-major flattened input: row index = t*B + (b*N + n)
    x_flat = jnp.transpose(x.reshape(B, T, F), (1, 0, 2)).reshape(T * B, F)
    # block-diagonal normalized adjacency for ONE time step (node index only)
    adj_b = jnp.kron(jnp.eye(bs, dtype=jnp.float32), adj)      # (B, B)
    return run_grnn_kernel(x_flat, p1, p2, adj_b,
                           params["lin_w_t"], params["lin_b"], bs=bs, N=N, T=T)


# ----------------------------------------------------------------------------
# Pure-JAX reference (for correctness check)
# ----------------------------------------------------------------------------
def lstm_ref(x_tbf, wih, whh, h0, c0):
    # wih: (F, 4H), whh: (H, 4H); fused gate order i, f, g, o
    H = whh.shape[0]

    def step(carry, x_t):
        h, c = carry
        z = x_t @ wih + h @ whh
        i = jax.nn.sigmoid(z[:, 0:H])
        f = jax.nn.sigmoid(z[:, H:2 * H])
        g = jnp.tanh(z[:, 2 * H:3 * H])
        o = jax.nn.sigmoid(z[:, 3 * H:4 * H])
        c = f * c + i * g
        h = o * jnp.tanh(c)
        return (h, c), h

    (hn, cn), out = jax.lax.scan(step, (h0, c0), x_tbf)
    return out, hn, cn


def glstm_conv_ref(x_bntf, adj, params, h0=None, relu=False):
    bs, N, T, F = x_bntf.shape
    H = params["whh"].shape[0]
    B = bs * N
    x_tbf = jnp.transpose(x_bntf.reshape(B, T, F), (1, 0, 2))
    if h0 is None:
        h0 = (jnp.zeros((B, H), jnp.float32), jnp.zeros((B, H), jnp.float32))
    out, hn, cn = lstm_ref(x_tbf, params["wih"], params["whh"], h0[0], h0[1])
    x_bnth = jnp.transpose(out.reshape(T, bs, N, H), (1, 2, 0, 3))   # (bs, N, T, H)
    agg = jnp.einsum("ij,bjth->bith", adj, x_bnth) + params["bias"][0]
    if relu:
        agg = jnp.maximum(agg, 0.0)
    return agg, (hn, cn)


def grnn_ref(params, x, adj):
    bs = x.shape[0]
    out1, hidden = glstm_conv_ref(x, adj, params["layer1"], None, relu=True)
    out2, _ = glstm_conv_ref(out1, adj, params["layer2"], hidden, relu=False)
    last = out2[:, :, -1, :].reshape(bs, -1)
    z = last @ params["lin_w_t"] + params["lin_b"][0]
    return jax.nn.softmax(z, axis=-1)


# ----------------------------------------------------------------------------
# Deterministic parameter init (mirrors nn.LSTM(bias=False) / nn.Linear)
# ----------------------------------------------------------------------------
def init_params(key, dims, num_nodes):
    f_in, h1, h2, d_out = dims
    k = jax.random.split(key, 6)

    def lstm_layer(k_ih, k_hh, in_c, hid):
        s = 1.0 / np.sqrt(hid)
        return {
            # fused-gate weight slabs (gate order i, f, g, o), pre-transposed for x @ W
            "wih": jax.random.uniform(k_ih, (in_c, 4 * hid), jnp.float32, -s, s),
            "whh": jax.random.uniform(k_hh, (hid, 4 * hid), jnp.float32, -s, s),
            "bias": jnp.zeros((1, hid), jnp.float32),   # GlstmConv bias (zero-init)
        }

    lin_in = h2 * num_nodes
    s_lin = 1.0 / np.sqrt(lin_in)
    return {
        "layer1": lstm_layer(k[0], k[1], f_in, h1),
        "layer2": lstm_layer(k[2], k[3], h1, h2),
        "lin_w_t": jax.random.uniform(k[4], (lin_in, d_out), jnp.float32, -s_lin, s_lin),
        "lin_b": jax.random.uniform(k[5], (1, d_out), jnp.float32, -s_lin, s_lin),
    }


if __name__ == "__main__":
    # small config; dims[1] == dims[2] so layer1's (h_n, c_n) can seed layer2
    bs, N, T = 2, 8, 8
    dims = [4, 16, 16, 8]           # [F_in, H1, H2, D_out]

    key = jax.random.PRNGKey(0)
    k_x, k_p = jax.random.split(key)
    x = jax.random.normal(k_x, (bs, N, T, dims[0]), jnp.float32)

    # deterministic ring graph (both directions) on N nodes
    src = np.arange(N)
    dst = (src + 1) % N
    edge_index = jnp.asarray(
        np.stack([np.concatenate([src, dst]), np.concatenate([dst, src])]), jnp.int32)

    params = init_params(k_p, dims, N)
    adj = build_norm_adj(edge_index, N)

    out = jax.block_until_ready(grnn_forward(params, x, adj))
    ref = jax.block_until_ready(grnn_ref(params, x, adj))

    np.testing.assert_allclose(np.asarray(out), np.asarray(ref), rtol=2e-3, atol=1e-3)
    # softmax uses an exact divide, so rows sum to 1 up to f32 rounding
    np.testing.assert_allclose(np.asarray(out).sum(-1), np.ones(bs), rtol=1e-5, atol=1e-5)

    print("KERNEL_OK")
</pallas_src>

<mosaic_0001>
module attributes {stable_mosaic.version = 11 : i64} {
  func.func @grnn_kernel(%arg0: memref<128x4xf32, #tpu.memory_space<vmem>>, %arg1: memref<4x64xf32, #tpu.memory_space<vmem>>, %arg2: memref<16x64xf32, #tpu.memory_space<vmem>>, %arg3: memref<1x16xf32, #tpu.memory_space<vmem>>, %arg4: memref<16x16xf32, #tpu.memory_space<vmem>>, %arg5: memref<16x64xf32, #tpu.memory_space<vmem>>, %arg6: memref<16x64xf32, #tpu.memory_space<vmem>>, %arg7: memref<1x16xf32, #tpu.memory_space<vmem>>, %arg8: memref<128x8xf32, #tpu.memory_space<vmem>>, %arg9: memref<1x8xf32, #tpu.memory_space<vmem>>, %arg10: memref<2x8xf32, #tpu.memory_space<vmem>>, %arg11: memref<128x64xf32, #tpu.memory_space<vmem>>, %arg12: memref<128x16xf32, #tpu.memory_space<vmem>>, %arg13: memref<2x128xf32, #tpu.memory_space<vmem>>) attributes {dimension_semantics = [], scalar_prefetch = 0 : i64, scratch_operands = 3 : i64, tpu.core_type = #tpu.core_type<tc>} {
    %c0 = arith.constant 0 : index
    %c0_0 = arith.constant 0 : index
    %0 = vector.load %arg4[%c0, %c0_0] : memref<16x16xf32, #tpu.memory_space<vmem>>, vector<16x16xf32>
    %c0_1 = arith.constant 0 : index
    %c0_2 = arith.constant 0 : index
    %1 = vector.load %arg0[%c0_1, %c0_2] : memref<128x4xf32, #tpu.memory_space<vmem>>, vector<128x4xf32>
    %c0_3 = arith.constant 0 : index
    %c0_4 = arith.constant 0 : index
    %2 = vector.load %arg1[%c0_3, %c0_4] : memref<4x64xf32, #tpu.memory_space<vmem>>, vector<4x64xf32>
    %cst = arith.constant dense<0.000000e+00> : vector<128x64xf32>
    %3 = tpu.matmul %1, %2, %cst {dimension_numbers = #tpu.dot_dimension_numbers<[1], [0], [0], [1], [0, 0, 1, 1], [], []>} : vector<128x4xf32>, vector<4x64xf32>, vector<128x64xf32> -> vector<128x64xf32>
    %c0_5 = arith.constant 0 : index
    %c0_6 = arith.constant 0 : index
    %4 = vector.load %arg11[%c0_5, %c0_6] : memref<128x64xf32, #tpu.memory_space<vmem>>, vector<128x64xf32>
    tpu.vector_store %arg11[%c0_5, %c0_6], %3 {strides = array<i32>} : memref<128x64xf32, #tpu.memory_space<vmem>>, vector<128x64xf32>,
    %c0_7 = arith.constant 0 : index
    %c0_8 = arith.constant 0 : index
    %5 = vector.load %arg2[%c0_7, %c0_8] : memref<16x64xf32, #tpu.memory_space<vmem>>, vector<16x64xf32>
    %c0_9 = arith.constant 0 : index
    %c0_10 = arith.constant 0 : index
    %6 = vector.load %arg3[%c0_9, %c0_10] : memref<1x16xf32, #tpu.memory_space<vmem>>, vector<1x16xf32>
    %cst_11 = arith.constant 0.000000e+00 : f32
    %7 = vector.broadcast %cst_11 : f32 to vector<16x16xf32>
    %cst_12 = arith.constant 0.000000e+00 : f32
    %8 = vector.broadcast %cst_12 : f32 to vector<16x16xf32>
    %c0_13 = arith.constant 0 : index
    %c0_14 = arith.constant 0 : index
    %9 = vector.load %arg11[%c0_13, %c0_14] : memref<128x64xf32, #tpu.memory_space<vmem>>, vector<16x64xf32>
    %cst_15 = arith.constant dense<0.000000e+00> : vector<16x64xf32>
    %10 = tpu.matmul %7, %5, %cst_15 {dimension_numbers = #tpu.dot_dimension_numbers<[1], [0], [0], [1], [0, 0, 1, 1], [], []>} : vector<16x16xf32>, vector<16x64xf32>, vector<16x64xf32> -> vector<16x64xf32>
    %11 = arith.addf %9, %10 : vector<16x64xf32>
    %12 = vector.extract_strided_slice %11 {offsets = [0, 0], sizes = [16, 16], strides = [1, 1]} : vector<16x64xf32> to vector<16x16xf32>
    %13 = arith.negf %12 : vector<16x16xf32>
    %14 = math.exp %13 : vector<16x16xf32>
    %cst_16 = arith.constant 1.000000e+00 : f32
    %15 = vector.broadcast %cst_16 : f32 to vector<16x16xf32>
    %16 = arith.addf %15, %14 : vector<16x16xf32>
    %17 = arith.divf %15, %16 : vector<16x16xf32>
    %18 = vector.extract_strided_slice %11 {offsets = [0, 16], sizes = [16, 16], strides = [1, 1]} : vector<16x64xf32> to vector<16x16xf32>
    %19 = arith.negf %18 : vector<16x16xf32>
    %20 = math.exp %19 : vector<16x16xf32>
    %cst_17 = arith.constant 1.000000e+00 : f32
    %21 = vector.broadcast %cst_17 : f32 to vector<16x16xf32>
    %22 = arith.addf %21, %20 : vector<16x16xf32>
    %23 = arith.divf %21, %22 : vector<16x16xf32>
    %24 = vector.extract_strided_slice %11 {offsets = [0, 32], sizes = [16, 16], strides = [1, 1]} : vector<16x64xf32> to vector<16x16xf32>
    %25 = math.tanh %24 : vector<16x16xf32>
    %26 = vector.extract_strided_slice %11 {offsets = [0, 48], sizes = [16, 16], strides = [1, 1]} : vector<16x64xf32> to vector<16x16xf32>
    %27 = arith.negf %26 : vector<16x16xf32>
    %28 = math.exp %27 : vector<16x16xf32>
    %cst_18 = arith.constant 1.000000e+00 : f32
    %29 = vector.broadcast %cst_18 : f32 to vector<16x16xf32>
    %30 = arith.addf %29, %28 : vector<16x16xf32>
    %31 = arith.divf %29, %30 : vector<16x16xf32>
    %32 = arith.mulf %23, %8 : vector<16x16xf32>
    %33 = arith.mulf %17, %25 : vector<16x16xf32>
    %34 = arith.addf %32, %33 : vector<16x16xf32>
    %35 = math.tanh %34 : vector<16x16xf32>
    %36 = arith.mulf %31, %35 : vector<16x16xf32>
    %cst_19 = arith.constant dense<0.000000e+00> : vector<16x16xf32>
    %37 = tpu.matmul %0, %36, %cst_19 {dimension_numbers = #tpu.dot_dimension_numbers<[1], [0], [0], [1], [0, 0, 1, 1], [], []>} : vector<16x16xf32>, vector<16x16xf32>, vector<16x16xf32> -> vector<16x16xf32>
    %38 = vector.broadcast %6 : vector<1x16xf32> to vector<16x16xf32>
    %39 = arith.addf %37, %38 : vector<16x16xf32>
    %cst_20 = arith.constant 0.000000e+00 : f32
    %40 = vector.broadcast %cst_20 : f32 to vector<16x16xf32>
    %41 = arith.maximumf %39, %40 : vector<16x16xf32>
    %c0_21 = arith.constant 0 : index
    %c0_22 = arith.constant 0 : index
    %42 = vector.load %arg12[%c0_21, %c0_22] : memref<128x16xf32, #tpu.memory_space<vmem>>, vector<16x16xf32>
    tpu.vector_store %arg12[%c0_21, %c0_22], %41 {strides = array<i32>} : memref<128x16xf32, #tpu.memory_space<vmem>>, vector<16x16xf32>,
    %c16 = arith.constant 16 : index
    %c0_23 = arith.constant 0 : index
    %43 = vector.load %arg11[%c16, %c0_23] : memref<128x64xf32, #tpu.memory_space<vmem>>, vector<16x64xf32>
    %cst_24 = arith.constant dense<0.000000e+00> : vector<16x64xf32>
    %44 = tpu.matmul %36, %5, %cst_24 {dimension_numbers = #tpu.dot_dimension_numbers<[1], [0], [0], [1], [0, 0, 1, 1], [], []>} : vector<16x16xf32>, vector<16x64xf32>, vector<16x64xf32> -> vector<16x64xf32>
    %45 = arith.addf %43, %44 : vector<16x64xf32>
    %46 = vector.extract_strided_slice %45 {offsets = [0, 0], sizes = [16, 16], strides = [1, 1]} : vector<16x64xf32> to vector<16x16xf32>
    %47 = arith.negf %46 : vector<16x16xf32>
    %48 = math.exp %47 : vector<16x16xf32>
    %cst_25 = arith.constant 1.000000e+00 : f32
    %49 = vector.broadcast %cst_25 : f32 to vector<16x16xf32>
    %50 = arith.addf %49, %48 : vector<16x16xf32>
    %51 = arith.divf %49, %50 : vector<16x16xf32>
    %52 = vector.extract_strided_slice %45 {offsets = [0, 16], sizes = [16, 16], strides = [1, 1]} : vector<16x64xf32> to vector<16x16xf32>
    %53 = arith.negf %52 : vector<16x16xf32>
    %54 = math.exp %53 : vector<16x16xf32>
    %cst_26 = arith.constant 1.000000e+00 : f32
    %55 = vector.broadcast %cst_26 : f32 to vector<16x16xf32>
    %56 = arith.addf %55, %54 : vector<16x16xf32>
    %57 = arith.divf %55, %56 : vector<16x16xf32>
    %58 = vector.extract_strided_slice %45 {offsets = [0, 32], sizes = [16, 16], strides = [1, 1]} : vector<16x64xf32> to vector<16x16xf32>
    %59 = math.tanh %58 : vector<16x16xf32>
    %60 = vector.extract_strided_slice %45 {offsets = [0, 48], sizes = [16, 16], strides = [1, 1]} : vector<16x64xf32> to vector<16x16xf32>
    %61 = arith.negf %60 : vector<16x16xf32>
    %62 = math.exp %61 : vector<16x16xf32>
    %cst_27 = arith.constant 1.000000e+00 : f32
    %63 = vector.broadcast %cst_27 : f32 to vector<16x16xf32>
    %64 = arith.addf %63, %62 : vector<16x16xf32>
    %65 = arith.divf %63, %64 : vector<16x16xf32>
    %66 = arith.mulf %57, %34 : vector<16x16xf32>
    %67 = arith.mulf %51, %59 : vector<16x16xf32>
    %68 = arith.addf %66, %67 : vector<16x16xf32>
    %69 = math.tanh %68 : vector<16x16xf32>
    %70 = arith.mulf %65, %69 : vector<16x16xf32>
    %cst_28 = arith.constant dense<0.000000e+00> : vector<16x16xf32>
    %71 = tpu.matmul %0, %70, %cst_28 {dimension_numbers = #tpu.dot_dimension_numbers<[1], [0], [0], [1], [0, 0, 1, 1], [], []>} : vector<16x16xf32>, vector<16x16xf32>, vector<16x16xf32> -> vector<16x16xf32>
    %72 = vector.broadcast %6 : vector<1x16xf32> to vector<16x16xf32>
    %73 = arith.addf %71, %72 : vector<16x16xf32>
    %cst_29 = arith.constant 0.000000e+00 : f32
    %74 = vector.broadcast %cst_29 : f32 to vector<16x16xf32>
    %75 = arith.maximumf %73, %74 : vector<16x16xf32>
    %c16_30 = arith.constant 16 : index
    %c0_31 = arith.constant 0 : index
    %76 = vector.load %arg12[%c16_30, %c0_31] : memref<128x16xf32, #tpu.memory_space<vmem>>, vector<16x16xf32>
    tpu.vector_store %arg12[%c16_30, %c0_31], %75 {strides = array<i32>} : memref<128x16xf32, #tpu.memory_space<vmem>>, vector<16x16xf32>,
    %c32 = arith.constant 32 : index
    %c0_32 = arith.constant 0 : index
    %77 = vector.load %arg11[%c32, %c0_32] : memref<128x64xf32, #tpu.memory_space<vmem>>, vector<16x64xf32>
    %cst_33 = arith.constant dense<0.000000e+00> : vector<16x64xf32>
    %78 = tpu.matmul %70, %5, %cst_33 {dimension_numbers = #tpu.dot_dimension_numbers<[1], [0], [0], [1], [0, 0, 1, 1], [], []>} : vector<16x16xf32>, vector<16x64xf32>, vector<16x64xf32> -> vector<16x64xf32>
    %79 = arith.addf %77, %78 : vector<16x64xf32>
    %80 = vector.extract_strided_slice %79 {offsets = [0, 0], sizes = [16, 16], strides = [1, 1]} : vector<16x64xf32> to vector<16x16xf32>
    %81 = arith.negf %80 : vector<16x16xf32>
    %82 = math.exp %81 : vector<16x16xf32>
    %cst_34 = arith.constant 1.000000e+00 : f32
    %83 = vector.broadcast %cst_34 : f32 to vector<16x16xf32>
    %84 = arith.addf %83, %82 : vector<16x16xf32>
    %85 = arith.divf %83, %84 : vector<16x16xf32>
    %86 = vector.extract_strided_slice %79 {offsets = [0, 16], sizes = [16, 16], strides = [1, 1]} : vector<16x64xf32> to vector<16x16xf32>
    %87 = arith.negf %86 : vector<16x16xf32>
    %88 = math.exp %87 : vector<16x16xf32>
    %cst_35 = arith.constant 1.000000e+00 : f32
    %89 = vector.broadcast %cst_35 : f32 to vector<16x16xf32>
    %90 = arith.addf %89, %88 : vector<16x16xf32>
    %91 = arith.divf %89, %90 : vector<16x16xf32>
    %92 = vector.extract_strided_slice %79 {offsets = [0, 32], sizes = [16, 16], strides = [1, 1]} : vector<16x64xf32> to vector<16x16xf32>
    %93 = math.tanh %92 : vector<16x16xf32>
    %94 = vector.extract_strided_slice %79 {offsets = [0, 48], sizes = [16, 16], strides = [1, 1]} : vector<16x64xf32> to vector<16x16xf32>
    %95 = arith.negf %94 : vector<16x16xf32>
    %96 = math.exp %95 : vector<16x16xf32>
    %cst_36 = arith.constant 1.000000e+00 : f32
    %97 = vector.broadcast %cst_36 : f32 to vector<16x16xf32>
    %98 = arith.addf %97, %96 : vector<16x16xf32>
    %99 = arith.divf %97, %98 : vector<16x16xf32>
    %100 = arith.mulf %91, %68 : vector<16x16xf32>
    %101 = arith.mulf %85, %93 : vector<16x16xf32>
    %102 = arith.addf %100, %101 : vector<16x16xf32>
    %103 = math.tanh %102 : vector<16x16xf32>
    %104 = arith.mulf %99, %103 : vector<16x16xf32>
    %cst_37 = arith.constant dense<0.000000e+00> : vector<16x16xf32>
    %105 = tpu.matmul %0, %104, %cst_37 {dimension_numbers = #tpu.dot_dimension_numbers<[1], [0], [0], [1], [0, 0, 1, 1], [], []>} : vector<16x16xf32>, vector<16x16xf32>, vector<16x16xf32> -> vector<16x16xf32>
    %106 = vector.broadcast %6 : vector<1x16xf32> to vector<16x16xf32>
    %107 = arith.addf %105, %106 : vector<16x16xf32>
    %cst_38 = arith.constant 0.000000e+00 : f32
    %108 = vector.broadcast %cst_38 : f32 to vector<16x16xf32>
    %109 = arith.maximumf %107, %108 : vector<16x16xf32>
    %c32_39 = arith.constant 32 : index
    %c0_40 = arith.constant 0 : index
    %110 = vector.load %arg12[%c32_39, %c0_40] : memref<128x16xf32, #tpu.memory_space<vmem>>, vector<16x16xf32>
    tpu.vector_store %arg12[%c32_39, %c0_40], %109 {strides = array<i32>} : memref<128x16xf32, #tpu.memory_space<vmem>>, vector<16x16xf32>,
    %c48 = arith.constant 48 : index
    %c0_41 = arith.constant 0 : index
    %111 = vector.load %arg11[%c48, %c0_41] : memref<128x64xf32, #tpu.memory_space<vmem>>, vector<16x64xf32>
    %cst_42 = arith.constant dense<0.000000e+00> : vector<16x64xf32>
    %112 = tpu.matmul %104, %5, %cst_42 {dimension_numbers = #tpu.dot_dimension_numbers<[1], [0], [0], [1], [0, 0, 1, 1], [], []>} : vector<16x16xf32>, vector<16x64xf32>, vector<16x64xf32> -> vector<16x64xf32>
    %113 = arith.addf %111, %112 : vector<16x64xf32>
    %114 = vector.extract_strided_slice %113 {offsets = [0, 0], sizes = [16, 16], strides = [1, 1]} : vector<16x64xf32> to vector<16x16xf32>
    %115 = arith.negf %114 : vector<16x16xf32>
    %116 = math.exp %115 : vector<16x16xf32>
    %cst_43 = arith.constant 1.000000e+00 : f32
    %117 = vector.broadcast %cst_43 : f32 to vector<16x16xf32>
    %118 = arith.addf %117, %116 : vector<16x16xf32>
    %119 = arith.divf %117, %118 : vector<16x16xf32>
    %120 = vector.extract_strided_slice %113 {offsets = [0, 16], sizes = [16, 16], strides = [1, 1]} : vector<16x64xf32> to vector<16x16xf32>
    %121 = arith.negf %120 : vector<16x16xf32>
    %122 = math.exp %121 : vector<16x16xf32>
    %cst_44 = arith.constant 1.000000e+00 : f32
    %123 = vector.broadcast %cst_44 : f32 to vector<16x16xf32>
    %124 = arith.addf %123, %122 : vector<16x16xf32>
    %125 = arith.divf %123, %124 : vector<16x16xf32>
    %126 = vector.extract_strided_slice %113 {offsets = [0, 32], sizes = [16, 16], strides = [1, 1]} : vector<16x64xf32> to vector<16x16xf32>
    %127 = math.tanh %126 : vector<16x16xf32>
    %128 = vector.extract_strided_slice %113 {offsets = [0, 48], sizes = [16, 16], strides = [1, 1]} : vector<16x64xf32> to vector<16x16xf32>
    %129 = arith.negf %128 : vector<16x16xf32>
    %130 = math.exp %129 : vector<16x16xf32>
    %cst_45 = arith.constant 1.000000e+00 : f32
    %131 = vector.broadcast %cst_45 : f32 to vector<16x16xf32>
    %132 = arith.addf %131, %130 : vector<16x16xf32>
    %133 = arith.divf %131, %132 : vector<16x16xf32>
    %134 = arith.mulf %125, %102 : vector<16x16xf32>
    %135 = arith.mulf %119, %127 : vector<16x16xf32>
    %136 = arith.addf %134, %135 : vector<16x16xf32>
    %137 = math.tanh %136 : vector<16x16xf32>
    %138 = arith.mulf %133, %137 : vector<16x16xf32>
    %cst_46 = arith.constant dense<0.000000e+00> : vector<16x16xf32>
    %139 = tpu.matmul %0, %138, %cst_46 {dimension_numbers = #tpu.dot_dimension_numbers<[1], [0], [0], [1], [0, 0, 1, 1], [], []>} : vector<16x16xf32>, vector<16x16xf32>, vector<16x16xf32> -> vector<16x16xf32>
    %140 = vector.broadcast %6 : vector<1x16xf32> to vector<16x16xf32>
    %141 = arith.addf %139, %140 : vector<16x16xf32>
    %cst_47 = arith.constant 0.000000e+00 : f32
    %142 = vector.broadcast %cst_47 : f32 to vector<16x16xf32>
    %143 = arith.maximumf %141, %142 : vector<16x16xf32>
    %c48_48 = arith.constant 48 : index
    %c0_49 = arith.constant 0 : index
    %144 = vector.load %arg12[%c48_48, %c0_49] : memref<128x16xf32, #tpu.memory_space<vmem>>, vector<16x16xf32>
    tpu.vector_store %arg12[%c48_48, %c0_49], %143 {strides = array<i32>} : memref<128x16xf32, #tpu.memory_space<vmem>>, vector<16x16xf32>,
    %c64 = arith.constant 64 : index
    %c0_50 = arith.constant 0 : index
    %145 = vector.load %arg11[%c64, %c0_50] : memref<128x64xf32, #tpu.memory_space<vmem>>, vector<16x64xf32>
    %cst_51 = arith.constant dense<0.000000e+00> : vector<16x64xf32>
    %146 = tpu.matmul %138, %5, %cst_51 {dimension_numbers = #tpu.dot_dimension_numbers<[1], [0], [0], [1], [0, 0, 1, 1], [], []>} : vector<16x16xf32>, vector<16x64xf32>, vector<16x64xf32> -> vector<16x64xf32>
    %147 = arith.addf %145, %146 : vector<16x64xf32>
    %148 = vector.extract_strided_slice %147 {offsets = [0, 0], sizes = [16, 16], strides = [1, 1]} : vector<16x64xf32> to vector<16x16xf32>
    %149 = arith.negf %148 : vector<16x16xf32>
    %150 = math.exp %149 : vector<16x16xf32>
    %cst_52 = arith.constant 1.000000e+00 : f32
    %151 = vector.broadcast %cst_52 : f32 to vector<16x16xf32>
    %152 = arith.addf %151, %150 : vector<16x16xf32>
    %153 = arith.divf %151, %152 : vector<16x16xf32>
    %154 = vector.extract_strided_slice %147 {offsets = [0, 16], sizes = [16, 16], strides = [1, 1]} : vector<16x64xf32> to vector<16x16xf32>
    %155 = arith.negf %154 : vector<16x16xf32>
    %156 = math.exp %155 : vector<16x16xf32>
    %cst_53 = arith.constant 1.000000e+00 : f32
    %157 = vector.broadcast %cst_53 : f32 to vector<16x16xf32>
    %158 = arith.addf %157, %156 : vector<16x16xf32>
    %159 = arith.divf %157, %158 : vector<16x16xf32>
    %160 = vector.extract_strided_slice %147 {offsets = [0, 32], sizes = [16, 16], strides = [1, 1]} : vector<16x64xf32> to vector<16x16xf32>
    %161 = math.tanh %160 : vector<16x16xf32>
    %162 = vector.extract_strided_slice %147 {offsets = [0, 48], sizes = [16, 16], strides = [1, 1]} : vector<16x64xf32> to vector<16x16xf32>
    %163 = arith.negf %162 : vector<16x16xf32>
    %164 = math.exp %163 : vector<16x16xf32>
    %cst_54 = arith.constant 1.000000e+00 : f32
    %165 = vector.broadcast %cst_54 : f32 to vector<16x16xf32>
    %166 = arith.addf %165, %164 : vector<16x16xf32>
    %167 = arith.divf %165, %166 : vector<16x16xf32>
    %168 = arith.mulf %159, %136 : vector<16x16xf32>
    %169 = arith.mulf %153, %161 : vector<16x16xf32>
    %170 = arith.addf %168, %169 : vector<16x16xf32>
    %171 = math.tanh %170 : vector<16x16xf32>
    %172 = arith.mulf %167, %171 : vector<16x16xf32>
    %cst_55 = arith.constant dense<0.000000e+00> : vector<16x16xf32>
    %173 = tpu.matmul %0, %172, %cst_55 {dimension_numbers = #tpu.dot_dimension_numbers<[1], [0], [0], [1], [0, 0, 1, 1], [], []>} : vector<16x16xf32>, vector<16x16xf32>, vector<16x16xf32> -> vector<16x16xf32>
    %174 = vector.broadcast %6 : vector<1x16xf32> to vector<16x16xf32>
    %175 = arith.addf %173, %174 : vector<16x16xf32>
    %cst_56 = arith.constant 0.000000e+00 : f32
    %176 = vector.broadcast %cst_56 : f32 to vector<16x16xf32>
    %177 = arith.maximumf %175, %176 : vector<16x16xf32>
    %c64_57 = arith.constant 64 : index
    %c0_58 = arith.constant 0 : index
    %178 = vector.load %arg12[%c64_57, %c0_58] : memref<128x16xf32, #tpu.memory_space<vmem>>, vector<16x16xf32>
    tpu.vector_store %arg12[%c64_57, %c0_58], %177 {strides = array<i32>} : memref<128x16xf32, #tpu.memory_space<vmem>>, vector<16x16xf32>,
    %c80 = arith.constant 80 : index
    %c0_59 = arith.constant 0 : index
    %179 = vector.load %arg11[%c80, %c0_59] : memref<128x64xf32, #tpu.memory_space<vmem>>, vector<16x64xf32>
    %cst_60 = arith.constant dense<0.000000e+00> : vector<16x64xf32>
    %180 = tpu.matmul %172, %5, %cst_60 {dimension_numbers = #tpu.dot_dimension_numbers<[1], [0], [0], [1], [0, 0, 1, 1], [], []>} : vector<16x16xf32>, vector<16x64xf32>, vector<16x64xf32> -> vector<16x64xf32>
    %181 = arith.addf %179, %180 : vector<16x64xf32>
    %182 = vector.extract_strided_slice %181 {offsets = [0, 0], sizes = [16, 16], strides = [1, 1]} : vector<16x64xf32> to vector<16x16xf32>
    %183 = arith.negf %182 : vector<16x16xf32>
    %184 = math.exp %183 : vector<16x16xf32>
    %cst_61 = arith.constant 1.000000e+00 : f32
    %185 = vector.broadcast %cst_61 : f32 to vector<16x16xf32>
    %186 = arith.addf %185, %184 : vector<16x16xf32>
    %187 = arith.divf %185, %186 : vector<16x16xf32>
    %188 = vector.extract_strided_slice %181 {offsets = [0, 16], sizes = [16, 16], strides = [1, 1]} : vector<16x64xf32> to vector<16x16xf32>
    %189 = arith.negf %188 : vector<16x16xf32>
    %190 = math.exp %189 : vector<16x16xf32>
    %cst_62 = arith.constant 1.000000e+00 : f32
    %191 = vector.broadcast %cst_62 : f32 to vector<16x16xf32>
    %192 = arith.addf %191, %190 : vector<16x16xf32>
    %193 = arith.divf %191, %192 : vector<16x16xf32>
    %194 = vector.extract_strided_slice %181 {offsets = [0, 32], sizes = [16, 16], strides = [1, 1]} : vector<16x64xf32> to vector<16x16xf32>
    %195 = math.tanh %194 : vector<16x16xf32>
    %196 = vector.extract_strided_slice %181 {offsets = [0, 48], sizes = [16, 16], strides = [1, 1]} : vector<16x64xf32> to vector<16x16xf32>
    %197 = arith.negf %196 : vector<16x16xf32>
    %198 = math.exp %197 : vector<16x16xf32>
    %cst_63 = arith.constant 1.000000e+00 : f32
    %199 = vector.broadcast %cst_63 : f32 to vector<16x16xf32>
    %200 = arith.addf %199, %198 : vector<16x16xf32>
    %201 = arith.divf %199, %200 : vector<16x16xf32>
    %202 = arith.mulf %193, %170 : vector<16x16xf32>
    %203 = arith.mulf %187, %195 : vector<16x16xf32>
    %204 = arith.addf %202, %203 : vector<16x16xf32>
    %205 = math.tanh %204 : vector<16x16xf32>
    %206 = arith.mulf %201, %205 : vector<16x16xf32>
    %cst_64 = arith.constant dense<0.000000e+00> : vector<16x16xf32>
    %207 = tpu.matmul %0, %206, %cst_64 {dimension_numbers = #tpu.dot_dimension_numbers<[1], [0], [0], [1], [0, 0, 1, 1], [], []>} : vector<16x16xf32>, vector<16x16xf32>, vector<16x16xf32> -> vector<16x16xf32>
    %208 = vector.broadcast %6 : vector<1x16xf32> to vector<16x16xf32>
    %209 = arith.addf %207, %208 : vector<16x16xf32>
    %cst_65 = arith.constant 0.000000e+00 : f32
    %210 = vector.broadcast %cst_65 : f32 to vector<16x16xf32>
    %211 = arith.maximumf %209, %210 : vector<16x16xf32>
    %c80_66 = arith.constant 80 : index
    %c0_67 = arith.constant 0 : index
    %212 = vector.load %arg12[%c80_66, %c0_67] : memref<128x16xf32, #tpu.memory_space<vmem>>, vector<16x16xf32>
    tpu.vector_store %arg12[%c80_66, %c0_67], %211 {strides = array<i32>} : memref<128x16xf32, #tpu.memory_space<vmem>>, vector<16x16xf32>,
    %c96 = arith.constant 96 : index
    %c0_68 = arith.constant 0 : index
    %213 = vector.load %arg11[%c96, %c0_68] : memref<128x64xf32, #tpu.memory_space<vmem>>, vector<16x64xf32>
    %cst_69 = arith.constant dense<0.000000e+00> : vector<16x64xf32>
    %214 = tpu.matmul %206, %5, %cst_69 {dimension_numbers = #tpu.dot_dimension_numbers<[1], [0], [0], [1], [0, 0, 1, 1], [], []>} : vector<16x16xf32>, vector<16x64xf32>, vector<16x64xf32> -> vector<16x64xf32>
    %215 = arith.addf %213, %214 : vector<16x64xf32>
    %216 = vector.extract_strided_slice %215 {offsets = [0, 0], sizes = [16, 16], strides = [1, 1]} : vector<16x64xf32> to vector<16x16xf32>
    %217 = arith.negf %216 : vector<16x16xf32>
    %218 = math.exp %217 : vector<16x16xf32>
    %cst_70 = arith.constant 1.000000e+00 : f32
    %219 = vector.broadcast %cst_70 : f32 to vector<16x16xf32>
    %220 = arith.addf %219, %218 : vector<16x16xf32>
    %221 = arith.divf %219, %220 : vector<16x16xf32>
    %222 = vector.extract_strided_slice %215 {offsets = [0, 16], sizes = [16, 16], strides = [1, 1]} : vector<16x64xf32> to vector<16x16xf32>
    %223 = arith.negf %222 : vector<16x16xf32>
    %224 = math.exp %223 : vector<16x16xf32>
    %cst_71 = arith.constant 1.000000e+00 : f32
    %225 = vector.broadcast %cst_71 : f32 to vector<16x16xf32>
    %226 = arith.addf %225, %224 : vector<16x16xf32>
    %227 = arith.divf %225, %226 : vector<16x16xf32>
    %228 = vector.extract_strided_slice %215 {offsets = [0, 32], sizes = [16, 16], strides = [1, 1]} : vector<16x64xf32> to vector<16x16xf32>
    %229 = math.tanh %228 : vector<16x16xf32>
    %230 = vector.extract_strided_slice %215 {offsets = [0, 48], sizes = [16, 16], strides = [1, 1]} : vector<16x64xf32> to vector<16x16xf32>
    %231 = arith.negf %230 : vector<16x16xf32>
    %232 = math.exp %231 : vector<16x16xf32>
    %cst_72 = arith.constant 1.000000e+00 : f32
    %233 = vector.broadcast %cst_72 : f32 to vector<16x16xf32>
    %234 = arith.addf %233, %232 : vector<16x16xf32>
    %235 = arith.divf %233, %234 : vector<16x16xf32>
    %236 = arith.mulf %227, %204 : vector<16x16xf32>
    %237 = arith.mulf %221, %229 : vector<16x16xf32>
    %238 = arith.addf %236, %237 : vector<16x16xf32>
    %239 = math.tanh %238 : vector<16x16xf32>
    %240 = arith.mulf %235, %239 : vector<16x16xf32>
    %cst_73 = arith.constant dense<0.000000e+00> : vector<16x16xf32>
    %241 = tpu.matmul %0, %240, %cst_73 {dimension_numbers = #tpu.dot_dimension_numbers<[1], [0], [0], [1], [0, 0, 1, 1], [], []>} : vector<16x16xf32>, vector<16x16xf32>, vector<16x16xf32> -> vector<16x16xf32>
    %242 = vector.broadcast %6 : vector<1x16xf32> to vector<16x16xf32>
    %243 = arith.addf %241, %242 : vector<16x16xf32>
    %cst_74 = arith.constant 0.000000e+00 : f32
    %244 = vector.broadcast %cst_74 : f32 to vector<16x16xf32>
    %245 = arith.maximumf %243, %244 : vector<16x16xf32>
    %c96_75 = arith.constant 96 : index
    %c0_76 = arith.constant 0 : index
    %246 = vector.load %arg12[%c96_75, %c0_76] : memref<128x16xf32, #tpu.memory_space<vmem>>, vector<16x16xf32>
    tpu.vector_store %arg12[%c96_75, %c0_76], %245 {strides = array<i32>} : memref<128x16xf32, #tpu.memory_space<vmem>>, vector<16x16xf32>,
    %c112 = arith.constant 112 : index
    %c0_77 = arith.constant 0 : index
    %247 = vector.load %arg11[%c112, %c0_77] : memref<128x64xf32, #tpu.memory_space<vmem>>, vector<16x64xf32>
    %cst_78 = arith.constant dense<0.000000e+00> : vector<16x64xf32>
    %248 = tpu.matmul %240, %5, %cst_78 {dimension_numbers = #tpu.dot_dimension_numbers<[1], [0], [0], [1], [0, 0, 1, 1], [], []>} : vector<16x16xf32>, vector<16x64xf32>, vector<16x64xf32> -> vector<16x64xf32>
    %249 = arith.addf %247, %248 : vector<16x64xf32>
    %250 = vector.extract_strided_slice %249 {offsets = [0, 0], sizes = [16, 16], strides = [1, 1]} : vector<16x64xf32> to vector<16x16xf32>
    %251 = arith.negf %250 : vector<16x16xf32>
    %252 = math.exp %251 : vector<16x16xf32>
    %cst_79 = arith.constant 1.000000e+00 : f32
    %253 = vector.broadcast %cst_79 : f32 to vector<16x16xf32>
    %254 = arith.addf %253, %252 : vector<16x16xf32>
    %255 = arith.divf %253, %254 : vector<16x16xf32>
    %256 = vector.extract_strided_slice %249 {offsets = [0, 16], sizes = [16, 16], strides = [1, 1]} : vector<16x64xf32> to vector<16x16xf32>
    %257 = arith.negf %256 : vector<16x16xf32>
    %258 = math.exp %257 : vector<16x16xf32>
    %cst_80 = arith.constant 1.000000e+00 : f32
    %259 = vector.broadcast %cst_80 : f32 to vector<16x16xf32>
    %260 = arith.addf %259, %258 : vector<16x16xf32>
    %261 = arith.divf %259, %260 : vector<16x16xf32>
    %262 = vector.extract_strided_slice %249 {offsets = [0, 32], sizes = [16, 16], strides = [1, 1]} : vector<16x64xf32> to vector<16x16xf32>
    %263 = math.tanh %262 : vector<16x16xf32>
    %264 = vector.extract_strided_slice %249 {offsets = [0, 48], sizes = [16, 16], strides = [1, 1]} : vector<16x64xf32> to vector<16x16xf32>
    %265 = arith.negf %264 : vector<16x16xf32>
    %266 = math.exp %265 : vector<16x16xf32>
    %cst_81 = arith.constant 1.000000e+00 : f32
    %267 = vector.broadcast %cst_81 : f32 to vector<16x16xf32>
    %268 = arith.addf %267, %266 : vector<16x16xf32>
    %269 = arith.divf %267, %268 : vector<16x16xf32>
    %270 = arith.mulf %261, %238 : vector<16x16xf32>
    %271 = arith.mulf %255, %263 : vector<16x16xf32>
    %272 = arith.addf %270, %271 : vector<16x16xf32>
    %273 = math.tanh %272 : vector<16x16xf32>
    %274 = arith.mulf %269, %273 : vector<16x16xf32>
    %cst_82 = arith.constant dense<0.000000e+00> : vector<16x16xf32>
    %275 = tpu.matmul %0, %274, %cst_82 {dimension_numbers = #tpu.dot_dimension_numbers<[1], [0], [0], [1], [0, 0, 1, 1], [], []>} : vector<16x16xf32>, vector<16x16xf32>, vector<16x16xf32> -> vector<16x16xf32>
    %276 = vector.broadcast %6 : vector<1x16xf32> to vector<16x16xf32>
    %277 = arith.addf %275, %276 : vector<16x16xf32>
    %cst_83 = arith.constant 0.000000e+00 : f32
    %278 = vector.broadcast %cst_83 : f32 to vector<16x16xf32>
    %279 = arith.maximumf %277, %278 : vector<16x16xf32>
    %c112_84 = arith.constant 112 : index
    %c0_85 = arith.constant 0 : index
    %280 = vector.load %arg12[%c112_84, %c0_85] : memref<128x16xf32, #tpu.memory_space<vmem>>, vector<16x16xf32>
    tpu.vector_store %arg12[%c112_84, %c0_85], %279 {strides = array<i32>} : memref<128x16xf32, #tpu.memory_space<vmem>>, vector<16x16xf32>,
    %c0_86 = arith.constant 0 : index
    %c0_87 = arith.constant 0 : index
    %281 = vector.load %arg12[%c0_86, %c0_87] : memref<128x16xf32, #tpu.memory_space<vmem>>, vector<128x16xf32>
    %c0_88 = arith.constant 0 : index
    %c0_89 = arith.constant 0 : index
    %282 = vector.load %arg5[%c0_88, %c0_89] : memref<16x64xf32, #tpu.memory_space<vmem>>, vector<16x64xf32>
    %cst_90 = arith.constant dense<0.000000e+00> : vector<128x64xf32>
    %283 = tpu.matmul %281, %282, %cst_90 {dimension_numbers = #tpu.dot_dimension_numbers<[1], [0], [0], [1], [0, 0, 1, 1], [], []>} : vector<128x16xf32>, vector<16x64xf32>, vector<128x64xf32> -> vector<128x64xf32>
    %c0_91 = arith.constant 0 : index
    %c0_92 = arith.constant 0 : index
    %284 = vector.load %arg11[%c0_91, %c0_92] : memref<128x64xf32, #tpu.memory_space<vmem>>, vector<128x64xf32>
    tpu.vector_store %arg11[%c0_91, %c0_92], %283 {strides = array<i32>} : memref<128x64xf32, #tpu.memory_space<vmem>>, vector<128x64xf32>,
    %c0_93 = arith.constant 0 : index
    %c0_94 = arith.constant 0 : index
    %285 = vector.load %arg6[%c0_93, %c0_94] : memref<16x64xf32, #tpu.memory_space<vmem>>, vector<16x64xf32>
    %c0_95 = arith.constant 0 : index
    %c0_96 = arith.constant 0 : index
    %286 = vector.load %arg11[%c0_95, %c0_96] : memref<128x64xf32, #tpu.memory_space<vmem>>, vector<16x64xf32>
    %cst_97 = arith.constant dense<0.000000e+00> : vector<16x64xf32>
    %287 = tpu.matmul %274, %285, %cst_97 {dimension_numbers = #tpu.dot_dimension_numbers<[1], [0], [0], [1], [0, 0, 1, 1], [], []>} : vector<16x16xf32>, vector<16x64xf32>, vector<16x64xf32> -> vector<16x64xf32>
    %288 = arith.addf %286, %287 : vector<16x64xf32>
    %289 = vector.extract_strided_slice %288 {offsets = [0, 0], sizes = [16, 16], strides = [1, 1]} : vector<16x64xf32> to vector<16x16xf32>
    %290 = arith.negf %289 : vector<16x16xf32>
    %291 = math.exp %290 : vector<16x16xf32>
    %cst_98 = arith.constant 1.000000e+00 : f32
    %292 = vector.broadcast %cst_98 : f32 to vector<16x16xf32>
    %293 = arith.addf %292, %291 : vector<16x16xf32>
    %294 = arith.divf %292, %293 : vector<16x16xf32>
    %295 = vector.extract_strided_slice %288 {offsets = [0, 16], sizes = [16, 16], strides = [1, 1]} : vector<16x64xf32> to vector<16x16xf32>
    %296 = arith.negf %295 : vector<16x16xf32>
    %297 = math.exp %296 : vector<16x16xf32>
    %cst_99 = arith.constant 1.000000e+00 : f32
    %298 = vector.broadcast %cst_99 : f32 to vector<16x16xf32>
    %299 = arith.addf %298, %297 : vector<16x16xf32>
    %300 = arith.divf %298, %299 : vector<16x16xf32>
    %301 = vector.extract_strided_slice %288 {offsets = [0, 32], sizes = [16, 16], strides = [1, 1]} : vector<16x64xf32> to vector<16x16xf32>
    %302 = math.tanh %301 : vector<16x16xf32>
    %303 = vector.extract_strided_slice %288 {offsets = [0, 48], sizes = [16, 16], strides = [1, 1]} : vector<16x64xf32> to vector<16x16xf32>
    %304 = arith.negf %303 : vector<16x16xf32>
    %305 = math.exp %304 : vector<16x16xf32>
    %cst_100 = arith.constant 1.000000e+00 : f32
    %306 = vector.broadcast %cst_100 : f32 to vector<16x16xf32>
    %307 = arith.addf %306, %305 : vector<16x16xf32>
    %308 = arith.divf %306, %307 : vector<16x16xf32>
    %309 = arith.mulf %300, %272 : vector<16x16xf32>
    %310 = arith.mulf %294, %302 : vector<16x16xf32>
    %311 = arith.addf %309, %310 : vector<16x16xf32>
    %312 = math.tanh %311 : vector<16x16xf32>
    %313 = arith.mulf %308, %312 : vector<16x16xf32>
    %c16_101 = arith.constant 16 : index
    %c0_102 = arith.constant 0 : index
    %314 = vector.load %arg11[%c16_101, %c0_102] : memref<128x64xf32, #tpu.memory_space<vmem>>, vector<16x64xf32>
    %cst_103 = arith.constant dense<0.000000e+00> : vector<16x64xf32>
    %315 = tpu.matmul %313, %285, %cst_103 {dimension_numbers = #tpu.dot_dimension_numbers<[1], [0], [0], [1], [0, 0, 1, 1], [], []>} : vector<16x16xf32>, vector<16x64xf32>, vector<16x64xf32> -> vector<16x64xf32>
    %316 = arith.addf %314, %315 : vector<16x64xf32>
    %317 = vector.extract_strided_slice %316 {offsets = [0, 0], sizes = [16, 16], strides = [1, 1]} : vector<16x64xf32> to vector<16x16xf32>
    %318 = arith.negf %317 : vector<16x16xf32>
    %319 = math.exp %318 : vector<16x16xf32>
    %cst_104 = arith.constant 1.000000e+00 : f32
    %320 = vector.broadcast %cst_104 : f32 to vector<16x16xf32>
    %321 = arith.addf %320, %319 : vector<16x16xf32>
    %322 = arith.divf %320, %321 : vector<16x16xf32>
    %323 = vector.extract_strided_slice %316 {offsets = [0, 16], sizes = [16, 16], strides = [1, 1]} : vector<16x64xf32> to vector<16x16xf32>
    %324 = arith.negf %323 : vector<16x16xf32>
    %325 = math.exp %324 : vector<16x16xf32>
    %cst_105 = arith.constant 1.000000e+00 : f32
    %326 = vector.broadcast %cst_105 : f32 to vector<16x16xf32>
    %327 = arith.addf %326, %325 : vector<16x16xf32>
    %328 = arith.divf %326, %327 : vector<16x16xf32>
    %329 = vector.extract_strided_slice %316 {offsets = [0, 32], sizes = [16, 16], strides = [1, 1]} : vector<16x64xf32> to vector<16x16xf32>
    %330 = math.tanh %329 : vector<16x16xf32>
    %331 = vector.extract_strided_slice %316 {offsets = [0, 48], sizes = [16, 16], strides = [1, 1]} : vector<16x64xf32> to vector<16x16xf32>
    %332 = arith.negf %331 : vector<16x16xf32>
    %333 = math.exp %332 : vector<16x16xf32>
    %cst_106 = arith.constant 1.000000e+00 : f32
    %334 = vector.broadcast %cst_106 : f32 to vector<16x16xf32>
    %335 = arith.addf %334, %333 : vector<16x16xf32>
    %336 = arith.divf %334, %335 : vector<16x16xf32>
    %337 = arith.mulf %328, %311 : vector<16x16xf32>
    %338 = arith.mulf %322, %330 : vector<16x16xf32>
    %339 = arith.addf %337, %338 : vector<16x16xf32>
    %340 = math.tanh %339 : vector<16x16xf32>
    %341 = arith.mulf %336, %340 : vector<16x16xf32>
    %c32_107 = arith.constant 32 : index
    %c0_108 = arith.constant 0 : index
    %342 = vector.load %arg11[%c32_107, %c0_108] : memref<128x64xf32, #tpu.memory_space<vmem>>, vector<16x64xf32>
    %cst_109 = arith.constant dense<0.000000e+00> : vector<16x64xf32>
    %343 = tpu.matmul %341, %285, %cst_109 {dimension_numbers = #tpu.dot_dimension_numbers<[1], [0], [0], [1], [0, 0, 1, 1], [], []>} : vector<16x16xf32>, vector<16x64xf32>, vector<16x64xf32> -> vector<16x64xf32>
    %344 = arith.addf %342, %343 : vector<16x64xf32>
    %345 = vector.extract_strided_slice %344 {offsets = [0, 0], sizes = [16, 16], strides = [1, 1]} : vector<16x64xf32> to vector<16x16xf32>
    %346 = arith.negf %345 : vector<16x16xf32>
    %347 = math.exp %346 : vector<16x16xf32>
    %cst_110 = arith.constant 1.000000e+00 : f32
    %348 = vector.broadcast %cst_110 : f32 to vector<16x16xf32>
    %349 = arith.addf %348, %347 : vector<16x16xf32>
    %350 = arith.divf %348, %349 : vector<16x16xf32>
    %351 = vector.extract_strided_slice %344 {offsets = [0, 16], sizes = [16, 16], strides = [1, 1]} : vector<16x64xf32> to vector<16x16xf32>
    %352 = arith.negf %351 : vector<16x16xf32>
    %353 = math.exp %352 : vector<16x16xf32>
    %cst_111 = arith.constant 1.000000e+00 : f32
    %354 = vector.broadcast %cst_111 : f32 to vector<16x16xf32>
    %355 = arith.addf %354, %353 : vector<16x16xf32>
    %356 = arith.divf %354, %355 : vector<16x16xf32>
    %357 = vector.extract_strided_slice %344 {offsets = [0, 32], sizes = [16, 16], strides = [1, 1]} : vector<16x64xf32> to vector<16x16xf32>
    %358 = math.tanh %357 : vector<16x16xf32>
    %359 = vector.extract_strided_slice %344 {offsets = [0, 48], sizes = [16, 16], strides = [1, 1]} : vector<16x64xf32> to vector<16x16xf32>
    %360 = arith.negf %359 : vector<16x16xf32>
    %361 = math.exp %360 : vector<16x16xf32>
    %cst_112 = arith.constant 1.000000e+00 : f32
    %362 = vector.broadcast %cst_112 : f32 to vector<16x16xf32>
    %363 = arith.addf %362, %361 : vector<16x16xf32>
    %364 = arith.divf %362, %363 : vector<16x16xf32>
    %365 = arith.mulf %356, %339 : vector<16x16xf32>
    %366 = arith.mulf %350, %358 : vector<16x16xf32>
    %367 = arith.addf %365, %366 : vector<16x16xf32>
    %368 = math.tanh %367 : vector<16x16xf32>
    %369 = arith.mulf %364, %368 : vector<16x16xf32>
    %c48_113 = arith.constant 48 : index
    %c0_114 = arith.constant 0 : index
    %370 = vector.load %arg11[%c48_113, %c0_114] : memref<128x64xf32, #tpu.memory_space<vmem>>, vector<16x64xf32>
    %cst_115 = arith.constant dense<0.000000e+00> : vector<16x64xf32>
    %371 = tpu.matmul %369, %285, %cst_115 {dimension_numbers = #tpu.dot_dimension_numbers<[1], [0], [0], [1], [0, 0, 1, 1], [], []>} : vector<16x16xf32>, vector<16x64xf32>, vector<16x64xf32> -> vector<16x64xf32>
    %372 = arith.addf %370, %371 : vector<16x64xf32>
    %373 = vector.extract_strided_slice %372 {offsets = [0, 0], sizes = [16, 16], strides = [1, 1]} : vector<16x64xf32> to vector<16x16xf32>
    %374 = arith.negf %373 : vector<16x16xf32>
    %375 = math.exp %374 : vector<16x16xf32>
    %cst_116 = arith.constant 1.000000e+00 : f32
    %376 = vector.broadcast %cst_116 : f32 to vector<16x16xf32>
    %377 = arith.addf %376, %375 : vector<16x16xf32>
    %378 = arith.divf %376, %377 : vector<16x16xf32>
    %379 = vector.extract_strided_slice %372 {offsets = [0, 16], sizes = [16, 16], strides = [1, 1]} : vector<16x64xf32> to vector<16x16xf32>
    %380 = arith.negf %379 : vector<16x16xf32>
    %381 = math.exp %380 : vector<16x16xf32>
    %cst_117 = arith.constant 1.000000e+00 : f32
    %382 = vector.broadcast %cst_117 : f32 to vector<16x16xf32>
    %383 = arith.addf %382, %381 : vector<16x16xf32>
    %384 = arith.divf %382, %383 : vector<16x16xf32>
    %385 = vector.extract_strided_slice %372 {offsets = [0, 32], sizes = [16, 16], strides = [1, 1]} : vector<16x64xf32> to vector<16x16xf32>
    %386 = math.tanh %385 : vector<16x16xf32>
    %387 = vector.extract_strided_slice %372 {offsets = [0, 48], sizes = [16, 16], strides = [1, 1]} : vector<16x64xf32> to vector<16x16xf32>
    %388 = arith.negf %387 : vector<16x16xf32>
    %389 = math.exp %388 : vector<16x16xf32>
    %cst_118 = arith.constant 1.000000e+00 : f32
    %390 = vector.broadcast %cst_118 : f32 to vector<16x16xf32>
    %391 = arith.addf %390, %389 : vector<16x16xf32>
    %392 = arith.divf %390, %391 : vector<16x16xf32>
    %393 = arith.mulf %384, %367 : vector<16x16xf32>
    %394 = arith.mulf %378, %386 : vector<16x16xf32>
    %395 = arith.addf %393, %394 : vector<16x16xf32>
    %396 = math.tanh %395 : vector<16x16xf32>
    %397 = arith.mulf %392, %396 : vector<16x16xf32>
    %c64_119 = arith.constant 64 : index
    %c0_120 = arith.constant 0 : index
    %398 = vector.load %arg11[%c64_119, %c0_120] : memref<128x64xf32, #tpu.memory_space<vmem>>, vector<16x64xf32>
    %cst_121 = arith.constant dense<0.000000e+00> : vector<16x64xf32>
    %399 = tpu.matmul %397, %285, %cst_121 {dimension_numbers = #tpu.dot_dimension_numbers<[1], [0], [0], [1], [0, 0, 1, 1], [], []>} : vector<16x16xf32>, vector<16x64xf32>, vector<16x64xf32> -> vector<16x64xf32>
    %400 = arith.addf %398, %399 : vector<16x64xf32>
    %401 = vector.extract_strided_slice %400 {offsets = [0, 0], sizes = [16, 16], strides = [1, 1]} : vector<16x64xf32> to vector<16x16xf32>
    %402 = arith.negf %401 : vector<16x16xf32>
    %403 = math.exp %402 : vector<16x16xf32>
    %cst_122 = arith.constant 1.000000e+00 : f32
    %404 = vector.broadcast %cst_122 : f32 to vector<16x16xf32>
    %405 = arith.addf %404, %403 : vector<16x16xf32>
    %406 = arith.divf %404, %405 : vector<16x16xf32>
    %407 = vector.extract_strided_slice %400 {offsets = [0, 16], sizes = [16, 16], strides = [1, 1]} : vector<16x64xf32> to vector<16x16xf32>
    %408 = arith.negf %407 : vector<16x16xf32>
    %409 = math.exp %408 : vector<16x16xf32>
    %cst_123 = arith.constant 1.000000e+00 : f32
    %410 = vector.broadcast %cst_123 : f32 to vector<16x16xf32>
    %411 = arith.addf %410, %409 : vector<16x16xf32>
    %412 = arith.divf %410, %411 : vector<16x16xf32>
    %413 = vector.extract_strided_slice %400 {offsets = [0, 32], sizes = [16, 16], strides = [1, 1]} : vector<16x64xf32> to vector<16x16xf32>
    %414 = math.tanh %413 : vector<16x16xf32>
    %415 = vector.extract_strided_slice %400 {offsets = [0, 48], sizes = [16, 16], strides = [1, 1]} : vector<16x64xf32> to vector<16x16xf32>
    %416 = arith.negf %415 : vector<16x16xf32>
    %417 = math.exp %416 : vector<16x16xf32>
    %cst_124 = arith.constant 1.000000e+00 : f32
    %418 = vector.broadcast %cst_124 : f32 to vector<16x16xf32>
    %419 = arith.addf %418, %417 : vector<16x16xf32>
    %420 = arith.divf %418, %419 : vector<16x16xf32>
    %421 = arith.mulf %412, %395 : vector<16x16xf32>
    %422 = arith.mulf %406, %414 : vector<16x16xf32>
    %423 = arith.addf %421, %422 : vector<16x16xf32>
    %424 = math.tanh %423 : vector<16x16xf32>
    %425 = arith.mulf %420, %424 : vector<16x16xf32>
    %c80_125 = arith.constant 80 : index
    %c0_126 = arith.constant 0 : index
    %426 = vector.load %arg11[%c80_125, %c0_126] : memref<128x64xf32, #tpu.memory_space<vmem>>, vector<16x64xf32>
    %cst_127 = arith.constant dense<0.000000e+00> : vector<16x64xf32>
    %427 = tpu.matmul %425, %285, %cst_127 {dimension_numbers = #tpu.dot_dimension_numbers<[1], [0], [0], [1], [0, 0, 1, 1], [], []>} : vector<16x16xf32>, vector<16x64xf32>, vector<16x64xf32> -> vector<16x64xf32>
    %428 = arith.addf %426, %427 : vector<16x64xf32>
    %429 = vector.extract_strided_slice %428 {offsets = [0, 0], sizes = [16, 16], strides = [1, 1]} : vector<16x64xf32> to vector<16x16xf32>
    %430 = arith.negf %429 : vector<16x16xf32>
    %431 = math.exp %430 : vector<16x16xf32>
    %cst_128 = arith.constant 1.000000e+00 : f32
    %432 = vector.broadcast %cst_128 : f32 to vector<16x16xf32>
    %433 = arith.addf %432, %431 : vector<16x16xf32>
    %434 = arith.divf %432, %433 : vector<16x16xf32>
    %435 = vector.extract_strided_slice %428 {offsets = [0, 16], sizes = [16, 16], strides = [1, 1]} : vector<16x64xf32> to vector<16x16xf32>
    %436 = arith.negf %435 : vector<16x16xf32>
    %437 = math.exp %436 : vector<16x16xf32>
    %cst_129 = arith.constant 1.000000e+00 : f32
    %438 = vector.broadcast %cst_129 : f32 to vector<16x16xf32>
    %439 = arith.addf %438, %437 : vector<16x16xf32>
    %440 = arith.divf %438, %439 : vector<16x16xf32>
    %441 = vector.extract_strided_slice %428 {offsets = [0, 32], sizes = [16, 16], strides = [1, 1]} : vector<16x64xf32> to vector<16x16xf32>
    %442 = math.tanh %441 : vector<16x16xf32>
    %443 = vector.extract_strided_slice %428 {offsets = [0, 48], sizes = [16, 16], strides = [1, 1]} : vector<16x64xf32> to vector<16x16xf32>
    %444 = arith.negf %443 : vector<16x16xf32>
    %445 = math.exp %444 : vector<16x16xf32>
    %cst_130 = arith.constant 1.000000e+00 : f32
    %446 = vector.broadcast %cst_130 : f32 to vector<16x16xf32>
    %447 = arith.addf %446, %445 : vector<16x16xf32>
    %448 = arith.divf %446, %447 : vector<16x16xf32>
    %449 = arith.mulf %440, %423 : vector<16x16xf32>
    %450 = arith.mulf %434, %442 : vector<16x16xf32>
    %451 = arith.addf %449, %450 : vector<16x16xf32>
    %452 = math.tanh %451 : vector<16x16xf32>
    %453 = arith.mulf %448, %452 : vector<16x16xf32>
    %c96_131 = arith.constant 96 : index
    %c0_132 = arith.constant 0 : index
    %454 = vector.load %arg11[%c96_131, %c0_132] : memref<128x64xf32, #tpu.memory_space<vmem>>, vector<16x64xf32>
    %cst_133 = arith.constant dense<0.000000e+00> : vector<16x64xf32>
    %455 = tpu.matmul %453, %285, %cst_133 {dimension_numbers = #tpu.dot_dimension_numbers<[1], [0], [0], [1], [0, 0, 1, 1], [], []>} : vector<16x16xf32>, vector<16x64xf32>, vector<16x64xf32> -> vector<16x64xf32>
    %456 = arith.addf %454, %455 : vector<16x64xf32>
    %457 = vector.extract_strided_slice %456 {offsets = [0, 0], sizes = [16, 16], strides = [1, 1]} : vector<16x64xf32> to vector<16x16xf32>
    %458 = arith.negf %457 : vector<16x16xf32>
    %459 = math.exp %458 : vector<16x16xf32>
    %cst_134 = arith.constant 1.000000e+00 : f32
    %460 = vector.broadcast %cst_134 : f32 to vector<16x16xf32>
    %461 = arith.addf %460, %459 : vector<16x16xf32>
    %462 = arith.divf %460, %461 : vector<16x16xf32>
    %463 = vector.extract_strided_slice %456 {offsets = [0, 16], sizes = [16, 16], strides = [1, 1]} : vector<16x64xf32> to vector<16x16xf32>
    %464 = arith.negf %463 : vector<16x16xf32>
    %465 = math.exp %464 : vector<16x16xf32>
    %cst_135 = arith.constant 1.000000e+00 : f32
    %466 = vector.broadcast %cst_135 : f32 to vector<16x16xf32>
    %467 = arith.addf %466, %465 : vector<16x16xf32>
    %468 = arith.divf %466, %467 : vector<16x16xf32>
    %469 = vector.extract_strided_slice %456 {offsets = [0, 32], sizes = [16, 16], strides = [1, 1]} : vector<16x64xf32> to vector<16x16xf32>
    %470 = math.tanh %469 : vector<16x16xf32>
    %471 = vector.extract_strided_slice %456 {offsets = [0, 48], sizes = [16, 16], strides = [1, 1]} : vector<16x64xf32> to vector<16x16xf32>
    %472 = arith.negf %471 : vector<16x16xf32>
    %473 = math.exp %472 : vector<16x16xf32>
    %cst_136 = arith.constant 1.000000e+00 : f32
    %474 = vector.broadcast %cst_136 : f32 to vector<16x16xf32>
    %475 = arith.addf %474, %473 : vector<16x16xf32>
    %476 = arith.divf %474, %475 : vector<16x16xf32>
    %477 = arith.mulf %468, %451 : vector<16x16xf32>
    %478 = arith.mulf %462, %470 : vector<16x16xf32>
    %479 = arith.addf %477, %478 : vector<16x16xf32>
    %480 = math.tanh %479 : vector<16x16xf32>
    %481 = arith.mulf %476, %480 : vector<16x16xf32>
    %c112_137 = arith.constant 112 : index
    %c0_138 = arith.constant 0 : index
    %482 = vector.load %arg11[%c112_137, %c0_138] : memref<128x64xf32, #tpu.memory_space<vmem>>, vector<16x64xf32>
    %cst_139 = arith.constant dense<0.000000e+00> : vector<16x64xf32>
    %483 = tpu.matmul %481, %285, %cst_139 {dimension_numbers = #tpu.dot_dimension_numbers<[1], [0], [0], [1], [0, 0, 1, 1], [], []>} : vector<16x16xf32>, vector<16x64xf32>, vector<16x64xf32> -> vector<16x64xf32>
    %484 = arith.addf %482, %483 : vector<16x64xf32>
    %485 = vector.extract_strided_slice %484 {offsets = [0, 0], sizes = [16, 16], strides = [1, 1]} : vector<16x64xf32> to vector<16x16xf32>
    %486 = arith.negf %485 : vector<16x16xf32>
    %487 = math.exp %486 : vector<16x16xf32>
    %cst_140 = arith.constant 1.000000e+00 : f32
    %488 = vector.broadcast %cst_140 : f32 to vector<16x16xf32>
    %489 = arith.addf %488, %487 : vector<16x16xf32>
    %490 = arith.divf %488, %489 : vector<16x16xf32>
    %491 = vector.extract_strided_slice %484 {offsets = [0, 16], sizes = [16, 16], strides = [1, 1]} : vector<16x64xf32> to vector<16x16xf32>
    %492 = arith.negf %491 : vector<16x16xf32>
    %493 = math.exp %492 : vector<16x16xf32>
    %cst_141 = arith.constant 1.000000e+00 : f32
    %494 = vector.broadcast %cst_141 : f32 to vector<16x16xf32>
    %495 = arith.addf %494, %493 : vector<16x16xf32>
    %496 = arith.divf %494, %495 : vector<16x16xf32>
    %497 = vector.extract_strided_slice %484 {offsets = [0, 32], sizes = [16, 16], strides = [1, 1]} : vector<16x64xf32> to vector<16x16xf32>
    %498 = math.tanh %497 : vector<16x16xf32>
    %499 = vector.extract_strided_slice %484 {offsets = [0, 48], sizes = [16, 16], strides = [1, 1]} : vector<16x64xf32> to vector<16x16xf32>
    %500 = arith.negf %499 : vector<16x16xf32>
    %501 = math.exp %500 : vector<16x16xf32>
    %cst_142 = arith.constant 1.000000e+00 : f32
    %502 = vector.broadcast %cst_142 : f32 to vector<16x16xf32>
    %503 = arith.addf %502, %501 : vector<16x16xf32>
    %504 = arith.divf %502, %503 : vector<16x16xf32>
    %505 = arith.mulf %496, %479 : vector<16x16xf32>
    %506 = arith.mulf %490, %498 : vector<16x16xf32>
    %507 = arith.addf %505, %506 : vector<16x16xf32>
    %508 = math.tanh %507 : vector<16x16xf32>
    %509 = arith.mulf %504, %508 : vector<16x16xf32>
    %cst_143 = arith.constant dense<0.000000e+00> : vector<16x16xf32>
    %510 = tpu.matmul %0, %509, %cst_143 {dimension_numbers = #tpu.dot_dimension_numbers<[1], [0], [0], [1], [0, 0, 1, 1], [], []>} : vector<16x16xf32>, vector<16x16xf32>, vector<16x16xf32> -> vector<16x16xf32>
    %c0_144 = arith.constant 0 : index
    %c0_145 = arith.constant 0 : index
    %511 = vector.load %arg7[%c0_144, %c0_145] : memref<1x16xf32, #tpu.memory_space<vmem>>, vector<1x16xf32>
    %512 = vector.broadcast %511 : vector<1x16xf32> to vector<16x16xf32>
    %513 = arith.addf %510, %512 : vector<16x16xf32>
    %514 = vector.extract_strided_slice %513 {offsets = [0, 0], sizes = [1, 16], strides = [1, 1]} : vector<16x16xf32> to vector<1x16xf32>
    %c0_146 = arith.constant 0 : index
    %c0_147 = arith.constant 0 : index
    %515 = vector.load %arg13[%c0_146, %c0_147] : memref<2x128xf32, #tpu.memory_space<vmem>>, vector<1x16xf32>
    tpu.vector_store %arg13[%c0_146, %c0_147], %514 {strides = array<i32>} : memref<2x128xf32, #tpu.memory_space<vmem>>, vector<1x16xf32>,
    %516 = vector.extract_strided_slice %513 {offsets = [1, 0], sizes = [1, 16], strides = [1, 1]} : vector<16x16xf32> to vector<1x16xf32>
    %c0_148 = arith.constant 0 : index
    %c16_149 = arith.constant 16 : index
    %517 = vector.load %arg13[%c0_148, %c16_149] : memref<2x128xf32, #tpu.memory_space<vmem>>, vector<1x16xf32>
    tpu.vector_store %arg13[%c0_148, %c16_149], %516 {strides = array<i32>} : memref<2x128xf32, #tpu.memory_space<vmem>>, vector<1x16xf32>,
    %518 = vector.extract_strided_slice %513 {offsets = [2, 0], sizes = [1, 16], strides = [1, 1]} : vector<16x16xf32> to vector<1x16xf32>
    %c0_150 = arith.constant 0 : index
    %c32_151 = arith.constant 32 : index
    %519 = vector.load %arg13[%c0_150, %c32_151] : memref<2x128xf32, #tpu.memory_space<vmem>>, vector<1x16xf32>
    tpu.vector_store %arg13[%c0_150, %c32_151], %518 {strides = array<i32>} : memref<2x128xf32, #tpu.memory_space<vmem>>, vector<1x16xf32>,
    %520 = vector.extract_strided_slice %513 {offsets = [3, 0], sizes = [1, 16], strides = [1, 1]} : vector<16x16xf32> to vector<1x16xf32>
    %c0_152 = arith.constant 0 : index
    %c48_153 = arith.constant 48 : index
    %521 = vector.load %arg13[%c0_152, %c48_153] : memref<2x128xf32, #tpu.memory_space<vmem>>, vector<1x16xf32>
    tpu.vector_store %arg13[%c0_152, %c48_153], %520 {strides = array<i32>} : memref<2x128xf32, #tpu.memory_space<vmem>>, vector<1x16xf32>,
    %522 = vector.extract_strided_slice %513 {offsets = [4, 0], sizes = [1, 16], strides = [1, 1]} : vector<16x16xf32> to vector<1x16xf32>
    %c0_154 = arith.constant 0 : index
    %c64_155 = arith.constant 64 : index
    %523 = vector.load %arg13[%c0_154, %c64_155] : memref<2x128xf32, #tpu.memory_space<vmem>>, vector<1x16xf32>
    tpu.vector_store %arg13[%c0_154, %c64_155], %522 {strides = array<i32>} : memref<2x128xf32, #tpu.memory_space<vmem>>, vector<1x16xf32>,
    %524 = vector.extract_strided_slice %513 {offsets = [5, 0], sizes = [1, 16], strides = [1, 1]} : vector<16x16xf32> to vector<1x16xf32>
    %c0_156 = arith.constant 0 : index
    %c80_157 = arith.constant 80 : index
    %525 = vector.load %arg13[%c0_156, %c80_157] : memref<2x128xf32, #tpu.memory_space<vmem>>, vector<1x16xf32>
    tpu.vector_store %arg13[%c0_156, %c80_157], %524 {strides = array<i32>} : memref<2x128xf32, #tpu.memory_space<vmem>>, vector<1x16xf32>,
    %526 = vector.extract_strided_slice %513 {offsets = [6, 0], sizes = [1, 16], strides = [1, 1]} : vector<16x16xf32> to vector<1x16xf32>
    %c0_158 = arith.constant 0 : index
    %c96_159 = arith.constant 96 : index
    %527 = vector.load %arg13[%c0_158, %c96_159] : memref<2x128xf32, #tpu.memory_space<vmem>>, vector<1x16xf32>
    tpu.vector_store %arg13[%c0_158, %c96_159], %526 {strides = array<i32>} : memref<2x128xf32, #tpu.memory_space<vmem>>, vector<1x16xf32>,
    %528 = vector.extract_strided_slice %513 {offsets = [7, 0], sizes = [1, 16], strides = [1, 1]} : vector<16x16xf32> to vector<1x16xf32>
    %c0_160 = arith.constant 0 : index
    %c112_161 = arith.constant 112 : index
    %529 = vector.load %arg13[%c0_160, %c112_161] : memref<2x128xf32, #tpu.memory_space<vmem>>, vector<1x16xf32>
    tpu.vector_store %arg13[%c0_160, %c112_161], %528 {strides = array<i32>} : memref<2x128xf32, #tpu.memory_space<vmem>>, vector<1x16xf32>,
    %530 = vector.extract_strided_slice %513 {offsets = [8, 0], sizes = [1, 16], strides = [1, 1]} : vector<16x16xf32> to vector<1x16xf32>
    %c1 = arith.constant 1 : index
    %c0_162 = arith.constant 0 : index
    %531 = vector.load %arg13[%c1, %c0_162] : memref<2x128xf32, #tpu.memory_space<vmem>>, vector<1x16xf32>
    tpu.vector_store %arg13[%c1, %c0_162], %530 {strides = array<i32>} : memref<2x128xf32, #tpu.memory_space<vmem>>, vector<1x16xf32>,
    %532 = vector.extract_strided_slice %513 {offsets = [9, 0], sizes = [1, 16], strides = [1, 1]} : vector<16x16xf32> to vector<1x16xf32>
    %c1_163 = arith.constant 1 : index
    %c16_164 = arith.constant 16 : index
    %533 = vector.load %arg13[%c1_163, %c16_164] : memref<2x128xf32, #tpu.memory_space<vmem>>, vector<1x16xf32>
    tpu.vector_store %arg13[%c1_163, %c16_164], %532 {strides = array<i32>} : memref<2x128xf32, #tpu.memory_space<vmem>>, vector<1x16xf32>,
    %534 = vector.extract_strided_slice %513 {offsets = [10, 0], sizes = [1, 16], strides = [1, 1]} : vector<16x16xf32> to vector<1x16xf32>
    %c1_165 = arith.constant 1 : index
    %c32_166 = arith.constant 32 : index
    %535 = vector.load %arg13[%c1_165, %c32_166] : memref<2x128xf32, #tpu.memory_space<vmem>>, vector<1x16xf32>
    tpu.vector_store %arg13[%c1_165, %c32_166], %534 {strides = array<i32>} : memref<2x128xf32, #tpu.memory_space<vmem>>, vector<1x16xf32>,
    %536 = vector.extract_strided_slice %513 {offsets = [11, 0], sizes = [1, 16], strides = [1, 1]} : vector<16x16xf32> to vector<1x16xf32>
    %c1_167 = arith.constant 1 : index
    %c48_168 = arith.constant 48 : index
    %537 = vector.load %arg13[%c1_167, %c48_168] : memref<2x128xf32, #tpu.memory_space<vmem>>, vector<1x16xf32>
    tpu.vector_store %arg13[%c1_167, %c48_168], %536 {strides = array<i32>} : memref<2x128xf32, #tpu.memory_space<vmem>>, vector<1x16xf32>,
    %538 = vector.extract_strided_slice %513 {offsets = [12, 0], sizes = [1, 16], strides = [1, 1]} : vector<16x16xf32> to vector<1x16xf32>
    %c1_169 = arith.constant 1 : index
    %c64_170 = arith.constant 64 : index
    %539 = vector.load %arg13[%c1_169, %c64_170] : memref<2x128xf32, #tpu.memory_space<vmem>>, vector<1x16xf32>
    tpu.vector_store %arg13[%c1_169, %c64_170], %538 {strides = array<i32>} : memref<2x128xf32, #tpu.memory_space<vmem>>, vector<1x16xf32>,
    %540 = vector.extract_strided_slice %513 {offsets = [13, 0], sizes = [1, 16], strides = [1, 1]} : vector<16x16xf32> to vector<1x16xf32>
    %c1_171 = arith.constant 1 : index
    %c80_172 = arith.constant 80 : index
    %541 = vector.load %arg13[%c1_171, %c80_172] : memref<2x128xf32, #tpu.memory_space<vmem>>, vector<1x16xf32>
    tpu.vector_store %arg13[%c1_171, %c80_172], %540 {strides = array<i32>} : memref<2x128xf32, #tpu.memory_space<vmem>>, vector<1x16xf32>,
    %542 = vector.extract_strided_slice %513 {offsets = [14, 0], sizes = [1, 16], strides = [1, 1]} : vector<16x16xf32> to vector<1x16xf32>
    %c1_173 = arith.constant 1 : index
    %c96_174 = arith.constant 96 : index
    %543 = vector.load %arg13[%c1_173, %c96_174] : memref<2x128xf32, #tpu.memory_space<vmem>>, vector<1x16xf32>
    tpu.vector_store %arg13[%c1_173, %c96_174], %542 {strides = array<i32>} : memref<2x128xf32, #tpu.memory_space<vmem>>, vector<1x16xf32>,
    %544 = vector.extract_strided_slice %513 {offsets = [15, 0], sizes = [1, 16], strides = [1, 1]} : vector<16x16xf32> to vector<1x16xf32>
    %c1_175 = arith.constant 1 : index
    %c112_176 = arith.constant 112 : index
    %545 = vector.load %arg13[%c1_175, %c112_176] : memref<2x128xf32, #tpu.memory_space<vmem>>, vector<1x16xf32>
    tpu.vector_store %arg13[%c1_175, %c112_176], %544 {strides = array<i32>} : memref<2x128xf32, #tpu.memory_space<vmem>>, vector<1x16xf32>,
    %c0_177 = arith.constant 0 : index
    %c0_178 = arith.constant 0 : index
    %546 = vector.load %arg13[%c0_177, %c0_178] : memref<2x128xf32, #tpu.memory_space<vmem>>, vector<2x128xf32>
    %c0_179 = arith.constant 0 : index
    %c0_180 = arith.constant 0 : index
    %547 = vector.load %arg8[%c0_179, %c0_180] : memref<128x8xf32, #tpu.memory_space<vmem>>, vector<128x8xf32>
    %cst_181 = arith.constant dense<0.000000e+00> : vector<2x8xf32>
    %548 = tpu.matmul %546, %547, %cst_181 {dimension_numbers = #tpu.dot_dimension_numbers<[1], [0], [0], [1], [0, 0, 1, 1], [], []>} : vector<2x128xf32>, vector<128x8xf32>, vector<2x8xf32> -> vector<2x8xf32>
    %c0_182 = arith.constant 0 : index
    %c0_183 = arith.constant 0 : index
    %549 = vector.load %arg9[%c0_182, %c0_183] : memref<1x8xf32, #tpu.memory_space<vmem>>, vector<1x8xf32>
    %550 = vector.broadcast %549 : vector<1x8xf32> to vector<2x8xf32>
    %551 = arith.addf %548, %550 : vector<2x8xf32>
    %cst_184 = arith.constant dense<0xFF800000> : vector<2xf32>
    %552 = vector.multi_reduction <maximumf>, %551, %cst_184 [1] : vector<2x8xf32> to vector<2xf32>
    %553 = vector.shape_cast %552 : vector<2xf32> to vector<2x1xf32>
    %554 = vector.broadcast %553 : vector<2x1xf32> to vector<2x8xf32>
    %555 = arith.subf %551, %554 : vector<2x8xf32>
    %556 = math.exp %555 : vector<2x8xf32>
    %cst_185 = arith.constant dense<0.000000e+00> : vector<2xf32>
    %557 = vector.multi_reduction <add>, %556, %cst_185 [1] : vector<2x8xf32> to vector<2xf32>
    %558 = vector.shape_cast %557 : vector<2xf32> to vector<2x1xf32>
    %559 = vector.broadcast %558 : vector<2x1xf32> to vector<2x8xf32>
    %560 = arith.divf %556, %559 : vector<2x8xf32>
    %c0_186 = arith.constant 0 : index
    %c0_187 = arith.constant 0 : index
    %561 = vector.load %arg10[%c0_186, %c0_187] : memref<2x8xf32, #tpu.memory_space<vmem>>, vector<2x8xf32>
    tpu.vector_store %arg10[%c0_186, %c0_187], %560 {strides = array<i32>} : memref<2x8xf32, #tpu.memory_space<vmem>>, vector<2x8xf32>,
    return
  }
}

</mosaic_0001>

<bundles_post_ra>
// kernel: tpu_custom_call.1
= control target key start
LH: loop header
LB: loop body
LE: loop exit
PB: predicated region body
PF: predicated region fallthrough
CT: control target
= control target key end

     0   :  { %vm104_vm0 = vcmask 1043456   ;;  %vm55_vm1 = vcmask 31744   ;;  %s5102_s0 = inlined_call_operand.vmem [shape: f32[128,4], index: 0, kind: input, shape index: {}]   ;;  %s5103_s1 = inlined_call_operand.vmem [shape: f32[4,64], index: 1, kind: input, shape index: {}]   ;;  %s5104_s2 = inlined_call_operand.vmem [shape: f32[16,64], index: 2, kind: input, shape index: {}]   ;;  %s5105_s3 = inlined_call_operand.vmem [shape: f32[1,16], index: 3, kind: input, shape index: {}]   ;;  %s5106_s4 = inlined_call_operand.vmem [shape: f32[16,16], index: 4, kind: input, shape index: {}]   ;;  %s5107_s5 = inlined_call_operand.vmem [shape: f32[16,64], index: 5, kind: input, shape index: {}]   ;;  %s5108_s6 = inlined_call_operand.vmem [shape: f32[16,64], index: 6, kind: input, shape index: {}]   ;;  %s5109_s7 = inlined_call_operand.vmem [shape: f32[1,16], index: 7, kind: input, shape index: {}]   ;;  %s5110_s8 = inlined_call_operand.vmem [shape: f32[128,8], index: 8, kind: input, shape index: {}]   ;;  %s5111_s9 = inlined_call_operand.vmem [shape: f32[1,8], index: 9, kind: input, shape index: {}]   ;;  %s5112_s10 = inlined_call_operand.hbm [shape: f32[2,8], index: 10, kind: output, shape index: {}]  }
   0x1   :  { %v54_v0 = vld [vmem:[%s5103_s1] sm:$0xf]  ;;  %v39_v2 = vld [vmem:[%s5102_s0 + $0x8] sm:$0xff]  ;;  %v40_v3 = vld [vmem:[%s5102_s0 + $0x10] sm:$0xff] }
   0x2   :  { %v38_v1 = vld [vmem:[%s5102_s0] sm:$0xff]  ;;  %3895 = vmatprep.subr.msk.mxu0 %vm104_vm0, %v54_v0  ;;  %v41_v4 = vld [vmem:[%s5102_s0 + $0x18] sm:$0xff]  ;;  %v4543_v6 = vld [vmem:[%s5104_s2 + $0x8] sm:$0xff] }
   0x3   :  { %3897 = vmatprep.mubr.msk.f32.mxu0 %vm55_vm1, %v38_v1  ;;  %3896 = vmatpush3.msk.msra.mxu0 %vm104_vm0, %v54_v0  ;;  %v42_v5 = vld [vmem:[%s5102_s0 + $0x20] sm:$0xff] }
   0x4   :  { %3898 = vmatmul.mubr.msk.f32.vlgmr.msra.gmra.mxu0 %vm55_vm1, %v39_v2  ;;  %3921 = vmatprep.subr.mxu0 %v4543_v6  ;;  %v4549_v7 = vld [vmem:[%s5104_s2] sm:$0xff] }
   0x5   :  { %3900 = vmatprep.mubr.msk.f32.mxu0 %vm55_vm1, %v40_v3  ;;  %3949 = vmatprep.subr.mxu1 %v4543_v6 }
   0x6   :  { %15 = vsyncpa [#allocation6], 0  ;;  %3950 = vmatpush3.msra.mxu1 %v4543_v6  ;;  %v43_v8 = vld [vmem:[%s5102_s0 + $0x28] sm:$0xff]  ;;  %3922 = vmatpush3.msra.mxu0 %v4543_v6  ;;  %v44_v9 = vld [vmem:[%s5102_s0 + $0x30] sm:$0xff]  ;;  %v4454_v19 = vmov 0.0   ;;  %vm253_vm2 = vcmask 523264  }
   0x7   :  { %3923 = vmatprep.subr.mxu0 %v4549_v7  ;;  %3951 = vmatprep.subr.mxu1 %v4549_v7  ;;  %v45_v10 = vld [vmem:[%s5102_s0 + $0x38] sm:$0xff]  ;;  %v46_v11 = vld [vmem:[%s5102_s0 + $0x40] sm:$0xff]  ;;  %v47_v12 = vld [vmem:[%s5102_s0 + $0x48] sm:$0xff]  ;;  %s4456_s28 = smov 16   ;;  %s4457_s29 = smov 32   ;;  %vm275_vm3 = vcmask 130048  }
   0x8   :  { %3901 = vmatmul.mubr.msk.f32.gmra.mxu0 %vm55_vm1, %v41_v4  ;;  %3952 = vmatpush3.msra.mxu1 %v4549_v7  ;;  %v48_v13 = vld [vmem:[%s5102_s0 + $0x50] sm:$0xff]  ;;  %v49_v14 = vld [vmem:[%s5102_s0 + $0x58] sm:$0xff]  ;;  %v50_v15 = vld [vmem:[%s5102_s0 + $0x60] sm:$0xff]  ;;  %s4458_s2 = smov 80   ;;  %vm3438_vm4 = vcmask 122880   ;;  %vm4461_vm5 = vmmov 0  }
   0x9   :  { %3903 = vmatprep.mubr.msk.f32.mxu0 %vm55_vm1, %v42_v5  ;;  %3924 = vmatpush3.msra.mxu0 %v4549_v7  ;;  %v51_v16 = vld [vmem:[%s5102_s0 + $0x68] sm:$0xff]  ;;  %v52_v17 = vld [vmem:[%s5102_s0 + $0x70] sm:$0xff]  ;;  %v53_v18 = vld [vmem:[%s5102_s0 + $0x78] sm:$0xff]  ;;  %s4455_s0 = smov 96   ;;  %s4462_s17 = smov 112   ;;  %vm3444_vm6 = vcmask 255105  }
   0xa   :  { %v4637_v0 = vld [vmem:[%s5106_s4] sm:$0xff]  ;;  %vm3449_vm7 = vcmask 387330   ;;  %vm3454_vm8 = vcmask 519555   ;;  %vm3459_vm9 = vcmask 651780   ;;  %vm3464_vm10 = vcmask 784005  }
   0xb   :  { %vm3469_vm11 = vcmask 916230   ;;  %vm3474_vm12 = vcmask 1048455   ;;  %vm3600_vm13 = vcmask 58368  }
   0xc   :  { %3904 = vmatmul.mubr.msk.f32.gmra.mxu0 %vm55_vm1, %v43_v8 }
   0xd   :  { %3906 = vmatprep.mubr.msk.f32.mxu0 %vm55_vm1, %v44_v9  ;;  %v4646_v9 = vld [vmem:[%s5106_s4 + $0x8] sm:$0xff] }
  0x10   :  { %3907 = vmatmul.mubr.msk.f32.gmra.mxu0 %vm55_vm1, %v45_v10  ;;  %v4661_v10 = vld [vmem:[%s5105_s3] ss:$0 sm:$0xff] }
  0x11   :  { %3909 = vmatprep.mubr.msk.f32.mxu0 %vm55_vm1, %v46_v11 }
  0x14   :  { %3910 = vmatmul.mubr.msk.f32.gmra.mxu0 %vm55_vm1, %v47_v12 }
  0x15   :  { %3912 = vmatprep.mubr.msk.f32.mxu0 %vm55_vm1, %v48_v13 }
  0x18   :  { %3913 = vmatmul.mubr.msk.f32.gmra.mxu0 %vm55_vm1, %v49_v14 }
  0x19   :  { %3915 = vmatprep.mubr.msk.f32.mxu0 %vm55_vm1, %v50_v15 }
  0x1c   :  { %3916 = vmatmul.mubr.msk.f32.gmra.mxu0 %vm55_vm1, %v51_v16 }
  0x1d   :  { %3918 = vmatprep.mubr.msk.f32.mxu0 %vm55_vm1, %v52_v17 }
  0x20   :  { %3919 = vmatmul.mubr.msk.f32.gmra.mxu0 %vm55_vm1, %v53_v18 }
  0x21   :  { %3925 = vmatprep.mubr.f32.mxu0 %v4454_v19 }
  0x24   :  { %3926 = vmatmul.mubr.f32.vlgmr.msra.gmra.mxu0 %v4454_v19 }
  0x25   :  { %3932 = vmatprep.mubr.msk.f32.mxu0 %vm275_vm3, %v4637_v0 }
  0xc4   :  { %v3899_v20 = vpop.f32.mrf.mxu0 }
  0xc5   :  { %255 = vst.msk [vmem:[#allocation2 + $0x8] sm:$0xff] %vm253_vm2, %v3899_v20 }
  0xc6   :  { %v174_v21 = vpop.f32.mrf.mxu0 }
  0xc7   :  { %254 = vst.msk [vmem:[#allocation2] sm:$0xff] %vm253_vm2, %v174_v21 }
  0xc8   :  { %v3902_v22 = vpop.f32.mrf.mxu0 }
  0xc9   :  { %257 = vst.msk [vmem:[#allocation2 + $0x18] sm:$0xff] %vm253_vm2, %v3902_v22 }
  0xca   :  { %v184_v23 = vpop.f32.mrf.mxu0 }
  0xcb   :  { %256 = vst.msk [vmem:[#allocation2 + $0x10] sm:$0xff] %vm253_vm2, %v184_v23 }
  0xcc   :  { %v3905_v24 = vpop.f32.mrf.mxu0  ;;  %v274_v36 = vld [vmem:[#allocation2 + $0x8] sm:$0xff] }
  0xcd   :  { %259 = vst.msk [vmem:[#allocation2 + $0x28] sm:$0xff] %vm253_vm2, %v3905_v24 }
  0xce   :  { %v194_v25 = vpop.f32.mrf.mxu0  ;;  %v273_v39 = vld [vmem:[#allocation2] sm:$0xff] }
  0xcf   :  { %258 = vst.msk [vmem:[#allocation2 + $0x20] sm:$0xff] %vm253_vm2, %v194_v25 }
  0xd0   :  { %v3908_v26 = vpop.f32.mrf.mxu0  ;;  %v504_v16 = vld [vmem:[#allocation2 + $0x18] sm:$0xff] }
  0xd1   :  { %261 = vst.msk [vmem:[#allocation2 + $0x38] sm:$0xff] %vm253_vm2, %v3908_v26 }
  0xd2   :  { %v204_v27 = vpop.f32.mrf.mxu0  ;;  %v503_v21 = vld [vmem:[#allocation2 + $0x10] sm:$0xff] }
  0xd3   :  { %260 = vst.msk [vmem:[#allocation2 + $0x30] sm:$0xff] %vm253_vm2, %v204_v27 }
  0xd4   :  { %v3911_v28 = vpop.f32.mrf.mxu0 }
  0xd5   :  { %263 = vst.msk [vmem:[#allocation2 + $0x48] sm:$0xff] %vm253_vm2, %v3911_v28 }
  0xd6   :  { %v214_v29 = vpop.f32.mrf.mxu0 }
  0xd7   :  { %262 = vst.msk [vmem:[#allocation2 + $0x40] sm:$0xff] %vm253_vm2, %v214_v29 }
  0xd8   :  { %v3914_v30 = vpop.f32.mrf.mxu0 }
  0xd9   :  { %265 = vst.msk [vmem:[#allocation2 + $0x58] sm:$0xff] %vm253_vm2, %v3914_v30 }
  0xda   :  { %v224_v31 = vpop.f32.mrf.mxu0 }
  0xdb   :  { %264 = vst.msk [vmem:[#allocation2 + $0x50] sm:$0xff] %vm253_vm2, %v224_v31 }
  0xdc   :  { %v3917_v32 = vpop.f32.mrf.mxu0 }
  0xdd   :  { %267 = vst.msk [vmem:[#allocation2 + $0x68] sm:$0xff] %vm253_vm2, %v3917_v32 }
  0xde   :  { %v234_v33 = vpop.f32.mrf.mxu0 }
  0xdf   :  { %266 = vst.msk [vmem:[#allocation2 + $0x60] sm:$0xff] %vm253_vm2, %v234_v33 }
  0xe0   :  { %v3920_v34 = vpop.f32.mrf.mxu0 }
  0xe1   :  { %269 = vst.msk [vmem:[#allocation2 + $0x78] sm:$0xff] %vm253_vm2, %v3920_v34 }
  0xe2   :  { %v244_v35 = vpop.f32.mrf.mxu0 }
  0xe3   :  { %268 = vst.msk [vmem:[#allocation2 + $0x70] sm:$0xff] %vm253_vm2, %v244_v35 }
  0xe4   :  { %v3927_v37 = vpop.f32.mrf.mxu0 }
  0xe5   :  { %v355_v38 = vadd.f32 %v3927_v37, %v274_v36 }
  0xe6   :  { %v345_v40 = vpop.f32.mrf.mxu0 }
  0xe7   :  { %4169 = vtanh.f32 %v355_v38  ;;  %v354_v41 = vadd.f32 %v345_v40, %v273_v39  ;;  %v3645_v44 = vmul.f32 -1.442695, %v355_v38 }
  0xe9   :  { %4171 = vtanh.f32 %v354_v41  ;;  %v3644_v45 = vmul.f32 -1.442695, %v354_v41 }
  0xea   :  { %4173 = vpow2.f32 %v3645_v44 }
  0xeb   :  { %4175 = vpow2.f32 %v3644_v45 }
  0xf4   :  { %v4170_v42 = vpop.eup %4169 }
  0xf5   :  { %376 = vrot.lane.b32.xlu0 %v4170_v42, %s4455_s0 }
  0xf6   :  { %v4172_v43 = vpop.eup %4171 }
  0xf7   :  { %v4174_v46 = vpop.eup %4173 }
  0xf8   :  { %v363_v47 = vadd.f32 1.0, %v4174_v46  ;;  %v4176_v48 = vpop.eup %4175 }
  0xf9   :  { %374 = vrot.lane.b32.xlu0 %v4172_v43, %s4455_s0  ;;  %v362_v49 = vadd.f32 1.0, %v4176_v48 }
  0xfa   :  { %4177 = vrcp.f32 %v363_v47 }
  0xfb   :  { %4179 = vrcp.f32 %v362_v49 }
 0x107   :  { %v4178_v50 = vpop.eup %4177 }
 0x108   :  { %v4180_v53 = vpop.eup %4179  ;;  %v371_v56 = vmul.f32 0.0, %v4178_v50 }
 0x109   :  { %v370_v59 = vmul.f32 0.0, %v4180_v53 }
 0x167   :  { %v377_v51 = vpop.permute.xlu0 %376 }
 0x168   :  { %v381_v52 = vmul.f32 %v4178_v50, %v377_v51 }
 0x16a   :  { %386 = vrot.lane.b32.xlu1 %v381_v52, %s4456_s28  ;;  %v722_v52 = vld [vmem:[#allocation2 + $0x28] sm:$0xff] }
 0x16b   :  { %v375_v54 = vpop.permute.xlu0 %374 }
 0x16c   :  { %v380_v55 = vmul.f32 %v4180_v53, %v375_v54 }
 0x16e   :  { %384 = vrot.lane.b32.xlu1 %v380_v55, %s4456_s28  ;;  %v721_v55 = vld [vmem:[#allocation2 + $0x20] sm:$0xff] }
 0x1dc   :  { %v387_v57 = vpop.permute.xlu1 %386 }
 0x1dd   :  { %v4626_v58 = vadd.f32 %v387_v57, %v371_v56 }
 0x1df   :  { %4181 = vtanh.f32 %v4626_v58 }
 0x1e0   :  { %v385_v60 = vpop.permute.xlu1 %384 }
 0x1e1   :  { %v4629_v61 = vadd.f32 %v385_v60, %v370_v59 }
 0x1e3   :  { %4183 = vtanh.f32 %v4629_v61 }
 0x1ec   :  { %v4182_v62 = vpop.eup %4181 }
 0x1ed   :  { %398 = vrot.lane.b32.xlu0 %v4182_v62, %s4457_s29 }
 0x1f0   :  { %v4184_v63 = vpop.eup %4183 }
 0x1f1   :  { %396 = vrot.lane.b32.xlu1 %v4184_v63, %s4457_s29 }
 0x25f   :  { %v399_v1 = vpop.permute.xlu0 %398 }
 0x260   :  { %v403_v2 = vmul.f32 %v4178_v50, %v399_v1 }
 0x262   :  { %414 = vrot.lane.b32.xlu0 %v403_v2, %s4458_s2 }
 0x263   :  { %v397_v3 = vpop.permute.xlu1 %396 }
 0x264   :  { %v402_v4 = vmul.f32 %v4180_v53, %v397_v3 }
 0x266   :  { %412 = vrot.lane.b32.xlu1 %v402_v4, %s4458_s2 }
 0x2d4   :  { %v415_v5 = vpop.permute.xlu0 %414 }
 0x2d5   :  { %3928 = vmatprep.subr.mxu0 %v415_v5 }
 0x2d6   :  { %3929 = vmatpush3.msra.mxu0 %v415_v5 }
 0x2d8   :  { %v413_v8 = vpop.permute.xlu1 %412 }
 0x2d9   :  { %3930 = vmatprep.subr.mxu0 %v413_v8 }
 0x2da   :  { %3931 = vmatpush3.msra.mxu0 %v413_v8 }
 0x2db   :  { %3933 = vmatmul.mubr.msk.f32.vlgmr.msra.gmra.mxu0 %vm275_vm3, %v4646_v9  ;;  %3935 = vmatprep.subr.mxu0 %v4543_v6 }
 0x2dc   :  { %3936 = vmatpush3.msra.mxu0 %v4543_v6  ;;  %3939 = vmatprep.mubr.msk.f32.mxu0 %vm275_vm3, %v413_v8 }
 0x2dd   :  { %3937 = vmatprep.subr.mxu0 %v4549_v7 }
 0x2de   :  { %3938 = vmatpush3.msra.mxu0 %v4549_v7 }
 0x2df   :  { %3940 = vmatmul.mubr.msk.f32.vlgmr.msra.gmra.mxu0 %vm275_vm3, %v415_v5 }
 0x2e0   :  { %3946 = vmatprep.mubr.msk.f32.mxu0 %vm275_vm3, %v4637_v0 }
 0x39b   :  { %v3934_v11 = vpop.f32.mrf.mxu0 }
 0x39c   :  { %v496_v12 = vadd.f32 %v3934_v11, %v4661_v10 }
 0x39d   :  { %v490_v13 = vpop.f32.mrf.mxu0 }
 0x39e   :  { %v500_v14 = vmax.f32 %v496_v12, 0.0  ;;  %v491_v15 = vadd.f32 %v4661_v10, %v490_v13 }
 0x39f   :  { %v3941_v17 = vpop.f32.mrf.mxu0 }
 0x3a0   :  { %502 = vst.msk [vmem:[#allocation3 + $0x8] sm:$0xff] %vm275_vm3, %v500_v14  ;;  %v499_v18 = vmax.f32 %v491_v15, 0.0  ;;  %v585_v20 = vadd.f32 %v3941_v17, %v504_v16 }
 0x3a1   :  { %v575_v22 = vpop.f32.mrf.mxu0 }
 0x3a2   :  { %501 = vst.msk [vmem:[#allocation3] sm:$0xff] %vm275_vm3, %v499_v18  ;;  %4185 = vtanh.f32 %v585_v20  ;;  %v584_v23 = vadd.f32 %v575_v22, %v503_v21  ;;  %v3652_v26 = vmul.f32 -1.442695, %v585_v20 }
 0x3a4   :  { %4187 = vtanh.f32 %v584_v23  ;;  %v3651_v27 = vmul.f32 -1.442695, %v584_v23 }
 0x3a5   :  { %4189 = vpow2.f32 %v3652_v26 }
 0x3a6   :  { %4191 = vpow2.f32 %v3651_v27 }
 0x3af   :  { %v4186_v24 = vpop.eup %4185 }
 0x3b0   :  { %606 = vrot.lane.b32.xlu1 %v4186_v24, %s4455_s0 }
 0x3b1   :  { %v4188_v25 = vpop.eup %4187 }
 0x3b2   :  { %604 = vrot.lane.b32.xlu0 %v4188_v25, %s4455_s0  ;;  %v4190_v28 = vpop.eup %4189 }
 0x3b3   :  { %v4192_v29 = vpop.eup %4191  ;;  %v593_v30 = vadd.f32 1.0, %v4190_v28 }
 0x3b4   :  { %v592_v31 = vadd.f32 1.0, %v4192_v29 }
 0x3b5   :  { %4193 = vrcp.f32 %v593_v30 }
 0x3b6   :  { %4195 = vrcp.f32 %v592_v31 }
 0x3c2   :  { %v4194_v32 = vpop.eup %4193 }
 0x3c3   :  { %v4196_v35 = vpop.eup %4195  ;;  %v601_v38 = vmul.f32 %v4194_v32, %v4626_v58 }
 0x3c4   :  { %v600_v41 = vmul.f32 %v4196_v35, %v4629_v61 }
 0x422   :  { %v607_v33 = vpop.permute.xlu1 %606 }
 0x423   :  { %v611_v34 = vmul.f32 %v4194_v32, %v607_v33  ;;  %v940_v33 = vld [vmem:[#allocation2 + $0x38] sm:$0xff] }
 0x424   :  { %v605_v36 = vpop.permute.xlu0 %604 }
 0x425   :  { %616 = vrot.lane.b32.xlu1 %v611_v34, %s4456_s28  ;;  %v610_v37 = vmul.f32 %v4196_v35, %v605_v36 }
 0x427   :  { %614 = vrot.lane.b32.xlu0 %v610_v37, %s4456_s28  ;;  %v939_v37 = vld [vmem:[#allocation2 + $0x30] sm:$0xff] }
 0x497   :  { %v617_v39 = vpop.permute.xlu1 %616 }
 0x498   :  { %v621_v40 = vadd.f32 %v617_v39, %v601_v38 }
 0x499   :  { %v615_v42 = vpop.permute.xlu0 %614 }
 0x49a   :  { %4197 = vtanh.f32 %v621_v40  ;;  %v620_v43 = vadd.f32 %v615_v42, %v600_v41 }
 0x49c   :  { %4199 = vtanh.f32 %v620_v43 }
 0x4a7   :  { %v4198_v44 = vpop.eup %4197 }
 0x4a8   :  { %628 = vrot.lane.b32.xlu1 %v4198_v44, %s4457_s29 }
 0x4a9   :  { %v4200_v45 = vpop.eup %4199 }
 0x4aa   :  { %626 = vrot.lane.b32.xlu0 %v4200_v45, %s4457_s29 }
 0x51a   :  { %v629_v46 = vpop.permute.xlu1 %628 }
 0x51b   :  { %v633_v47 = vmul.f32 %v4194_v32, %v629_v46 }
 0x51c   :  { %v627_v48 = vpop.permute.xlu0 %626 }
 0x51d   :  { %638 = vrot.lane.b32.xlu1 %v633_v47, %s4458_s2  ;;  %v632_v49 = vmul.f32 %v4196_v35, %v627_v48 }
 0x51f   :  { %636 = vrot.lane.b32.xlu0 %v632_v49, %s4458_s2 }
 0x58f   :  { %v639_v50 = vpop.permute.xlu1 %638 }
 0x590   :  { %3942 = vmatprep.subr.mxu0 %v639_v50 }
 0x591   :  { %3943 = vmatpush3.msra.mxu0 %v639_v50  ;;  %v637_v51 = vpop.permute.xlu0 %636 }
 0x592   :  { %3944 = vmatprep.subr.mxu0 %v637_v51  ;;  %3953 = vmatprep.mubr.msk.f32.mxu1 %vm275_vm3, %v637_v51 }
 0x593   :  { %3945 = vmatpush3.msra.mxu0 %v637_v51  ;;  %3954 = vmatmul.mubr.msk.f32.vlgmr.msra.gmra.mxu1 %vm275_vm3, %v639_v50 }
 0x594   :  { %3960 = vmatprep.mubr.msk.f32.mxu1 %vm275_vm3, %v4637_v0  ;;  %3947 = vmatmul.mubr.msk.f32.vlgmr.msra.gmra.mxu0 %vm275_vm3, %v4646_v9 }
 0x595   :  { %3977 = vmatprep.subr.mxu0 %v4543_v6 }
 0x596   :  { %3978 = vmatpush3.msra.mxu0 %v4543_v6 }
 0x597   :  { %3979 = vmatprep.subr.mxu0 %v4549_v7 }
 0x598   :  { %3980 = vmatpush3.msra.mxu0 %v4549_v7 }
 0x599   :  { %3991 = vmatprep.subr.mxu0 %v4543_v6 }
 0x653   :  { %v3955_v53 = vpop.f32.mrf.mxu1 }
 0x654   :  { %v803_v54 = vadd.f32 %v3955_v53, %v722_v52 }
 0x655   :  { %v793_v56 = vpop.f32.mrf.mxu1 }
 0x656   :  { %4201 = vtanh.f32 %v803_v54  ;;  %v802_v57 = vadd.f32 %v793_v56, %v721_v55  ;;  %v3658_v60 = vmul.f32 -1.442695, %v803_v54 }
 0x658   :  { %4203 = vtanh.f32 %v802_v57  ;;  %v3657_v61 = vmul.f32 -1.442695, %v802_v57 }
 0x659   :  { %4205 = vpow2.f32 %v3658_v60 }
 0x65a   :  { %4207 = vpow2.f32 %v3657_v61 }
 0x663   :  { %v4202_v58 = vpop.eup %4201 }
 0x664   :  { %824 = vrot.lane.b32.xlu0 %v4202_v58, %s4455_s0 }
 0x665   :  { %v4204_v59 = vpop.eup %4203 }
 0x666   :  { %822 = vrot.lane.b32.xlu1 %v4204_v59, %s4455_s0  ;;  %v4206_v62 = vpop.eup %4205 }
 0x667   :  { %v4208_v63 = vpop.eup %4207  ;;  %v811_v1 = vadd.f32 1.0, %v4206_v62  ;;  %v3948_v62 = vpop.f32.mrf.mxu0 }
 0x668   :  { %v810_v2 = vadd.f32 1.0, %v4208_v63  ;;  %v714_v63 = vadd.f32 %v3948_v62, %v4661_v10 }
 0x669   :  { %4209 = vrcp.f32 %v811_v1  ;;  %v708_v1 = vpop.f32.mrf.mxu0 }
 0x66a   :  { %4211 = vrcp.f32 %v810_v2  ;;  %v718_v2 = vmax.f32 %v714_v63, 0.0 }
 0x66c   :  { %720 = vst.msk [vmem:[#allocation3 + $0x18] sm:$0xff] %vm275_vm3, %v718_v2 }
 0x676   :  { %v4210_v3 = vpop.eup %4209 }
 0x677   :  { %v4212_v8 = vpop.eup %4211  ;;  %v819_v13 = vmul.f32 %v4210_v3, %v621_v40 }
 0x678   :  { %v818_v16 = vmul.f32 %v4212_v8, %v620_v43 }
 0x6d6   :  { %v825_v4 = vpop.permute.xlu0 %824 }
 0x6d7   :  { %v829_v5 = vmul.f32 %v4210_v3, %v825_v4 }
 0x6d8   :  { %v823_v11 = vpop.permute.xlu1 %822 }
 0x6d9   :  { %834 = vrot.lane.b32.xlu0 %v829_v5, %s4456_s28  ;;  %v828_v12 = vmul.f32 %v4212_v8, %v823_v11 }
 0x6db   :  { %832 = vrot.lane.b32.xlu1 %v828_v12, %s4456_s28 }
 0x74b   :  { %v835_v14 = vpop.permute.xlu0 %834 }
 0x74c   :  { %v4692_v15 = vadd.f32 %v835_v14, %v819_v13 }
 0x74d   :  { %v833_v17 = vpop.permute.xlu1 %832 }
 0x74e   :  { %4213 = vtanh.f32 %v4692_v15  ;;  %v4695_v18 = vadd.f32 %v833_v17, %v818_v16 }
 0x750   :  { %4215 = vtanh.f32 %v4695_v18 }
 0x75b   :  { %v4214_v20 = vpop.eup %4213 }
 0x75c   :  { %846 = vrot.lane.b32.xlu0 %v4214_v20, %s4457_s29 }
 0x75d   :  { %v4216_v21 = vpop.eup %4215 }
 0x75e   :  { %844 = vrot.lane.b32.xlu1 %v4216_v21, %s4457_s29 }
 0x7ce   :  { %v847_v22 = vpop.permute.xlu0 %846 }
 0x7cf   :  { %v851_v23 = vmul.f32 %v4210_v3, %v847_v22  ;;  %v709_v3 = vadd.f32 %v4661_v10, %v708_v1 }
 0x7d0   :  { %v845_v24 = vpop.permute.xlu1 %844 }
 0x7d1   :  { %856 = vrot.lane.b32.xlu0 %v851_v23, %s4458_s2  ;;  %v850_v25 = vmul.f32 %v4212_v8, %v845_v24  ;;  %v717_v4 = vmax.f32 %v709_v3, 0.0 }
 0x7d3   :  { %854 = vrot.lane.b32.xlu1 %v850_v25, %s4458_s2  ;;  %719 = vst.msk [vmem:[#allocation3 + $0x10] sm:$0xff] %vm275_vm3, %v717_v4 }
 0x843   :  { %v857_v26 = vpop.permute.xlu0 %856 }
 0x844   :  { %3956 = vmatprep.subr.mxu1 %v857_v26 }
 0x845   :  { %3957 = vmatpush3.msra.mxu1 %v857_v26  ;;  %v855_v27 = vpop.permute.xlu1 %854 }
 0x846   :  { %3958 = vmatprep.subr.mxu1 %v855_v27 }
 0x847   :  { %3959 = vmatpush3.msra.mxu1 %v855_v27 }
 0x848   :  { %3961 = vmatmul.mubr.msk.f32.vlgmr.msra.gmra.mxu1 %vm275_vm3, %v4646_v9  ;;  %3963 = vmatprep.subr.mxu1 %v4543_v6 }
 0x849   :  { %3964 = vmatpush3.msra.mxu1 %v4543_v6  ;;  %3967 = vmatprep.mubr.msk.f32.mxu1 %vm275_vm3, %v855_v27 }
 0x84a   :  { %3965 = vmatprep.subr.mxu1 %v4549_v7 }
 0x84b   :  { %3966 = vmatpush3.msra.mxu1 %v4549_v7 }
 0x84c   :  { %3968 = vmatmul.mubr.msk.f32.vlgmr.msra.gmra.mxu1 %vm275_vm3, %v857_v26 }
 0x84d   :  { %3974 = vmatprep.mubr.msk.f32.mxu1 %vm275_vm3, %v4637_v0 }
 0x908   :  { %v3962_v28 = vpop.f32.mrf.mxu1 }
 0x909   :  { %v932_v29 = vadd.f32 %v3962_v28, %v4661_v10 }
 0x90a   :  { %v926_v30 = vpop.f32.mrf.mxu1 }
 0x90b   :  { %v936_v31 = vmax.f32 %v932_v29, 0.0  ;;  %v927_v32 = vadd.f32 %v4661_v10, %v926_v30 }
 0x90c   :  { %v3969_v34 = vpop.f32.mrf.mxu1 }
 0x90d   :  { %938 = vst.msk [vmem:[#allocation3 + $0x28] sm:$0xff] %vm275_vm3, %v936_v31  ;;  %v935_v35 = vmax.f32 %v927_v32, 0.0  ;;  %v1021_v36 = vadd.f32 %v3969_v34, %v940_v33 }
 0x90e   :  { %v1011_v38 = vpop.f32.mrf.mxu1 }
 0x90f   :  { %937 = vst.msk [vmem:[#allocation3 + $0x20] sm:$0xff] %vm275_vm3, %v935_v35  ;;  %4217 = vtanh.f32 %v1021_v36  ;;  %v1020_v39 = vadd.f32 %v1011_v38, %v939_v37  ;;  %v3664_v42 = vmul.f32 -1.442695, %v1021_v36 }
 0x911   :  { %4219 = vtanh.f32 %v1020_v39  ;;  %v3663_v43 = vmul.f32 -1.442695, %v1020_v39 }
 0x912   :  { %4221 = vpow2.f32 %v3664_v42 }
 0x913   :  { %4223 = vpow2.f32 %v3663_v43 }
 0x91c   :  { %v4218_v40 = vpop.eup %4217 }
 0x91d   :  { %1042 = vrot.lane.b32.xlu1 %v4218_v40, %s4455_s0 }
 0x91e   :  { %v4220_v41 = vpop.eup %4219 }
 0x91f   :  { %1040 = vrot.lane.b32.xlu0 %v4220_v41, %s4455_s0  ;;  %v4222_v44 = vpop.eup %4221 }
 0x920   :  { %v4224_v45 = vpop.eup %4223  ;;  %v1029_v46 = vadd.f32 1.0, %v4222_v44 }
 0x921   :  { %v1028_v47 = vadd.f32 1.0, %v4224_v45 }
 0x922   :  { %4225 = vrcp.f32 %v1029_v46 }
 0x923   :  { %4227 = vrcp.f32 %v1028_v47 }
 0x92f   :  { %v4226_v48 = vpop.eup %4225 }
 0x930   :  { %v4228_v51 = vpop.eup %4227  ;;  %v1037_v54 = vmul.f32 %v4226_v48, %v4692_v15  ;;  %v1158_v15 = vld [vmem:[#allocation2 + $0x48] sm:$0xff] }
 0x931   :  { %v1036_v57 = vmul.f32 %v4228_v51, %v4695_v18  ;;  %v1157_v18 = vld [vmem:[#allocation2 + $0x40] sm:$0xff] }
 0x98f   :  { %v1043_v49 = vpop.permute.xlu1 %1042 }
 0x990   :  { %v1047_v50 = vmul.f32 %v4226_v48, %v1043_v49 }
 0x991   :  { %v1041_v52 = vpop.permute.xlu0 %1040 }
 0x992   :  { %1052 = vrot.lane.b32.xlu1 %v1047_v50, %s4456_s28  ;;  %v1046_v53 = vmul.f32 %v4228_v51, %v1041_v52  ;;  %v1376_v50 = vld [vmem:[#allocation2 + $0x58] sm:$0xff] }
 0x994   :  { %1050 = vrot.lane.b32.xlu0 %v1046_v53, %s4456_s28  ;;  %v1375_v53 = vld [vmem:[#allocation2 + $0x50] sm:$0xff] }
 0xa04   :  { %v1053_v55 = vpop.permute.xlu1 %1052 }
 0xa05   :  { %v4721_v56 = vadd.f32 %v1053_v55, %v1037_v54 }
 0xa06   :  { %v1051_v58 = vpop.permute.xlu0 %1050 }
 0xa07   :  { %4229 = vtanh.f32 %v4721_v56  ;;  %v4725_v59 = vadd.f32 %v1051_v58, %v1036_v57 }
 0xa09   :  { %4231 = vtanh.f32 %v4725_v59 }
 0xa14   :  { %v4230_v60 = vpop.eup %4229 }
 0xa15   :  { %1064 = vrot.lane.b32.xlu1 %v4230_v60, %s4457_s29 }
 0xa16   :  { %v4232_v61 = vpop.eup %4231 }
 0xa17   :  { %1062 = vrot.lane.b32.xlu0 %v4232_v61, %s4457_s29 }
 0xa87   :  { %v1065_v5 = vpop.permute.xlu1 %1064 }
 0xa88   :  { %v1069_v8 = vmul.f32 %v4226_v48, %v1065_v5 }
 0xa89   :  { %v1063_v11 = vpop.permute.xlu0 %1062 }
 0xa8a   :  { %1074 = vrot.lane.b32.xlu1 %v1069_v8, %s4458_s2  ;;  %v1068_v12 = vmul.f32 %v4228_v51, %v1063_v11 }
 0xa8c   :  { %1072 = vrot.lane.b32.xlu0 %v1068_v12, %s4458_s2 }
 0xafc   :  { %v1075_v13 = vpop.permute.xlu1 %1074 }
 0xafd   :  { %3970 = vmatprep.subr.mxu1 %v1075_v13 }
 0xafe   :  { %3971 = vmatpush3.msra.mxu1 %v1075_v13  ;;  %v1073_v14 = vpop.permute.xlu0 %1072 }
 0xaff   :  { %3972 = vmatprep.subr.mxu1 %v1073_v14  ;;  %3981 = vmatprep.mubr.msk.f32.mxu0 %vm275_vm3, %v1073_v14 }
 0xb00   :  { %3973 = vmatpush3.msra.mxu1 %v1073_v14  ;;  %3982 = vmatmul.mubr.msk.f32.vlgmr.msra.gmra.mxu0 %vm275_vm3, %v1075_v13 }
 0xb01   :  { %3992 = vmatpush3.msra.mxu0 %v4543_v6  ;;  %3975 = vmatmul.mubr.msk.f32.vlgmr.msra.gmra.mxu1 %vm275_vm3, %v4646_v9 }
 0xb02   :  { %3993 = vmatprep.subr.mxu0 %v4549_v7  ;;  %3988 = vmatprep.mubr.msk.f32.mxu1 %vm275_vm3, %v4637_v0 }
 0xb03   :  { %3994 = vmatpush3.msra.mxu0 %v4549_v7 }
 0xb04   :  { %4005 = vmatprep.subr.mxu0 %v4543_v6 }
 0xbc0   :  { %v3983_v16 = vpop.f32.mrf.mxu0 }
 0xbc1   :  { %v1239_v17 = vadd.f32 %v3983_v16, %v1158_v15 }
 0xbc2   :  { %v1229_v20 = vpop.f32.mrf.mxu0 }
 0xbc3   :  { %4233 = vtanh.f32 %v1239_v17  ;;  %v1238_v21 = vadd.f32 %v1229_v20, %v1157_v18  ;;  %v3670_v24 = vmul.f32 -1.442695, %v1239_v17 }
 0xbc5   :  { %4235 = vtanh.f32 %v1238_v21  ;;  %v3669_v25 = vmul.f32 -1.442695, %v1238_v21 }
 0xbc6   :  { %4237 = vpow2.f32 %v3670_v24 }
 0xbc7   :  { %4239 = vpow2.f32 %v3669_v25 }
 0xbd0   :  { %v4234_v22 = vpop.eup %4233 }
 0xbd1   :  { %1260 = vrot.lane.b32.xlu1 %v4234_v22, %s4455_s0 }
 0xbd2   :  { %v4236_v23 = vpop.eup %4235 }
 0xbd3   :  { %1258 = vrot.lane.b32.xlu0 %v4236_v23, %s4455_s0  ;;  %v4238_v26 = vpop.eup %4237 }
 0xbd4   :  { %v4240_v27 = vpop.eup %4239  ;;  %v1247_v28 = vadd.f32 1.0, %v4238_v26  ;;  %v1594_v26 = vld [vmem:[#allocation2 + $0x68] sm:$0xff] }
 0xbd5   :  { %v1246_v29 = vadd.f32 1.0, %v4240_v27 }
 0xbd6   :  { %4241 = vrcp.f32 %v1247_v28 }
 0xbd7   :  { %4243 = vrcp.f32 %v1246_v29  ;;  %v1593_v29 = vld [vmem:[#allocation2 + $0x60] sm:$0xff] }
 0xbe3   :  { %v4242_v30 = vpop.eup %4241 }
 0xbe4   :  { %v4244_v33 = vpop.eup %4243  ;;  %v1255_v36 = vmul.f32 %v4242_v30, %v4721_v56 }
 0xbe5   :  { %v1254_v39 = vmul.f32 %v4244_v33, %v4725_v59 }
 0xc43   :  { %v1261_v31 = vpop.permute.xlu1 %1260 }
 0xc44   :  { %v1265_v32 = vmul.f32 %v4242_v30, %v1261_v31 }
 0xc45   :  { %v1259_v34 = vpop.permute.xlu0 %1258 }
 0xc46   :  { %1270 = vrot.lane.b32.xlu1 %v1265_v32, %s4456_s28  ;;  %v1264_v35 = vmul.f32 %v4244_v33, %v1259_v34 }
 0xc48   :  { %1268 = vrot.lane.b32.xlu0 %v1264_v35, %s4456_s28 }
 0xcb8   :  { %v1271_v37 = vpop.permute.xlu1 %1270 }
 0xcb9   :  { %v1275_v38 = vadd.f32 %v1271_v37, %v1255_v36 }
 0xcba   :  { %v1269_v40 = vpop.permute.xlu0 %1268 }
 0xcbb   :  { %4245 = vtanh.f32 %v1275_v38  ;;  %v1274_v41 = vadd.f32 %v1269_v40, %v1254_v39 }
 0xcbd   :  { %4247 = vtanh.f32 %v1274_v41 }
 0xcc8   :  { %v4246_v42 = vpop.eup %4245 }
 0xcc9   :  { %1282 = vrot.lane.b32.xlu1 %v4246_v42, %s4457_s29 }
 0xcca   :  { %v4248_v43 = vpop.eup %4247 }
 0xccb   :  { %1280 = vrot.lane.b32.xlu0 %v4248_v43, %s4457_s29 }
 0xd3b   :  { %v1283_v44 = vpop.permute.xlu1 %1282 }
 0xd3c   :  { %v1287_v45 = vmul.f32 %v4242_v30, %v1283_v44 }
 0xd3d   :  { %v1281_v46 = vpop.permute.xlu0 %1280 }
 0xd3e   :  { %1292 = vrot.lane.b32.xlu1 %v1287_v45, %s4458_s2  ;;  %v1286_v47 = vmul.f32 %v4244_v33, %v1281_v46 }
 0xd40   :  { %1290 = vrot.lane.b32.xlu0 %v1286_v47, %s4458_s2 }
 0xdb0   :  { %v1293_v48 = vpop.permute.xlu1 %1292 }
 0xdb1   :  { %3984 = vmatprep.subr.mxu1 %v1293_v48 }
 0xdb2   :  { %3985 = vmatpush3.msra.mxu1 %v1293_v48  ;;  %v1291_v49 = vpop.permute.xlu0 %1290 }
 0xdb3   :  { %3986 = vmatprep.subr.mxu1 %v1291_v49  ;;  %3995 = vmatprep.mubr.msk.f32.mxu0 %vm275_vm3, %v1291_v49 }
 0xdb4   :  { %3987 = vmatpush3.msra.mxu1 %v1291_v49  ;;  %3996 = vmatmul.mubr.msk.f32.vlgmr.msra.gmra.mxu0 %vm275_vm3, %v1293_v48 }
 0xdb5   :  { %4006 = vmatpush3.msra.mxu0 %v4543_v6  ;;  %3989 = vmatmul.mubr.msk.f32.vlgmr.msra.gmra.mxu1 %vm275_vm3, %v4646_v9 }
 0xdb6   :  { %4007 = vmatprep.subr.mxu0 %v4549_v7  ;;  %4002 = vmatprep.mubr.msk.f32.mxu1 %vm275_vm3, %v4637_v0 }
 0xdb7   :  { %4008 = vmatpush3.msra.mxu0 %v4549_v7 }
 0xdb8   :  { %4019 = vmatprep.subr.mxu0 %v4543_v6 }
 0xe74   :  { %v3997_v51 = vpop.f32.mrf.mxu0 }
 0xe75   :  { %v1457_v52 = vadd.f32 %v3997_v51, %v1376_v50 }
 0xe76   :  { %v1447_v54 = vpop.f32.mrf.mxu0 }
 0xe77   :  { %4249 = vtanh.f32 %v1457_v52  ;;  %v1456_v55 = vadd.f32 %v1447_v54, %v1375_v53  ;;  %v3676_v58 = vmul.f32 -1.442695, %v1457_v52  ;;  %v2046_v52 = vld [vmem:[%s5107_s5 + $0x8] sm:$0xff] }
 0xe79   :  { %4251 = vtanh.f32 %v1456_v55  ;;  %v3675_v59 = vmul.f32 -1.442695, %v1456_v55 }
 0xe7a   :  { %4253 = vpow2.f32 %v3676_v58 }
 0xe7b   :  { %4255 = vpow2.f32 %v3675_v59  ;;  %v2045_v59 = vld [vmem:[%s5107_s5] sm:$0xff] }
 0xe84   :  { %v4250_v56 = vpop.eup %4249 }
 0xe85   :  { %1478 = vrot.lane.b32.xlu1 %v4250_v56, %s4455_s0 }
 0xe86   :  { %v4252_v57 = vpop.eup %4251 }
 0xe87   :  { %1476 = vrot.lane.b32.xlu0 %v4252_v57, %s4455_s0  ;;  %v4254_v60 = vpop.eup %4253 }
 0xe88   :  { %v4256_v61 = vpop.eup %4255  ;;  %v1465_v62 = vadd.f32 1.0, %v4254_v60  ;;  %v2029_v60 = vld [vmem:[#allocation3] sm:$0xff] }
 0xe89   :  { %v1464_v63 = vadd.f32 1.0, %v4256_v61  ;;  %v2030_v61 = vld [vmem:[#allocation3 + $0x8] sm:$0xff] }
 0xe8a   :  { %4257 = vrcp.f32 %v1465_v62  ;;  %v2031_v62 = vld [vmem:[#allocation3 + $0x10] sm:$0xff] }
 0xe8b   :  { %4259 = vrcp.f32 %v1464_v63  ;;  %v2032_v63 = vld [vmem:[#allocation3 + $0x18] sm:$0xff] }
 0xe97   :  { %v4258_v1 = vpop.eup %4257 }
 0xe98   :  { %v4260_v4 = vpop.eup %4259  ;;  %v1473_v11 = vmul.f32 %v4258_v1, %v1275_v38 }
 0xe99   :  { %v1472_v14 = vmul.f32 %v4260_v4, %v1274_v41 }
 0xef7   :  { %v1479_v2 = vpop.permute.xlu1 %1478 }
 0xef8   :  { %v1483_v3 = vmul.f32 %v4258_v1, %v1479_v2  ;;  %v2034_v2 = vld [vmem:[#allocation3 + $0x28] sm:$0xff] }
 0xef9   :  { %v1477_v5 = vpop.permute.xlu0 %1476 }
 0xefa   :  { %1488 = vrot.lane.b32.xlu1 %v1483_v3, %s4456_s28  ;;  %v1482_v8 = vmul.f32 %v4260_v4, %v1477_v5  ;;  %v1811_v5 = vld [vmem:[#allocation2 + $0x70] sm:$0xff] }
 0xefc   :  { %1486 = vrot.lane.b32.xlu0 %v1482_v8, %s4456_s28 }
 0xf6c   :  { %v1489_v12 = vpop.permute.xlu1 %1488 }
 0xf6d   :  { %v1493_v13 = vadd.f32 %v1489_v12, %v1473_v11 }
 0xf6e   :  { %v1487_v15 = vpop.permute.xlu0 %1486 }
 0xf6f   :  { %4261 = vtanh.f32 %v1493_v13  ;;  %v1492_v16 = vadd.f32 %v1487_v15, %v1472_v14 }
 0xf71   :  { %4263 = vtanh.f32 %v1492_v16 }
 0xf7c   :  { %v4262_v17 = vpop.eup %4261 }
 0xf7d   :  { %1500 = vrot.lane.b32.xlu1 %v4262_v17, %s4457_s29 }
 0xf7e   :  { %v4264_v18 = vpop.eup %4263 }
 0xf7f   :  { %1498 = vrot.lane.b32.xlu0 %v4264_v18, %s4457_s29 }
 0xfef   :  { %v1501_v20 = vpop.permute.xlu1 %1500 }
 0xff0   :  { %v1505_v21 = vmul.f32 %v4258_v1, %v1501_v20  ;;  %v2033_v1 = vld [vmem:[#allocation3 + $0x20] sm:$0xff] }
 0xff1   :  { %v1499_v22 = vpop.permute.xlu0 %1498 }
 0xff2   :  { %1510 = vrot.lane.b32.xlu1 %v1505_v21, %s4458_s2  ;;  %v1504_v23 = vmul.f32 %v4260_v4, %v1499_v22 }
 0xff4   :  { %1508 = vrot.lane.b32.xlu0 %v1504_v23, %s4458_s2 }
0x1064   :  { %v1511_v24 = vpop.permute.xlu1 %1510 }
0x1065   :  { %3998 = vmatprep.subr.mxu1 %v1511_v24 }
0x1066   :  { %3999 = vmatpush3.msra.mxu1 %v1511_v24  ;;  %v1509_v25 = vpop.permute.xlu0 %1508 }
0x1067   :  { %4000 = vmatprep.subr.mxu1 %v1509_v25  ;;  %4009 = vmatprep.mubr.msk.f32.mxu0 %vm275_vm3, %v1509_v25 }
0x1068   :  { %4001 = vmatpush3.msra.mxu1 %v1509_v25  ;;  %4010 = vmatmul.mubr.msk.f32.vlgmr.msra.gmra.mxu0 %vm275_vm3, %v1511_v24 }
0x1069   :  { %4020 = vmatpush3.msra.mxu0 %v4543_v6  ;;  %4003 = vmatmul.mubr.msk.f32.vlgmr.msra.gmra.mxu1 %vm275_vm3, %v4646_v9 }
0x106a   :  { %4021 = vmatprep.subr.mxu0 %v4549_v7  ;;  %4016 = vmatprep.mubr.msk.f32.mxu1 %vm275_vm3, %v4637_v0 }
0x106b   :  { %4022 = vmatpush3.msra.mxu0 %v4549_v7 }
0x106c   :  { %4033 = vmatprep.subr.mxu0 %v2046_v52 }
0x1128   :  { %v4011_v27 = vpop.f32.mrf.mxu0 }
0x1129   :  { %v1675_v28 = vadd.f32 %v4011_v27, %v1594_v26 }
0x112a   :  { %v1665_v30 = vpop.f32.mrf.mxu0 }
0x112b   :  { %4265 = vtanh.f32 %v1675_v28  ;;  %v1674_v31 = vadd.f32 %v1665_v30, %v1593_v29  ;;  %v3682_v33 = vmul.f32 -1.442695, %v1675_v28 }
0x112d   :  { %4267 = vtanh.f32 %v1674_v31  ;;  %v3681_v34 = vmul.f32 -1.442695, %v1674_v31 }
0x112e   :  { %4269 = vpow2.f32 %v3682_v33 }
0x112f   :  { %4271 = vpow2.f32 %v3681_v34 }
0x1138   :  { %v4266_v32 = vpop.eup %4265 }
0x1139   :  { %1696 = vrot.lane.b32.xlu1 %v4266_v32, %s4455_s0 }
0x113a   :  { %v4268_v6 = vpop.eup %4267 }
0x113b   :  { %1694 = vrot.lane.b32.xlu0 %v4268_v6, %s4455_s0  ;;  %v4270_v35 = vpop.eup %4269 }
0x113c   :  { %v4272_v7 = vpop.eup %4271  ;;  %v1683_v36 = vadd.f32 1.0, %v4270_v35 }
0x113d   :  { %v1682_v37 = vadd.f32 1.0, %v4272_v7 }
0x113e   :  { %4273 = vrcp.f32 %v1683_v36 }
0x113f   :  { %4275 = vrcp.f32 %v1682_v37 }
0x114b   :  { %v4274_v38 = vpop.eup %4273 }
0x114c   :  { %v4276_v41 = vpop.eup %4275  ;;  %v1691_v44 = vmul.f32 %v4274_v38, %v1493_v13 }
0x114d   :  { %v1690_v47 = vmul.f32 %v4276_v41, %v1492_v16 }
0x11ab   :  { %v1697_v39 = vpop.permute.xlu1 %1696 }
0x11ac   :  { %v1701_v40 = vmul.f32 %v4274_v38, %v1697_v39 }
0x11ad   :  { %v1695_v42 = vpop.permute.xlu0 %1694 }
0x11ae   :  { %1706 = vrot.lane.b32.xlu1 %v1701_v40, %s4456_s28  ;;  %v1700_v43 = vmul.f32 %v4276_v41, %v1695_v42 }
0x11b0   :  { %1704 = vrot.lane.b32.xlu0 %v1700_v43, %s4456_s28 }
0x1220   :  { %v1707_v45 = vpop.permute.xlu1 %1706 }
0x1221   :  { %v4787_v46 = vadd.f32 %v1707_v45, %v1691_v44 }
0x1222   :  { %v1705_v48 = vpop.permute.xlu0 %1704 }
0x1223   :  { %4277 = vtanh.f32 %v4787_v46  ;;  %v4790_v49 = vadd.f32 %v1705_v48, %v1690_v47 }
0x1225   :  { %4279 = vtanh.f32 %v4790_v49 }
0x1230   :  { %v4278_v50 = vpop.eup %4277 }
0x1231   :  { %1718 = vrot.lane.b32.xlu1 %v4278_v50, %s4457_s29 }
0x1232   :  { %v4280_v51 = vpop.eup %4279 }
0x1233   :  { %1716 = vrot.lane.b32.xlu0 %v4280_v51, %s4457_s29 }
0x12a3   :  { %v1719_v53 = vpop.permute.xlu1 %1718 }
0x12a4   :  { %v1723_v54 = vmul.f32 %v4274_v38, %v1719_v53  ;;  %v3976_v38 = vpop.f32.mrf.mxu1 }
0x12a5   :  { %v1717_v55 = vpop.permute.xlu0 %1716  ;;  %v1150_v40 = vadd.f32 %v3976_v38, %v4661_v10 }
0x12a6   :  { %1728 = vrot.lane.b32.xlu1 %v1723_v54, %s4458_s2  ;;  %v1722_v56 = vmul.f32 %v4276_v41, %v1717_v55  ;;  %v1144_v42 = vpop.f32.mrf.mxu1 }
0x12a7   :  { %v1154_v43 = vmax.f32 %v1150_v40, 0.0  ;;  %v1145_v44 = vadd.f32 %v4661_v10, %v1144_v42 }
0x12a8   :  { %1726 = vrot.lane.b32.xlu0 %v1722_v56, %s4458_s2 }
0x12a9   :  { %1156 = vst.msk [vmem:[#allocation3 + $0x38] sm:$0xff] %vm275_vm3, %v1154_v43  ;;  %v1153_v48 = vmax.f32 %v1145_v44, 0.0 }
0x12ab   :  { %1155 = vst.msk [vmem:[#allocation3 + $0x30] sm:$0xff] %vm275_vm3, %v1153_v48 }
0x1318   :  { %v1729_v57 = vpop.permute.xlu1 %1728 }
0x1319   :  { %4012 = vmatprep.subr.mxu1 %v1729_v57 }
0x131a   :  { %4013 = vmatpush3.msra.mxu1 %v1729_v57  ;;  %v1727_v58 = vpop.permute.xlu0 %1726 }
0x131b   :  { %4014 = vmatprep.subr.mxu1 %v1727_v58  ;;  %4023 = vmatprep.mubr.msk.f32.mxu0 %vm275_vm3, %v1727_v58 }
0x131c   :  { %4015 = vmatpush3.msra.mxu1 %v1727_v58  ;;  %4024 = vmatmul.mubr.msk.f32.vlgmr.msra.gmra.mxu0 %vm275_vm3, %v1729_v57 }
0x131d   :  { %4034 = vmatpush3.msra.mxu0 %v2046_v52  ;;  %4037 = vmatprep.mubr.msk.f32.mxu0 %vm275_vm3, %v2029_v60 }
0x131e   :  { %4035 = vmatprep.subr.mxu0 %v2045_v59  ;;  %4017 = vmatmul.mubr.msk.f32.vlgmr.msra.gmra.mxu1 %vm275_vm3, %v4646_v9  ;;  %v1812_v9 = vld [vmem:[#allocation2 + $0x78] sm:$0xff] }
0x131f   :  { %4036 = vmatpush3.msra.mxu0 %v2045_v59  ;;  %4030 = vmatprep.mubr.msk.f32.mxu1 %vm275_vm3, %v4637_v0 }
0x1320   :  { %4038 = vmatmul.mubr.msk.f32.vlgmr.msra.gmra.mxu0 %vm275_vm3, %v2030_v61 }
0x1321   :  { %4040 = vmatprep.mubr.msk.f32.mxu0 %vm275_vm3, %v2031_v62  ;;  %v2036_v62 = vld [vmem:[#allocation3 + $0x38] sm:$0xff] }
0x1324   :  { %4041 = vmatmul.mubr.msk.f32.gmra.mxu0 %vm275_vm3, %v2032_v63 }
0x1325   :  { %4043 = vmatprep.mubr.msk.f32.mxu0 %vm275_vm3, %v2033_v1  ;;  %v2035_v1 = vld [vmem:[#allocation3 + $0x30] sm:$0xff] }
0x1328   :  { %4044 = vmatmul.mubr.msk.f32.gmra.mxu0 %vm275_vm3, %v2034_v2 }
0x1329   :  { %4046 = vmatprep.mubr.msk.f32.mxu0 %vm275_vm3, %v2035_v1 }
0x132c   :  { %4047 = vmatmul.mubr.msk.f32.gmra.mxu0 %vm275_vm3, %v2036_v62 }
0x13dc   :  { %v4025_v3 = vpop.f32.mrf.mxu0 }
0x13dd   :  { %v1893_v4 = vadd.f32 %v4025_v3, %v1812_v9 }
0x13de   :  { %v1883_v8 = vpop.f32.mrf.mxu0 }
0x13df   :  { %4281 = vtanh.f32 %v1893_v4  ;;  %v1892_v0 = vadd.f32 %v1883_v8, %v1811_v5  ;;  %v3688_v20 = vmul.f32 -1.442695, %v1893_v4 }
0x13e0   :  { %v4039_v11 = vpop.f32.mrf.mxu0 }
0x13e1   :  { %2241 = vst.msk [vmem:[#allocation2 + $0x8] sm:$0xff] %vm253_vm2, %v4039_v11  ;;  %4283 = vtanh.f32 %v1892_v0  ;;  %v3687_v21 = vmul.f32 -1.442695, %v1892_v0  ;;  %v4865_v11 = vld [vmem:[%s5108_s6] sm:$0xff] }
0x13e2   :  { %v2161_v12 = vpop.f32.mrf.mxu0  ;;  %4285 = vpow2.f32 %v3688_v20 }
0x13e3   :  { %2240 = vst.msk [vmem:[#allocation2] sm:$0xff] %vm253_vm2, %v2161_v12  ;;  %4287 = vpow2.f32 %v3687_v21  ;;  %v4870_v12 = vld [vmem:[%s5106_s4 + $0x8] sm:$0xff] }
0x13e4   :  { %v4042_v13 = vpop.f32.mrf.mxu0 }
0x13e5   :  { %2243 = vst.msk [vmem:[#allocation2 + $0x18] sm:$0xff] %vm253_vm2, %v4042_v13 }
0x13e6   :  { %v2171_v14 = vpop.f32.mrf.mxu0 }
0x13e7   :  { %2242 = vst.msk [vmem:[#allocation2 + $0x10] sm:$0xff] %vm253_vm2, %v2171_v14 }
0x13e8   :  { %v4045_v15 = vpop.f32.mrf.mxu0 }
0x13e9   :  { %2245 = vst.msk [vmem:[#allocation2 + $0x28] sm:$0xff] %vm253_vm2, %v4045_v15 }
0x13ea   :  { %v2181_v16 = vpop.f32.mrf.mxu0 }
0x13eb   :  { %2244 = vst.msk [vmem:[#allocation2 + $0x20] sm:$0xff] %vm253_vm2, %v2181_v16 }
0x13ec   :  { %v4282_v17 = vpop.eup %4281 }
0x13ed   :  { %1914 = vrot.lane.b32.xlu0 %v4282_v17, %s4455_s0 }
0x13ee   :  { %v4284_v18 = vpop.eup %4283 }
0x13ef   :  { %1912 = vrot.lane.b32.xlu1 %v4284_v18, %s4455_s0  ;;  %v4286_v22 = vpop.eup %4285  ;;  %v4430_v18 = vld [vmem:[%s5105_s3] ss:$0 sm:$0xff] }
0x13f0   :  { %v4288_v23 = vpop.eup %4287  ;;  %v1901_v24 = vadd.f32 1.0, %v4286_v22 }
0x13f1   :  { %v1900_v25 = vadd.f32 1.0, %v4288_v23 }
0x13f2   :  { %4289 = vrcp.f32 %v1901_v24  ;;  %v2259_v24 = vld [vmem:[#allocation2 + $0x8] sm:$0xff] }
0x13f3   :  { %4291 = vrcp.f32 %v1900_v25 }
0x13ff   :  { %v4290_v26 = vpop.eup %4289 }
0x1400   :  { %v4292_v29 = vpop.eup %4291  ;;  %v1909_v32 = vmul.f32 %v4290_v26, %v4787_v46  ;;  %v3990_v46 = vpop.f32.mrf.mxu1 }
0x1401   :  { %v1908_v34 = vmul.f32 %v4292_v29, %v4790_v49  ;;  %v1368_v49 = vadd.f32 %v3990_v46, %v4661_v10 }
0x1402   :  { %v1362_v50 = vpop.f32.mrf.mxu1 }
0x1403   :  { %v1372_v51 = vmax.f32 %v1368_v49, 0.0  ;;  %v1363_v52 = vadd.f32 %v4661_v10, %v1362_v50 }
0x1404   :  { %v4004_v53 = vpop.f32.mrf.mxu1 }
0x1405   :  { %1374 = vst.msk [vmem:[#allocation3 + $0x48] sm:$0xff] %vm275_vm3, %v1372_v51  ;;  %v1371_v54 = vmax.f32 %v1363_v52, 0.0  ;;  %v1586_v55 = vadd.f32 %v4004_v53, %v4661_v10 }
0x1406   :  { %v1580_v56 = vpop.f32.mrf.mxu1 }
0x1407   :  { %1373 = vst.msk [vmem:[#allocation3 + $0x40] sm:$0xff] %vm275_vm3, %v1371_v54  ;;  %v1590_v57 = vmax.f32 %v1586_v55, 0.0  ;;  %v1581_v58 = vadd.f32 %v4661_v10, %v1580_v56 }
0x1408   :  { %v4018_v59 = vpop.f32.mrf.mxu1 }
0x1409   :  { %1592 = vst.msk [vmem:[#allocation3 + $0x58] sm:$0xff] %vm275_vm3, %v1590_v57  ;;  %v1589_v60 = vmax.f32 %v1581_v58, 0.0  ;;  %v1804_v61 = vadd.f32 %v4018_v59, %v4661_v10 }
0x140a   :  { %v1798_v63 = vpop.f32.mrf.mxu1 }
0x140b   :  { %1591 = vst.msk [vmem:[#allocation3 + $0x50] sm:$0xff] %vm275_vm3, %v1589_v60  ;;  %v1808_v2 = vmax.f32 %v1804_v61, 0.0  ;;  %v1799_v9 = vadd.f32 %v4661_v10, %v1798_v63  ;;  %v4860_v10 = vld [vmem:[%s5108_s6 + $0x8] sm:$0xff] }
0x140c   :  { %v2038_v4 = vld [vmem:[#allocation3 + $0x48] sm:$0xff] }
0x140d   :  { %1810 = vst.msk [vmem:[#allocation3 + $0x68] sm:$0xff] %vm275_vm3, %v1808_v2  ;;  %v1807_v3 = vmax.f32 %v1799_v9, 0.0 }
0x140e   :  { %v2037_v5 = vld [vmem:[#allocation3 + $0x40] sm:$0xff] }
0x140f   :  { %1809 = vst.msk [vmem:[#allocation3 + $0x60] sm:$0xff] %vm275_vm3, %v1807_v3  ;;  %4049 = vmatprep.mubr.msk.f32.mxu0 %vm275_vm3, %v2037_v5 }
0x1410   :  { %4050 = vmatmul.mubr.msk.f32.gmra.mxu0 %vm275_vm3, %v2038_v4  ;;  %v2040_v14 = vld [vmem:[#allocation3 + $0x58] sm:$0xff] }
0x1412   :  { %v2039_v13 = vld [vmem:[#allocation3 + $0x50] sm:$0xff] }
0x1413   :  { %4052 = vmatprep.mubr.msk.f32.mxu0 %vm275_vm3, %v2039_v13 }
0x1414   :  { %4053 = vmatmul.mubr.msk.f32.gmra.mxu0 %vm275_vm3, %v2040_v14  ;;  %v2042_v16 = vld [vmem:[#allocation3 + $0x68] sm:$0xff]  ;;  %v2389_v14 = vld [vmem:[#allocation2 + $0x10] sm:$0xff] }
0x1416   :  { %v2041_v15 = vld [vmem:[#allocation3 + $0x60] sm:$0xff] }
0x1417   :  { %4055 = vmatprep.mubr.msk.f32.mxu0 %vm275_vm3, %v2041_v15 }
0x1418   :  { %4056 = vmatmul.mubr.msk.f32.gmra.mxu0 %vm275_vm3, %v2042_v16 }
0x145f   :  { %v1915_v27 = vpop.permute.xlu0 %1914 }
0x1460   :  { %v1919_v28 = vmul.f32 %v4290_v26, %v1915_v27 }
0x1461   :  { %v1913_v30 = vpop.permute.xlu1 %1912 }
0x1462   :  { %1924 = vrot.lane.b32.xlu0 %v1919_v28, %s4456_s28  ;;  %v1918_v31 = vmul.f32 %v4292_v29, %v1913_v30  ;;  %v2258_v28 = vld [vmem:[#allocation2] sm:$0xff] }
0x1464   :  { %1922 = vrot.lane.b32.xlu1 %v1918_v31, %s4456_s28  ;;  %v4048_v31 = vpop.f32.mrf.mxu0 }
0x1465   :  { %2247 = vst.msk [vmem:[#allocation2 + $0x38] sm:$0xff] %vm253_vm2, %v4048_v31 }
0x14d4   :  { %v1925_v6 = vpop.permute.xlu0 %1924 }
0x14d5   :  { %v4826_v33 = vadd.f32 %v1925_v6, %v1909_v32 }
0x14d6   :  { %v1923_v35 = vpop.permute.xlu1 %1922 }
0x14d7   :  { %4293 = vtanh.f32 %v4826_v33  ;;  %v4830_v7 = vadd.f32 %v1923_v35, %v1908_v34  ;;  %v2191_v34 = vpop.f32.mrf.mxu0 }
0x14d8   :  { %2246 = vst.msk [vmem:[#allocation2 + $0x30] sm:$0xff] %vm253_vm2, %v2191_v34 }
0x14d9   :  { %4295 = vtanh.f32 %v4830_v7  ;;  %v4051_v35 = vpop.f32.mrf.mxu0 }
0x14da   :  { %2249 = vst.msk [vmem:[#allocation2 + $0x48] sm:$0xff] %vm253_vm2, %v4051_v35 }
0x14e4   :  { %v4294_v36 = vpop.eup %4293 }
0x14e5   :  { %1936 = vrot.lane.b32.xlu0 %v4294_v36, %s4457_s29  ;;  %v4431_v36 = vld [vmem:[%s5106_s4] sm:$0xff] }
0x14e6   :  { %v4296_v37 = vpop.eup %4295 }
0x14e7   :  { %1934 = vrot.lane.b32.xlu1 %v4296_v37, %s4457_s29  ;;  %v2201_v37 = vpop.f32.mrf.mxu0 }
0x14e8   :  { %2248 = vst.msk [vmem:[#allocation2 + $0x40] sm:$0xff] %vm253_vm2, %v2201_v37 }
0x14e9   :  { %v4054_v40 = vpop.f32.mrf.mxu0 }
0x14ea   :  { %2251 = vst.msk [vmem:[#allocation2 + $0x58] sm:$0xff] %vm253_vm2, %v4054_v40 }
0x1557   :  { %v1937_v39 = vpop.permute.xlu0 %1936 }
0x1558   :  { %v1941_v41 = vmul.f32 %v4290_v26, %v1937_v39 }
0x1559   :  { %v1935_v45 = vpop.permute.xlu1 %1934 }
0x155a   :  { %1946 = vrot.lane.b32.xlu0 %v1941_v41, %s4458_s2  ;;  %v1940_v47 = vmul.f32 %v4292_v29, %v1935_v45  ;;  %v2211_v41 = vpop.f32.mrf.mxu0 }
0x155b   :  { %2250 = vst.msk [vmem:[#allocation2 + $0x50] sm:$0xff] %vm253_vm2, %v2211_v41 }
0x155c   :  { %1944 = vrot.lane.b32.xlu1 %v1940_v47, %s4458_s2  ;;  %v4057_v42 = vpop.f32.mrf.mxu0 }
0x155d   :  { %2253 = vst.msk [vmem:[#allocation2 + $0x68] sm:$0xff] %vm253_vm2, %v4057_v42 }
0x155e   :  { %v2221_v43 = vpop.f32.mrf.mxu0 }
0x155f   :  { %2252 = vst.msk [vmem:[#allocation2 + $0x60] sm:$0xff] %vm253_vm2, %v2221_v43 }
0x15cc   :  { %v1947_v8 = vpop.permute.xlu0 %1946 }
0x15cd   :  { %4026 = vmatprep.subr.mxu1 %v1947_v8 }
0x15ce   :  { %4027 = vmatpush3.msra.mxu1 %v1947_v8  ;;  %v1945_v0 = vpop.permute.xlu1 %1944 }
0x15cf   :  { %4028 = vmatprep.subr.mxu1 %v1945_v0 }
0x15d0   :  { %4029 = vmatpush3.msra.mxu1 %v1945_v0 }
0x15d1   :  { %4031 = vmatmul.mubr.msk.f32.vlgmr.msra.gmra.mxu1 %vm275_vm3, %v4870_v12  ;;  %4061 = vmatprep.subr.mxu1 %v4860_v10 }
0x15d2   :  { %4062 = vmatpush3.msra.mxu1 %v4860_v10  ;;  %4065 = vmatprep.mubr.msk.f32.mxu1 %vm275_vm3, %v1945_v0 }
0x15d3   :  { %4063 = vmatprep.subr.mxu1 %v4865_v11 }
0x15d4   :  { %4064 = vmatpush3.msra.mxu1 %v4865_v11 }
0x15d5   :  { %4066 = vmatmul.mubr.msk.f32.vlgmr.msra.gmra.mxu1 %vm275_vm3, %v1947_v8  ;;  %4068 = vmatprep.subr.mxu1 %v4860_v10  ;;  %v2390_v8 = vld [vmem:[#allocation2 + $0x18] sm:$0xff] }
0x15d6   :  { %4069 = vmatpush3.msra.mxu1 %v4860_v10 }
0x15d7   :  { %4070 = vmatprep.subr.mxu1 %v4865_v11 }
0x15d8   :  { %4071 = vmatpush3.msra.mxu1 %v4865_v11 }
0x15d9   :  { %4075 = vmatprep.subr.mxu1 %v4860_v10 }
0x1691   :  { %v4032_v17 = vpop.f32.mrf.mxu1 }
0x1692   :  { %v2022_v20 = vadd.f32 %v4430_v18, %v4032_v17 }
0x1693   :  { %v2016_v21 = vpop.f32.mrf.mxu1 }
0x1694   :  { %v2026_v22 = vmax.f32 %v2022_v20, 0.0  ;;  %v2017_v23 = vadd.f32 %v4430_v18, %v2016_v21 }
0x1695   :  { %v4067_v25 = vpop.f32.mrf.mxu1 }
0x1696   :  { %2028 = vst.msk [vmem:[#allocation3 + $0x78] sm:$0xff] %vm275_vm3, %v2026_v22  ;;  %v2025_v26 = vmax.f32 %v2017_v23, 0.0  ;;  %v2340_v27 = vadd.f32 %v4067_v25, %v2259_v24 }
0x1697   :  { %v2330_v29 = vpop.f32.mrf.mxu1 }
0x1698   :  { %2027 = vst.msk [vmem:[#allocation3 + $0x70] sm:$0xff] %vm275_vm3, %v2025_v26  ;;  %4297 = vtanh.f32 %v2340_v27  ;;  %v2339_v30 = vadd.f32 %v2330_v29, %v2258_v28  ;;  %v3710_v44 = vmul.f32 -1.442695, %v2340_v27 }
0x169a   :  { %4299 = vtanh.f32 %v2339_v30  ;;  %v3709_v45 = vmul.f32 -1.442695, %v2339_v30 }
0x169b   :  { %4301 = vpow2.f32 %v3710_v44 }
0x169c   :  { %4303 = vpow2.f32 %v3709_v45 }
0x169d   :  { %v2044_v6 = vld [vmem:[#allocation3 + $0x78] sm:$0xff] }
0x169f   :  { %v2043_v32 = vld [vmem:[#allocation3 + $0x70] sm:$0xff] }
0x16a0   :  { %4058 = vmatprep.mubr.msk.f32.mxu0 %vm275_vm3, %v2043_v32 }
0x16a1   :  { %4059 = vmatmul.mubr.msk.f32.gmra.mxu0 %vm275_vm3, %v2044_v6 }
0x16a2   :  { %4121 = vmatprep.mubr.msk.f32.mxu0 %vm275_vm3, %v4431_v36 }
0x16a5   :  { %v4298_v38 = vpop.eup %4297 }
0x16a6   :  { %2361 = vrot.lane.b32.xlu1 %v4298_v38, %s4455_s0 }
0x16a7   :  { %v4300_v39 = vpop.eup %4299 }
0x16a8   :  { %2359 = vrot.lane.b32.xlu0 %v4300_v39, %s4455_s0  ;;  %v4302_v46 = vpop.eup %4301 }
0x16a9   :  { %v4304_v47 = vpop.eup %4303  ;;  %v2348_v48 = vadd.f32 1.0, %v4302_v46  ;;  %v2527_v46 = vld [vmem:[#allocation2 + $0x28] sm:$0xff] }
0x16aa   :  { %v2347_v49 = vadd.f32 1.0, %v4304_v47 }
0x16ab   :  { %4305 = vrcp.f32 %v2348_v48 }
0x16ac   :  { %4307 = vrcp.f32 %v2347_v49  ;;  %v2526_v49 = vld [vmem:[#allocation2 + $0x20] sm:$0xff] }
0x16b8   :  { %v4306_v50 = vpop.eup %4305 }
0x16b9   :  { %v4308_v53 = vpop.eup %4307  ;;  %v2356_v58 = vmul.f32 %v4306_v50, %v4826_v33 }
0x16ba   :  { %v2355_v61 = vmul.f32 %v4308_v53, %v4830_v7 }
0x1718   :  { %v2362_v51 = vpop.permute.xlu1 %2361 }
0x1719   :  { %v2366_v52 = vmul.f32 %v4306_v50, %v2362_v51 }
0x171a   :  { %v2360_v54 = vpop.permute.xlu0 %2359 }
0x171b   :  { %2371 = vrot.lane.b32.xlu1 %v2366_v52, %s4456_s28  ;;  %v2365_v55 = vmul.f32 %v4308_v53, %v2360_v54 }
0x171d   :  { %2369 = vrot.lane.b32.xlu0 %v2365_v55, %s4456_s28 }
0x1761   :  { %v4060_v56 = vpop.f32.mrf.mxu0 }
0x1762   :  { %2255 = vst.msk [vmem:[#allocation2 + $0x78] sm:$0xff] %vm253_vm2, %v4060_v56 }
0x1763   :  { %v2231_v57 = vpop.f32.mrf.mxu0 }
0x1764   :  { %2254 = vst.msk [vmem:[#allocation2 + $0x70] sm:$0xff] %vm253_vm2, %v2231_v57 }
0x178d   :  { %v2372_v59 = vpop.permute.xlu1 %2371 }
0x178e   :  { %v2376_v60 = vadd.f32 %v2372_v59, %v2356_v58 }
0x178f   :  { %v2370_v62 = vpop.permute.xlu0 %2369 }
0x1790   :  { %4309 = vtanh.f32 %v2376_v60  ;;  %v2375_v63 = vadd.f32 %v2370_v62, %v2355_v61 }
0x1792   :  { %4311 = vtanh.f32 %v2375_v63 }
0x179d   :  { %v4310_v1 = vpop.eup %4309 }
0x179e   :  { %2383 = vrot.lane.b32.xlu1 %v4310_v1, %s4457_s29 }
0x179f   :  { %v4312_v2 = vpop.eup %4311 }
0x17a0   :  { %2381 = vrot.lane.b32.xlu0 %v4312_v2, %s4457_s29 }
0x1810   :  { %v2384_v9 = vpop.permute.xlu1 %2383 }
0x1811   :  { %v2388_v3 = vmul.f32 %v4306_v50, %v2384_v9 }
0x1812   :  { %v2382_v4 = vpop.permute.xlu0 %2381 }
0x1813   :  { %2395 = vrot.lane.b32.xlu1 %v2388_v3, %s4458_s2  ;;  %v2387_v33 = vmul.f32 %v4308_v53, %v2382_v4 }
0x1815   :  { %2393 = vrot.lane.b32.xlu0 %v2387_v33, %s4458_s2 }
0x1885   :  { %v2396_v7 = vpop.permute.xlu1 %2395 }
0x1887   :  { %v2394_v5 = vpop.permute.xlu0 %2393 }
0x1888   :  { %4072 = vmatprep.mubr.msk.f32.mxu1 %vm275_vm3, %v2394_v5 }
0x1889   :  { %4073 = vmatmul.mubr.msk.f32.vlgmr.msra.gmra.mxu1 %vm275_vm3, %v2396_v7 }
0x188a   :  { %4076 = vmatpush3.msra.mxu1 %v4860_v10 }
0x188b   :  { %4077 = vmatprep.subr.mxu1 %v4865_v11 }
0x188c   :  { %4078 = vmatpush3.msra.mxu1 %v4865_v11 }
0x188d   :  { %4082 = vmatprep.subr.mxu1 %v4860_v10 }
0x1949   :  { %v4074_v0 = vpop.f32.mrf.mxu1 }
0x194a   :  { %v2477_v13 = vadd.f32 %v4074_v0, %v2390_v8 }
0x194b   :  { %v2467_v15 = vpop.f32.mrf.mxu1 }
0x194c   :  { %4313 = vtanh.f32 %v2477_v13  ;;  %v2476_v16 = vadd.f32 %v2467_v15, %v2389_v14  ;;  %v3714_v20 = vmul.f32 -1.442695, %v2477_v13 }
0x194e   :  { %4315 = vtanh.f32 %v2476_v16  ;;  %v3713_v21 = vmul.f32 -1.442695, %v2476_v16 }
0x194f   :  { %4317 = vpow2.f32 %v3714_v20  ;;  %v2664_v20 = vld [vmem:[#allocation2 + $0x38] sm:$0xff] }
0x1950   :  { %4319 = vpow2.f32 %v3713_v21 }
0x1959   :  { %v4314_v17 = vpop.eup %4313 }
0x195a   :  { %2498 = vrot.lane.b32.xlu1 %v4314_v17, %s4455_s0 }
0x195b   :  { %v4316_v18 = vpop.eup %4315 }
0x195c   :  { %2496 = vrot.lane.b32.xlu0 %v4316_v18, %s4455_s0  ;;  %v4318_v22 = vpop.eup %4317 }
0x195d   :  { %v4320_v23 = vpop.eup %4319  ;;  %v2485_v24 = vadd.f32 1.0, %v4318_v22 }
0x195e   :  { %v2484_v25 = vadd.f32 1.0, %v4320_v23  ;;  %v2663_v23 = vld [vmem:[#allocation2 + $0x30] sm:$0xff] }
0x195f   :  { %4321 = vrcp.f32 %v2485_v24 }
0x1960   :  { %4323 = vrcp.f32 %v2484_v25 }
0x196c   :  { %v4322_v26 = vpop.eup %4321 }
0x196d   :  { %v4324_v29 = vpop.eup %4323  ;;  %v2493_v32 = vmul.f32 %v4322_v26, %v2376_v60 }
0x196e   :  { %v2492_v35 = vmul.f32 %v4324_v29, %v2375_v63 }
0x19cc   :  { %v2499_v27 = vpop.permute.xlu1 %2498 }
0x19cd   :  { %v2503_v28 = vmul.f32 %v4322_v26, %v2499_v27 }
0x19ce   :  { %v2497_v30 = vpop.permute.xlu0 %2496 }
0x19cf   :  { %2508 = vrot.lane.b32.xlu1 %v2503_v28, %s4456_s28  ;;  %v2502_v31 = vmul.f32 %v4324_v29, %v2497_v30 }
0x19d1   :  { %2506 = vrot.lane.b32.xlu0 %v2502_v31, %s4456_s28 }
0x1a41   :  { %v2509_v6 = vpop.permute.xlu1 %2508 }
0x1a42   :  { %v2513_v34 = vadd.f32 %v2509_v6, %v2493_v32 }
0x1a43   :  { %v2507_v36 = vpop.permute.xlu0 %2506 }
0x1a44   :  { %4325 = vtanh.f32 %v2513_v34  ;;  %v2512_v37 = vadd.f32 %v2507_v36, %v2492_v35 }
0x1a46   :  { %4327 = vtanh.f32 %v2512_v37 }
0x1a51   :  { %v4326_v38 = vpop.eup %4325 }
0x1a52   :  { %2520 = vrot.lane.b32.xlu1 %v4326_v38, %s4457_s29 }
0x1a53   :  { %v4328_v39 = vpop.eup %4327 }
0x1a54   :  { %2518 = vrot.lane.b32.xlu0 %v4328_v39, %s4457_s29 }
0x1ac4   :  { %v2521_v40 = vpop.permute.xlu1 %2520 }
0x1ac5   :  { %v2525_v41 = vmul.f32 %v4322_v26, %v2521_v40 }
0x1ac6   :  { %v2519_v42 = vpop.permute.xlu0 %2518 }
0x1ac7   :  { %2532 = vrot.lane.b32.xlu1 %v2525_v41, %s4458_s2  ;;  %v2524_v43 = vmul.f32 %v4324_v29, %v2519_v42 }
0x1ac9   :  { %2530 = vrot.lane.b32.xlu0 %v2524_v43, %s4458_s2 }
0x1b39   :  { %v2533_v45 = vpop.permute.xlu1 %2532 }
0x1b3b   :  { %v2531_v44 = vpop.permute.xlu0 %2530 }
0x1b3c   :  { %4079 = vmatprep.mubr.msk.f32.mxu1 %vm275_vm3, %v2531_v44 }
0x1b3d   :  { %4080 = vmatmul.mubr.msk.f32.vlgmr.msra.gmra.mxu1 %vm275_vm3, %v2533_v45 }
0x1b3e   :  { %4083 = vmatpush3.msra.mxu1 %v4860_v10 }
0x1b3f   :  { %4084 = vmatprep.subr.mxu1 %v4865_v11 }
0x1b40   :  { %4085 = vmatpush3.msra.mxu1 %v4865_v11 }
0x1b41   :  { %4089 = vmatprep.subr.mxu1 %v4860_v10 }
0x1bfd   :  { %v4081_v47 = vpop.f32.mrf.mxu1 }
0x1bfe   :  { %v2614_v48 = vadd.f32 %v4081_v47, %v2527_v46 }
0x1bff   :  { %v2604_v50 = vpop.f32.mrf.mxu1 }
0x1c00   :  { %4329 = vtanh.f32 %v2614_v48  ;;  %v2613_v51 = vadd.f32 %v2604_v50, %v2526_v49  ;;  %v3718_v54 = vmul.f32 -1.442695, %v2614_v48 }
0x1c02   :  { %4331 = vtanh.f32 %v2613_v51  ;;  %v3717_v55 = vmul.f32 -1.442695, %v2613_v51 }
0x1c03   :  { %4333 = vpow2.f32 %v3718_v54  ;;  %v2801_v54 = vld [vmem:[#allocation2 + $0x48] sm:$0xff] }
0x1c04   :  { %4335 = vpow2.f32 %v3717_v55 }
0x1c0d   :  { %v4330_v52 = vpop.eup %4329 }
0x1c0e   :  { %2635 = vrot.lane.b32.xlu1 %v4330_v52, %s4455_s0 }
0x1c0f   :  { %v4332_v53 = vpop.eup %4331 }
0x1c10   :  { %2633 = vrot.lane.b32.xlu0 %v4332_v53, %s4455_s0  ;;  %v4334_v56 = vpop.eup %4333 }
0x1c11   :  { %v4336_v57 = vpop.eup %4335  ;;  %v2622_v58 = vadd.f32 1.0, %v4334_v56 }
0x1c12   :  { %v2621_v59 = vadd.f32 1.0, %v4336_v57  ;;  %v2800_v57 = vld [vmem:[#allocation2 + $0x40] sm:$0xff] }
0x1c13   :  { %4337 = vrcp.f32 %v2622_v58 }
0x1c14   :  { %4339 = vrcp.f32 %v2621_v59 }
0x1c20   :  { %v4338_v60 = vpop.eup %4337 }
0x1c21   :  { %v4340_v63 = vpop.eup %4339  ;;  %v2630_v9 = vmul.f32 %v4338_v60, %v2513_v34 }
0x1c22   :  { %v2629_v33 = vmul.f32 %v4340_v63, %v2512_v37 }
0x1c80   :  { %v2636_v61 = vpop.permute.xlu1 %2635 }
0x1c81   :  { %v2640_v62 = vmul.f32 %v4338_v60, %v2636_v61 }
0x1c82   :  { %v2634_v1 = vpop.permute.xlu0 %2633 }
0x1c83   :  { %2645 = vrot.lane.b32.xlu1 %v2640_v62, %s4456_s28  ;;  %v2639_v2 = vmul.f32 %v4340_v63, %v2634_v1 }
0x1c85   :  { %2643 = vrot.lane.b32.xlu0 %v2639_v2, %s4456_s28 }
0x1cf5   :  { %v2646_v3 = vpop.permute.xlu1 %2645 }
0x1cf6   :  { %v2650_v4 = vadd.f32 %v2646_v3, %v2630_v9 }
0x1cf7   :  { %v2644_v5 = vpop.permute.xlu0 %2643 }
0x1cf8   :  { %4341 = vtanh.f32 %v2650_v4  ;;  %v2649_v7 = vadd.f32 %v2644_v5, %v2629_v33 }
0x1cfa   :  { %4343 = vtanh.f32 %v2649_v7 }
0x1d05   :  { %v4342_v8 = vpop.eup %4341 }
0x1d06   :  { %2657 = vrot.lane.b32.xlu1 %v4342_v8, %s4457_s29 }
0x1d07   :  { %v4344_v0 = vpop.eup %4343 }
0x1d08   :  { %2655 = vrot.lane.b32.xlu0 %v4344_v0, %s4457_s29 }
0x1d78   :  { %v2658_v13 = vpop.permute.xlu1 %2657 }
0x1d79   :  { %v2662_v14 = vmul.f32 %v4338_v60, %v2658_v13 }
0x1d7a   :  { %v2656_v15 = vpop.permute.xlu0 %2655 }
0x1d7b   :  { %2669 = vrot.lane.b32.xlu1 %v2662_v14, %s4458_s2  ;;  %v2661_v16 = vmul.f32 %v4340_v63, %v2656_v15 }
0x1d7d   :  { %2667 = vrot.lane.b32.xlu0 %v2661_v16, %s4458_s2 }
0x1ded   :  { %v2670_v18 = vpop.permute.xlu1 %2669 }
0x1def   :  { %v2668_v17 = vpop.permute.xlu0 %2667 }
0x1df0   :  { %4086 = vmatprep.mubr.msk.f32.mxu1 %vm275_vm3, %v2668_v17 }
0x1df1   :  { %4087 = vmatmul.mubr.msk.f32.vlgmr.msra.gmra.mxu1 %vm275_vm3, %v2670_v18 }
0x1df2   :  { %4090 = vmatpush3.msra.mxu1 %v4860_v10 }
0x1df3   :  { %4091 = vmatprep.subr.mxu1 %v4865_v11 }
0x1df4   :  { %4092 = vmatpush3.msra.mxu1 %v4865_v11 }
0x1df5   :  { %4096 = vmatprep.subr.mxu1 %v4860_v10 }
0x1eb1   :  { %v4088_v21 = vpop.f32.mrf.mxu1 }
0x1eb2   :  { %v2751_v22 = vadd.f32 %v4088_v21, %v2664_v20 }
0x1eb3   :  { %v2741_v24 = vpop.f32.mrf.mxu1 }
0x1eb4   :  { %4345 = vtanh.f32 %v2751_v22  ;;  %v2750_v25 = vadd.f32 %v2741_v24, %v2663_v23  ;;  %v3722_v28 = vmul.f32 -1.442695, %v2751_v22 }
0x1eb6   :  { %4347 = vtanh.f32 %v2750_v25  ;;  %v3721_v29 = vmul.f32 -1.442695, %v2750_v25 }
0x1eb7   :  { %4349 = vpow2.f32 %v3722_v28  ;;  %v2938_v28 = vld [vmem:[#allocation2 + $0x58] sm:$0xff] }
0x1eb8   :  { %4351 = vpow2.f32 %v3721_v29 }
0x1ec1   :  { %v4346_v26 = vpop.eup %4345 }
0x1ec2   :  { %2772 = vrot.lane.b32.xlu1 %v4346_v26, %s4455_s0 }
0x1ec3   :  { %v4348_v27 = vpop.eup %4347 }
0x1ec4   :  { %2770 = vrot.lane.b32.xlu0 %v4348_v27, %s4455_s0  ;;  %v4350_v30 = vpop.eup %4349 }
0x1ec5   :  { %v4352_v31 = vpop.eup %4351  ;;  %v2759_v32 = vadd.f32 1.0, %v4350_v30 }
0x1ec6   :  { %v2758_v6 = vadd.f32 1.0, %v4352_v31  ;;  %v2937_v31 = vld [vmem:[#allocation2 + $0x50] sm:$0xff] }
0x1ec7   :  { %4353 = vrcp.f32 %v2759_v32 }
0x1ec8   :  { %4355 = vrcp.f32 %v2758_v6 }
0x1ed4   :  { %v4354_v34 = vpop.eup %4353 }
0x1ed5   :  { %v4356_v37 = vpop.eup %4355  ;;  %v2767_v40 = vmul.f32 %v4354_v34, %v2650_v4 }
0x1ed6   :  { %v2766_v43 = vmul.f32 %v4356_v37, %v2649_v7 }
0x1f34   :  { %v2773_v35 = vpop.permute.xlu1 %2772 }
0x1f35   :  { %v2777_v36 = vmul.f32 %v4354_v34, %v2773_v35 }
0x1f36   :  { %v2771_v38 = vpop.permute.xlu0 %2770 }
0x1f37   :  { %2782 = vrot.lane.b32.xlu1 %v2777_v36, %s4456_s28  ;;  %v2776_v39 = vmul.f32 %v4356_v37, %v2771_v38 }
0x1f39   :  { %2780 = vrot.lane.b32.xlu0 %v2776_v39, %s4456_s28 }
0x1fa9   :  { %v2783_v41 = vpop.permute.xlu1 %2782 }
0x1faa   :  { %v2787_v42 = vadd.f32 %v2783_v41, %v2767_v40 }
0x1fab   :  { %v2781_v44 = vpop.permute.xlu0 %2780 }
0x1fac   :  { %4357 = vtanh.f32 %v2787_v42  ;;  %v2786_v45 = vadd.f32 %v2781_v44, %v2766_v43 }
0x1fae   :  { %4359 = vtanh.f32 %v2786_v45 }
0x1fb9   :  { %v4358_v46 = vpop.eup %4357 }
0x1fba   :  { %2794 = vrot.lane.b32.xlu1 %v4358_v46, %s4457_s29 }
0x1fbb   :  { %v4360_v47 = vpop.eup %4359 }
0x1fbc   :  { %2792 = vrot.lane.b32.xlu0 %v4360_v47, %s4457_s29 }
0x202c   :  { %v2795_v48 = vpop.permute.xlu1 %2794 }
0x202d   :  { %v2799_v49 = vmul.f32 %v4354_v34, %v2795_v48 }
0x202e   :  { %v2793_v50 = vpop.permute.xlu0 %2792 }
0x202f   :  { %2806 = vrot.lane.b32.xlu1 %v2799_v49, %s4458_s2  ;;  %v2798_v51 = vmul.f32 %v4356_v37, %v2793_v50 }
0x2031   :  { %2804 = vrot.lane.b32.xlu0 %v2798_v51, %s4458_s2 }
0x20a1   :  { %v2807_v53 = vpop.permute.xlu1 %2806 }
0x20a3   :  { %v2805_v52 = vpop.permute.xlu0 %2804 }
0x20a4   :  { %4093 = vmatprep.mubr.msk.f32.mxu1 %vm275_vm3, %v2805_v52 }
0x20a5   :  { %4094 = vmatmul.mubr.msk.f32.vlgmr.msra.gmra.mxu1 %vm275_vm3, %v2807_v53 }
0x20a6   :  { %4097 = vmatpush3.msra.mxu1 %v4860_v10 }
0x20a7   :  { %4098 = vmatprep.subr.mxu1 %v4865_v11 }
0x20a8   :  { %4099 = vmatpush3.msra.mxu1 %v4865_v11 }
0x20a9   :  { %4103 = vmatprep.subr.mxu1 %v4860_v10 }
0x2165   :  { %v4095_v55 = vpop.f32.mrf.mxu1 }
0x2166   :  { %v2888_v56 = vadd.f32 %v4095_v55, %v2801_v54 }
0x2167   :  { %v2878_v58 = vpop.f32.mrf.mxu1 }
0x2168   :  { %4361 = vtanh.f32 %v2888_v56  ;;  %v2887_v59 = vadd.f32 %v2878_v58, %v2800_v57  ;;  %v3726_v62 = vmul.f32 -1.442695, %v2888_v56 }
0x216a   :  { %4363 = vtanh.f32 %v2887_v59  ;;  %v3725_v63 = vmul.f32 -1.442695, %v2887_v59 }
0x216b   :  { %4365 = vpow2.f32 %v3726_v62  ;;  %v3075_v62 = vld [vmem:[#allocation2 + $0x68] sm:$0xff] }
0x216c   :  { %4367 = vpow2.f32 %v3725_v63 }
0x2175   :  { %v4362_v60 = vpop.eup %4361 }
0x2176   :  { %2909 = vrot.lane.b32.xlu1 %v4362_v60, %s4455_s0 }
0x2177   :  { %v4364_v61 = vpop.eup %4363 }
0x2178   :  { %2907 = vrot.lane.b32.xlu0 %v4364_v61, %s4455_s0  ;;  %v4366_v1 = vpop.eup %4365 }
0x2179   :  { %v4368_v2 = vpop.eup %4367  ;;  %v2896_v9 = vadd.f32 1.0, %v4366_v1 }
0x217a   :  { %v2895_v3 = vadd.f32 1.0, %v4368_v2  ;;  %v3074_v2 = vld [vmem:[#allocation2 + $0x60] sm:$0xff] }
0x217b   :  { %4369 = vrcp.f32 %v2896_v9 }
0x217c   :  { %4371 = vrcp.f32 %v2895_v3 }
0x2188   :  { %v4370_v4 = vpop.eup %4369 }
0x2189   :  { %v4372_v7 = vpop.eup %4371  ;;  %v2904_v13 = vmul.f32 %v4370_v4, %v2787_v42 }
0x218a   :  { %v2903_v16 = vmul.f32 %v4372_v7, %v2786_v45 }
0x21e8   :  { %v2910_v33 = vpop.permute.xlu1 %2909 }
0x21e9   :  { %v2914_v5 = vmul.f32 %v4370_v4, %v2910_v33 }
0x21ea   :  { %v2908_v8 = vpop.permute.xlu0 %2907 }
0x21eb   :  { %2919 = vrot.lane.b32.xlu1 %v2914_v5, %s4456_s28  ;;  %v2913_v0 = vmul.f32 %v4372_v7, %v2908_v8 }
0x21ed   :  { %2917 = vrot.lane.b32.xlu0 %v2913_v0, %s4456_s28 }
0x225d   :  { %v2920_v14 = vpop.permute.xlu1 %2919 }
0x225e   :  { %v2924_v15 = vadd.f32 %v2920_v14, %v2904_v13 }
0x225f   :  { %v2918_v17 = vpop.permute.xlu0 %2917 }
0x2260   :  { %4373 = vtanh.f32 %v2924_v15  ;;  %v2923_v18 = vadd.f32 %v2918_v17, %v2903_v16 }
0x2262   :  { %4375 = vtanh.f32 %v2923_v18 }
0x226d   :  { %v4374_v20 = vpop.eup %4373 }
0x226e   :  { %2931 = vrot.lane.b32.xlu1 %v4374_v20, %s4457_s29 }
0x226f   :  { %v4376_v21 = vpop.eup %4375 }
0x2270   :  { %2929 = vrot.lane.b32.xlu0 %v4376_v21, %s4457_s29 }
0x22e0   :  { %v2932_v22 = vpop.permute.xlu1 %2931 }
0x22e1   :  { %v2936_v23 = vmul.f32 %v4370_v4, %v2932_v22 }
0x22e2   :  { %v2930_v24 = vpop.permute.xlu0 %2929 }
0x22e3   :  { %2943 = vrot.lane.b32.xlu1 %v2936_v23, %s4458_s2  ;;  %v2935_v25 = vmul.f32 %v4372_v7, %v2930_v24 }
0x22e5   :  { %2941 = vrot.lane.b32.xlu0 %v2935_v25, %s4458_s2 }
0x2355   :  { %v2944_v27 = vpop.permute.xlu1 %2943 }
0x2357   :  { %v2942_v26 = vpop.permute.xlu0 %2941 }
0x2358   :  { %4100 = vmatprep.mubr.msk.f32.mxu1 %vm275_vm3, %v2942_v26 }
0x2359   :  { %4101 = vmatmul.mubr.msk.f32.vlgmr.msra.gmra.mxu1 %vm275_vm3, %v2944_v27 }
0x235a   :  { %4104 = vmatpush3.msra.mxu1 %v4860_v10 }
0x235b   :  { %4105 = vmatprep.subr.mxu1 %v4865_v11 }
0x235c   :  { %4106 = vmatpush3.msra.mxu1 %v4865_v11 }
0x235d   :  { %4110 = vmatprep.subr.mxu1 %v4860_v10 }
0x2419   :  { %v4102_v29 = vpop.f32.mrf.mxu1 }
0x241a   :  { %v3025_v30 = vadd.f32 %v4102_v29, %v2938_v28 }
0x241b   :  { %v3015_v32 = vpop.f32.mrf.mxu1 }
0x241c   :  { %4377 = vtanh.f32 %v3025_v30  ;;  %v3024_v6 = vadd.f32 %v3015_v32, %v2937_v31  ;;  %v3730_v36 = vmul.f32 -1.442695, %v3025_v30 }
0x241e   :  { %4379 = vtanh.f32 %v3024_v6  ;;  %v3729_v37 = vmul.f32 -1.442695, %v3024_v6 }
0x241f   :  { %4381 = vpow2.f32 %v3730_v36 }
0x2420   :  { %4383 = vpow2.f32 %v3729_v37  ;;  %v3211_v37 = vld [vmem:[#allocation2 + $0x70] sm:$0xff] }
0x2429   :  { %v4378_v34 = vpop.eup %4377 }
0x242a   :  { %3046 = vrot.lane.b32.xlu1 %v4378_v34, %s4455_s0  ;;  %v3212_v34 = vld [vmem:[#allocation2 + $0x78] sm:$0xff] }
0x242b   :  { %v4380_v35 = vpop.eup %4379 }
0x242c   :  { %3044 = vrot.lane.b32.xlu0 %v4380_v35, %s4455_s0  ;;  %v4382_v38 = vpop.eup %4381 }
0x242d   :  { %v4384_v39 = vpop.eup %4383  ;;  %v3033_v40 = vadd.f32 1.0, %v4382_v38 }
0x242e   :  { %v3032_v41 = vadd.f32 1.0, %v4384_v39 }
0x242f   :  { %4385 = vrcp.f32 %v3033_v40 }
0x2430   :  { %4387 = vrcp.f32 %v3032_v41 }
0x243c   :  { %v4386_v42 = vpop.eup %4385 }
0x243d   :  { %v4388_v45 = vpop.eup %4387  ;;  %v3041_v48 = vmul.f32 %v4386_v42, %v2924_v15 }
0x243e   :  { %v3040_v51 = vmul.f32 %v4388_v45, %v2923_v18 }
0x249c   :  { %v3047_v43 = vpop.permute.xlu1 %3046 }
0x249d   :  { %v3051_v44 = vmul.f32 %v4386_v42, %v3047_v43 }
0x249e   :  { %v3045_v46 = vpop.permute.xlu0 %3044 }
0x249f   :  { %3056 = vrot.lane.b32.xlu1 %v3051_v44, %s4456_s28  ;;  %v3050_v47 = vmul.f32 %v4388_v45, %v3045_v46 }
0x24a1   :  { %3054 = vrot.lane.b32.xlu0 %v3050_v47, %s4456_s28 }
0x2511   :  { %v3057_v49 = vpop.permute.xlu1 %3056 }
0x2512   :  { %v3061_v50 = vadd.f32 %v3057_v49, %v3041_v48 }
0x2513   :  { %v3055_v52 = vpop.permute.xlu0 %3054 }
0x2514   :  { %4389 = vtanh.f32 %v3061_v50  ;;  %v3060_v53 = vadd.f32 %v3055_v52, %v3040_v51 }
0x2516   :  { %4391 = vtanh.f32 %v3060_v53 }
0x2521   :  { %v4390_v54 = vpop.eup %4389 }
0x2522   :  { %3068 = vrot.lane.b32.xlu1 %v4390_v54, %s4457_s29 }
0x2523   :  { %v4392_v55 = vpop.eup %4391 }
0x2524   :  { %3066 = vrot.lane.b32.xlu0 %v4392_v55, %s4457_s29 }
0x2594   :  { %v3069_v56 = vpop.permute.xlu1 %3068 }
0x2595   :  { %v3073_v57 = vmul.f32 %v4386_v42, %v3069_v56 }
0x2596   :  { %v3067_v58 = vpop.permute.xlu0 %3066 }
0x2597   :  { %3080 = vrot.lane.b32.xlu1 %v3073_v57, %s4458_s2  ;;  %v3072_v59 = vmul.f32 %v4388_v45, %v3067_v58 }
0x2599   :  { %3078 = vrot.lane.b32.xlu0 %v3072_v59, %s4458_s2 }
0x2609   :  { %v3081_v61 = vpop.permute.xlu1 %3080 }
0x260b   :  { %v3079_v60 = vpop.permute.xlu0 %3078 }
0x260c   :  { %4107 = vmatprep.mubr.msk.f32.mxu1 %vm275_vm3, %v3079_v60 }
0x260d   :  { %4108 = vmatmul.mubr.msk.f32.vlgmr.msra.gmra.mxu1 %vm275_vm3, %v3081_v61 }
0x260e   :  { %4111 = vmatpush3.msra.mxu1 %v4860_v10 }
0x260f   :  { %4112 = vmatprep.subr.mxu1 %v4865_v11 }
0x2610   :  { %4113 = vmatpush3.msra.mxu1 %v4865_v11 }
0x2611   :  { %4124 = vmatprep.subr.mxu1 %v4454_v19 }
0x26cd   :  { %v4109_v63 = vpop.f32.mrf.mxu1 }
0x26ce   :  { %v3162_v1 = vadd.f32 %v4109_v63, %v3075_v62 }
0x26cf   :  { %v3152_v9 = vpop.f32.mrf.mxu1 }
0x26d0   :  { %4393 = vtanh.f32 %v3162_v1  ;;  %v3161_v3 = vadd.f32 %v3152_v9, %v3074_v2  ;;  %v3734_v10 = vmul.f32 -1.442695, %v3162_v1 }
0x26d2   :  { %4395 = vtanh.f32 %v3161_v3  ;;  %v3733_v5 = vmul.f32 -1.442695, %v3161_v3 }
0x26d3   :  { %4397 = vpow2.f32 %v3734_v10  ;;  %v3520_v10 = vld [vmem:[%s5110_s8 + $0x68] sm:$0xff] }
0x26d4   :  { %4399 = vpow2.f32 %v3733_v5  ;;  %v3739_v5 = vld [vmem:[%s5109_s7] ss:$0 sm:$0xff] }
0x26dd   :  { %v4394_v4 = vpop.eup %4393 }
0x26de   :  { %3183 = vrot.lane.b32.xlu1 %v4394_v4, %s4455_s0  ;;  %v3522_v4 = vld [vmem:[%s5110_s8 + $0x78] sm:$0xff] }
0x26df   :  { %v4396_v33 = vpop.eup %4395 }
0x26e0   :  { %3181 = vrot.lane.b32.xlu0 %v4396_v33, %s4455_s0  ;;  %v4398_v11 = vpop.eup %4397  ;;  %v3521_v33 = vld [vmem:[%s5110_s8 + $0x70] sm:$0xff] }
0x26e1   :  { %v4400_v7 = vpop.eup %4399  ;;  %v3170_v8 = vadd.f32 1.0, %v4398_v11 }
0x26e2   :  { %v3169_v0 = vadd.f32 1.0, %v4400_v7  ;;  %v3518_v7 = vld [vmem:[%s5110_s8 + $0x58] sm:$0xff] }
0x26e3   :  { %4401 = vrcp.f32 %v3170_v8  ;;  %v3517_v8 = vld [vmem:[%s5110_s8 + $0x50] sm:$0xff] }
0x26e4   :  { %4403 = vrcp.f32 %v3169_v0 }
0x26f0   :  { %v4402_v13 = vpop.eup %4401 }
0x26f1   :  { %v4404_v16 = vpop.eup %4403  ;;  %v3178_v20 = vmul.f32 %v4402_v13, %v3061_v50 }
0x26f2   :  { %v3177_v23 = vmul.f32 %v4404_v16, %v3060_v53 }
0x2750   :  { %v3184_v14 = vpop.permute.xlu1 %3183 }
0x2751   :  { %v3188_v15 = vmul.f32 %v4402_v13, %v3184_v14 }
0x2752   :  { %v3182_v17 = vpop.permute.xlu0 %3181 }
0x2753   :  { %3193 = vrot.lane.b32.xlu1 %v3188_v15, %s4456_s28  ;;  %v3187_v18 = vmul.f32 %v4404_v16, %v3182_v17  ;;  %v3516_v15 = vld [vmem:[%s5110_s8 + $0x48] sm:$0xff]  ;;  %v3514_v17 = vld [vmem:[%s5110_s8 + $0x38] sm:$0xff] }
0x2755   :  { %3191 = vrot.lane.b32.xlu0 %v3187_v18, %s4456_s28  ;;  %v3513_v18 = vld [vmem:[%s5110_s8 + $0x30] sm:$0xff] }
0x27c5   :  { %v3194_v21 = vpop.permute.xlu1 %3193 }
0x27c6   :  { %v3198_v22 = vadd.f32 %v3194_v21, %v3178_v20  ;;  %v3512_v20 = vld [vmem:[%s5110_s8 + $0x28] sm:$0xff]  ;;  %v3511_v21 = vld [vmem:[%s5110_s8 + $0x20] sm:$0xff] }
0x27c7   :  { %v3192_v24 = vpop.permute.xlu0 %3191 }
0x27c8   :  { %4405 = vtanh.f32 %v3198_v22  ;;  %v3197_v25 = vadd.f32 %v3192_v24, %v3177_v23  ;;  %v3509_v23 = vld [vmem:[%s5110_s8 + $0x10] sm:$0xff]  ;;  %v3508_v24 = vld [vmem:[%s5110_s8 + $0x8] sm:$0xff] }
0x27ca   :  { %4407 = vtanh.f32 %v3197_v25 }
0x27d5   :  { %v4406_v26 = vpop.eup %4405 }
0x27d6   :  { %3205 = vrot.lane.b32.xlu1 %v4406_v26, %s4457_s29 }
0x27d7   :  { %v4408_v27 = vpop.eup %4407 }
0x27d8   :  { %3203 = vrot.lane.b32.xlu0 %v4408_v27, %s4457_s29 }
0x2848   :  { %v3206_v28 = vpop.permute.xlu1 %3205 }
0x2849   :  { %v3210_v29 = vmul.f32 %v4402_v13, %v3206_v28 }
0x284a   :  { %v3204_v30 = vpop.permute.xlu0 %3203 }
0x284b   :  { %3217 = vrot.lane.b32.xlu1 %v3210_v29, %s4458_s2  ;;  %v3209_v31 = vmul.f32 %v4404_v16, %v3204_v30  ;;  %v3515_v16 = vld [vmem:[%s5110_s8 + $0x40] sm:$0xff] }
0x284d   :  { %3215 = vrot.lane.b32.xlu0 %v3209_v31, %s4458_s2 }
0x28bd   :  { %v3218_v6 = vpop.permute.xlu1 %3217 }
0x28bf   :  { %v3216_v32 = vpop.permute.xlu0 %3215 }
0x28c0   :  { %4114 = vmatprep.mubr.msk.f32.mxu1 %vm275_vm3, %v3216_v32 }
0x28c1   :  { %4115 = vmatmul.mubr.msk.f32.vlgmr.msra.gmra.mxu1 %vm275_vm3, %v3218_v6 }
0x28c2   :  { %4125 = vmatpush3.msra.mxu1 %v3522_v4  ;;  %4156 = vmatprep.mubr.msk.f32.mxu1 %vm4461_vm5, %v4454_v19 }
0x28c3   :  { %4126 = vmatprep.subr.mxu1 %v4454_v19 }
0x28c4   :  { %4127 = vmatpush3.msra.mxu1 %v3521_v33 }
0x28c5   :  { %4128 = vmatprep.subr.mxu1 %v4454_v19 }
0x28c6   :  { %4129 = vmatpush3.msra.mxu1 %v3520_v10 }
0x28c7   :  { %4130 = vmatprep.subr.mxu1 %v4454_v19 }
0x2981   :  { %v4116_v35 = vpop.f32.mrf.mxu1 }
0x2982   :  { %v3299_v36 = vadd.f32 %v4116_v35, %v3212_v34 }
0x2983   :  { %v3289_v38 = vpop.f32.mrf.mxu1 }
0x2984   :  { %4409 = vtanh.f32 %v3299_v36  ;;  %v3298_v39 = vadd.f32 %v3289_v38, %v3211_v37  ;;  %v3738_v42 = vmul.f32 -1.442695, %v3299_v36 }
0x2986   :  { %4411 = vtanh.f32 %v3298_v39  ;;  %v3737_v43 = vmul.f32 -1.442695, %v3298_v39 }
0x2987   :  { %4413 = vpow2.f32 %v3738_v42 }
0x2988   :  { %4415 = vpow2.f32 %v3737_v43 }
0x2991   :  { %v4410_v40 = vpop.eup %4409 }
0x2992   :  { %3320 = vrot.lane.b32.xlu0 %v4410_v40, %s4455_s0  ;;  %v3742_v40 = vld [vmem:[%s5111_s9] ss:$0 sm:$0xff] }
0x2993   :  { %v4412_v41 = vpop.eup %4411 }
0x2994   :  { %3318 = vrot.lane.b32.xlu1 %v4412_v41, %s4455_s0  ;;  %v4414_v44 = vpop.eup %4413 }
0x2995   :  { %v4416_v45 = vpop.eup %4415  ;;  %v3307_v46 = vadd.f32 1.0, %v4414_v44 }
0x2996   :  { %v3306_v47 = vadd.f32 1.0, %v4416_v45 }
0x2997   :  { %4417 = vrcp.f32 %v3307_v46 }
0x2998   :  { %4419 = vrcp.f32 %v3306_v47 }
0x29a4   :  { %v4418_v48 = vpop.eup %4417 }
0x29a5   :  { %v4420_v51 = vpop.eup %4419  ;;  %v3315_v54 = vmul.f32 %v4418_v48, %v3198_v22  ;;  %v3510_v22 = vld [vmem:[%s5110_s8 + $0x18] sm:$0xff] }
0x29a6   :  { %v3314_v57 = vmul.f32 %v4420_v51, %v3197_v25  ;;  %v3507_v25 = vld [vmem:[%s5110_s8] sm:$0xff] }
0x2a04   :  { %v3321_v49 = vpop.permute.xlu0 %3320 }
0x2a05   :  { %v3325_v50 = vmul.f32 %v4418_v48, %v3321_v49 }
0x2a06   :  { %v3319_v52 = vpop.permute.xlu1 %3318 }
0x2a07   :  { %3330 = vrot.lane.b32.xlu0 %v3325_v50, %s4456_s28  ;;  %v3324_v53 = vmul.f32 %v4420_v51, %v3319_v52 }
0x2a09   :  { %3328 = vrot.lane.b32.xlu1 %v3324_v53, %s4456_s28 }
0x2a79   :  { %v3331_v55 = vpop.permute.xlu0 %3330 }
0x2a7a   :  { %v3335_v56 = vadd.f32 %v3331_v55, %v3315_v54 }
0x2a7b   :  { %v3329_v58 = vpop.permute.xlu1 %3328 }
0x2a7c   :  { %4421 = vtanh.f32 %v3335_v56  ;;  %v3334_v59 = vadd.f32 %v3329_v58, %v3314_v57 }
0x2a7e   :  { %4423 = vtanh.f32 %v3334_v59 }
0x2a89   :  { %v4422_v60 = vpop.eup %4421 }
0x2a8a   :  { %3342 = vrot.lane.b32.xlu0 %v4422_v60, %s4457_s29 }
0x2a8b   :  { %v4424_v61 = vpop.eup %4423 }
0x2a8c   :  { %3340 = vrot.lane.b32.xlu1 %v4424_v61, %s4457_s29 }
0x2afc   :  { %v3343_v62 = vpop.permute.xlu0 %3342 }
0x2afd   :  { %v3347_v63 = vmul.f32 %v4418_v48, %v3343_v62 }
0x2afe   :  { %v3341_v1 = vpop.permute.xlu1 %3340 }
0x2aff   :  { %3359 = vrot.lane.b32.xlu0 %v3347_v63, %s4458_s2  ;;  %v3346_v2 = vmul.f32 %v4420_v51, %v3341_v1 }
0x2b01   :  { %3357 = vrot.lane.b32.xlu1 %v3346_v2, %s4458_s2 }
0x2b71   :  { %v3360_v9 = vpop.permute.xlu0 %3359 }
0x2b72   :  { %4117 = vmatprep.subr.mxu0 %v3360_v9 }
0x2b73   :  { %4118 = vmatpush3.msra.mxu0 %v3360_v9  ;;  %v3358_v3 = vpop.permute.xlu1 %3357 }
0x2b74   :  { %4119 = vmatprep.subr.mxu0 %v3358_v3 }
0x2b75   :  { %4120 = vmatpush3.msra.mxu0 %v3358_v3 }
0x2b76   :  { %4122 = vmatmul.mubr.msk.f32.vlgmr.msra.gmra.mxu0 %vm275_vm3, %v4870_v12  ;;  %v3519_v12 = vld [vmem:[%s5110_s8 + $0x60] sm:$0xff] }
0x2b77   :  { %4131 = vmatpush3.msra.mxu1 %v3519_v12 }
0x2b78   :  { %4132 = vmatprep.subr.mxu1 %v4454_v19 }
0x2b79   :  { %4133 = vmatpush3.msra.mxu1 %v3518_v7 }
0x2b7a   :  { %4134 = vmatprep.subr.mxu1 %v4454_v19 }
0x2b7b   :  { %4135 = vmatpush3.msra.mxu1 %v3517_v8 }
0x2b7c   :  { %4136 = vmatprep.subr.mxu1 %v4454_v19 }
0x2b7d   :  { %4137 = vmatpush3.msra.mxu1 %v3516_v15 }
0x2b7e   :  { %4138 = vmatprep.subr.mxu1 %v4454_v19 }
0x2b7f   :  { %4139 = vmatpush3.msra.mxu1 %v3515_v16 }
0x2b80   :  { %4140 = vmatprep.subr.mxu1 %v4454_v19 }
0x2b81   :  { %4141 = vmatpush3.msra.mxu1 %v3514_v17 }
0x2b82   :  { %4142 = vmatprep.subr.mxu1 %v4454_v19 }
0x2b83   :  { %4143 = vmatpush3.msra.mxu1 %v3513_v18 }
0x2b84   :  { %4144 = vmatprep.subr.mxu1 %v4454_v19 }
0x2b85   :  { %4145 = vmatpush3.msra.mxu1 %v3512_v20 }
0x2b86   :  { %4146 = vmatprep.subr.mxu1 %v4454_v19 }
0x2b87   :  { %4147 = vmatpush3.msra.mxu1 %v3511_v21 }
0x2b88   :  { %4148 = vmatprep.subr.mxu1 %v4454_v19 }
0x2b89   :  { %4149 = vmatpush3.msra.mxu1 %v3510_v22 }
0x2b8a   :  { %4150 = vmatprep.subr.mxu1 %v4454_v19 }
0x2b8b   :  { %4151 = vmatpush3.msra.mxu1 %v3509_v23 }
0x2b8c   :  { %4152 = vmatprep.subr.mxu1 %v4454_v19 }
0x2b8d   :  { %4153 = vmatpush3.msra.mxu1 %v3508_v24 }
0x2b8e   :  { %4154 = vmatprep.subr.mxu1 %v4454_v19 }
0x2b8f   :  { %4155 = vmatpush3.msra.mxu1 %v3507_v25 }
0x2c36   :  { %v4123_v11 = vpop.f32.mrf.mxu0 }
0x2c37   :  { %v3435_v0 = vadd.f32 %v4123_v11, %v3739_v5 }
0x2c38   :  { %v3429_v13 = vpop.f32.mrf.mxu0 }
0x2c39   :  { %v3430_v14 = vadd.f32 %v3739_v5, %v3429_v13  ;;  %3478 = vrot.lane.b32.xlu1 %v3435_v0, %s4456_s28  ;;  %3476 = vst.msk [vmem:[#allocation4 + $0x1] sm:$0x1] %vm3438_vm4, %v3435_v0 }
0x2c3b   :  { %3441 = vrot.lane.b32.xlu0 %v3430_v14, %s4456_s28  ;;  %3439 = vst.msk [vmem:[#allocation4] sm:$0x1] %vm3438_vm4, %v3430_v14  ;;  %s4459_s28 = smov 48  }
0x2c3d   :  { %3482 = vrot.lane.b32.xlu1 %v3435_v0, %s4457_s29 }
0x2c3f   :  { %3446 = vrot.lane.b32.xlu0 %v3430_v14, %s4457_s29  ;;  %s4460_s29 = smov 64  }
0x2c41   :  { %3486 = vrot.lane.b32.xlu1 %v3435_v0, %s4459_s28 }
0x2c43   :  { %3451 = vrot.lane.b32.xlu0 %v3430_v14, %s4459_s28 }
0x2c45   :  { %3490 = vrot.lane.b32.xlu1 %v3435_v0, %s4460_s29 }
0x2c47   :  { %3456 = vrot.lane.b32.xlu0 %v3430_v14, %s4460_s29 }
0x2c49   :  { %3494 = vrot.lane.b32.xlu1 %v3435_v0, %s4458_s2 }
0x2c4b   :  { %3461 = vrot.lane.b32.xlu0 %v3430_v14, %s4458_s2  ;;  %s4463_s2 = smov [#allocation5]  }
0x2c4c   :  { %s3619_s18 = sshll.u32 %s4463_s2, 4  ;;  %s3620_s18 = int_to_ptr.vmem [resolvable:$true] %s3619_s18 }
0x2c4d   :  { %3498 = vrot.lane.b32.xlu1 %v3435_v0, %s4455_s0  ;;  %s4432_s9 = scalar_lea.vmem %s3620_s18, 32  ;;  %p4437_p1 = scmp.lt.s32.totalorder %s3620_s18, %s3620_s18 }
0x2c4e   :  { %p4433_p0 = scmp.ne.s32.totalorder %s3620_s18, %s4432_s9  ;;  %p4438_p2 = scmp.lt.s32.totalorder %s4432_s9, %s4432_s9 }
0x2c4f   :  { %3466 = vrot.lane.b32.xlu0 %v3430_v14, %s4455_s0 }
0x2c50   :  { %p4439_p3 = por %p4438_p2, %p4437_p1 }
0x2c51   :  { %3502 = vrot.lane.b32.xlu1 %v3435_v0, %s4462_s17 }
0x2c52   :  { %p4440_p4 = pnand %p4439_p3, %p4433_p0 }
0x2c53   :  { %3471 = vrot.lane.b32.xlu0 %v3430_v14, %s4462_s17 }
0x2cab   :  { %v3479_v26 = vpop.permute.xlu1 %3478 }
0x2cac   :  { %3481 = vst.msk [vmem:[#allocation4] sm:$0x2] %vm3444_vm6, %v3479_v26 }
0x2cad   :  { %v3442_v27 = vpop.permute.xlu0 %3441 }
0x2cae   :  { %3445 = vst.msk [vmem:[#allocation4 - $0x1] sm:$0x2] %vm3444_vm6, %v3442_v27 }
0x2caf   :  { %v3483_v28 = vpop.permute.xlu1 %3482 }
0x2cb0   :  { %3485 = vst.msk [vmem:[#allocation4 - $0x1] sm:$0x4] %vm3449_vm7, %v3483_v28 }
0x2cb1   :  { %v3447_v29 = vpop.permute.xlu0 %3446 }
0x2cb2   :  { %3450 = vst.msk [vmem:[#allocation4 - $0x2] sm:$0x4] %vm3449_vm7, %v3447_v29 }
0x2cb3   :  { %v3487_v19 = vpop.permute.xlu1 %3486 }
0x2cb4   :  { %3489 = vst.msk [vmem:[#allocation4 - $0x2] sm:$0x8] %vm3454_vm8, %v3487_v19 }
0x2cb5   :  { %v3452_v30 = vpop.permute.xlu0 %3451 }
0x2cb6   :  { %3455 = vst.msk [vmem:[#allocation4 - $0x3] sm:$0x8] %vm3454_vm8, %v3452_v30 }
0x2cb7   :  { %v3491_v31 = vpop.permute.xlu1 %3490 }
0x2cb8   :  { %3493 = vst.msk [vmem:[#allocation4 - $0x3] sm:$0x10] %vm3459_vm9, %v3491_v31 }
0x2cb9   :  { %v3457_v32 = vpop.permute.xlu0 %3456 }
0x2cba   :  { %3460 = vst.msk [vmem:[#allocation4 - $0x4] sm:$0x10] %vm3459_vm9, %v3457_v32 }
0x2cbb   :  { %v3495_v6 = vpop.permute.xlu1 %3494 }
0x2cbc   :  { %3497 = vst.msk [vmem:[#allocation4 - $0x4] sm:$0x20] %vm3464_vm10, %v3495_v6 }
0x2cbd   :  { %v3462_v34 = vpop.permute.xlu0 %3461 }
0x2cbe   :  { %3465 = vst.msk [vmem:[#allocation4 - $0x5] sm:$0x20] %vm3464_vm10, %v3462_v34 }
0x2cbf   :  { %v3499_v35 = vpop.permute.xlu1 %3498 }
0x2cc0   :  { %3501 = vst.msk [vmem:[#allocation4 - $0x5] sm:$0x40] %vm3469_vm11, %v3499_v35 }
0x2cc1   :  { %v3467_v36 = vpop.permute.xlu0 %3466 }
0x2cc2   :  { %3470 = vst.msk [vmem:[#allocation4 - $0x6] sm:$0x40] %vm3469_vm11, %v3467_v36 }
0x2cc3   :  { %v3503_v37 = vpop.permute.xlu1 %3502 }
0x2cc4   :  { %3505 = vst.msk [vmem:[#allocation4 - $0x6] sm:$0x80] %vm3474_vm12, %v3503_v37 }
0x2cc5   :  { %v3472_v38 = vpop.permute.xlu0 %3471 }
0x2cc6   :  { %3475 = vst.msk [vmem:[#allocation4 - $0x7] sm:$0x80] %vm3474_vm12, %v3472_v38 }
0x2ccd   :  { %v3506_v39 = vld [vmem:[#allocation4] sm:$0x3] }
0x2cce   :  { %4157 = vmatmul.mubr.f32.vlgmr.msra.gmra.mxu1 %v3506_v39 }
0x2d8e   :  { %v3596_v41 = vpop.f32.mrf.mxu1 }
0x2d8f   :  { %v3597_v42 = vadd.f32 %v3742_v40, %v3596_v41 }
0x2d90   :  { %v4158_v43 = vpop.f32.mrf.mxu1 }
0x2d91   :  { %v3601_v44 = vsel %vm3600_vm13, %v3597_v42, -inf }
0x2d92   :  { %3602 = vmax.xlane.f32.xlu0 %v3601_v44 }
0x2e1b   :  { %v3603_v45 = vpop.xlane.xlu0 %3602 }
0x2e1c   :  { %v3604_v46 = vsub.f32 %v3597_v42, %v3603_v45 }
0x2e1e   :  { %v3605_v47 = vmul.f32 1.442695, %v3604_v46 }
0x2e20   :  { %4425 = vpow2.f32 %v3605_v47 }
0x2e2d   :  { %v4426_v48 = vpop.eup %4425 }
0x2e2e   :  { %v3607_v49 = vsel %vm3600_vm13, %v4426_v48, 0.0 }
0x2e2f   :  { %3608 = vadd.xlane.f32.xlu1 %v3607_v49 }
0x2eb8   :  { %v3609_v50 = vpop.xlane.xlu1 %3608 }
0x2eb9   :  { %4427 = vrcp.f32 %v3609_v50 }
0x2ec6   :  { %v4428_v51 = vpop.eup %4427 }
0x2ec7   :  { %v3611_v52 = vmul.f32 %v4428_v51, %v4426_v48 }
0x2ec9   :  { %3612 = vst.msk [vmem:[#allocation5] sm:$0x3] %vm3600_vm13, %v3611_v52 }
0x2eca   :  { %4443 = shalt.err (!%p4440_p4)
}
0x2ecb   :  { %3622 = dma.vmem_to_hbm [thread:$0]  %s3620_s18, 32, %s5112_s10, [#allocation6]  }
0x2ecc   :  { %4452 = dma.done.wait [#allocation6], 32  }
0x2ecd   :  { %4453 = vsyncadd [#allocation6], 4294967264 }
0x2ece   :  { %3626 = vsyncpa [#allocation6], 1 }

</bundles_post_ra>
